<compile_context>
chip_gen: v6e
topology: v6e:2x2x1
jax: 0.10.0
libtpu: 0.0.40
codegen_flags: <defaults>
</compile_context>

<pallas_src>
import functools

import jax
import jax.numpy as jnp
from jax import lax
from jax.experimental import pallas as pl
from jax.experimental.pallas import tpu as pltpu


# _FOLD_GROUPS[a][r] = set of 3x3 kernel rows (kh) folded into 2x2 tap row r for
# output-row parity a (same table used for columns with (b, s, kw)).
_FOLD_GROUPS = (((0,), (1, 2)), ((0, 1), (2,)))


def _fold_weights(weight):
    """(Cout, Cin, 3, 3) OIHW -> phase-folded (2, 2, 2, 2, Cin, Cout) [a,b,r,s,ci,co]."""
    wt = jnp.transpose(weight, (2, 3, 1, 0)).astype(jnp.float32)  # (3, 3, Cin, Cout)
    out_a = []
    for a in range(2):
        out_b = []
        for b in range(2):
            out_r = []
            for r in range(2):
                out_s = []
                for s in range(2):
                    acc = jnp.zeros(wt.shape[2:], jnp.float32)
                    for kh in _FOLD_GROUPS[a][r]:
                        for kw in _FOLD_GROUPS[b][s]:
                            acc = acc + wt[kh, kw]
                    out_s.append(acc)
                out_r.append(jnp.stack(out_s, 0))
            out_b.append(jnp.stack(out_r, 0))
        out_a.append(jnp.stack(out_b, 0))
    return jnp.stack(out_a, 0)


def _upconv_kernel_1k(x_ref, w_ref, b_ref, o_ref, *, th, w):
    """Single Cin-tile variant: no reduction axis, no scratch, stream to o_ref."""
    # x_ref: (1, 1, th+2, w+2, cit)   w_ref: (2, 2, 1, 4*cit, ct)
    # b_ref: (1, ct)                  o_ref: (1, 1, 2, 2, th*w, ct)
    xb = x_ref[0, 0]
    cit = xb.shape[-1]
    hw = th * w
    bias = b_ref[...]                                  # (1, ct) f32
    for a in range(2):                                 # output-row parity
        for b in range(2):                             # output-col parity
            slabs = [xb[a + r:a + r + th, b + s:b + s + w, :]
                     for r in range(2) for s in range(2)]
            patch = jnp.concatenate(slabs, axis=-1).reshape(hw, 4 * cit)
            acc = jnp.dot(patch, w_ref[a, b, 0],
                          preferred_element_type=jnp.float32)
            o_ref[0, 0, a, b] = (acc + bias).astype(o_ref.dtype)


def _upconv_kernel_nk(x_ref, w_ref, b_ref, o_ref, acc_ref, *, th, w):
    """Multi Cin-tile variant: Cin tiles are the trailing ("arbitrary") grid axis."""
    ki = pl.program_id(3)

    @pl.when(ki == 0)
    def _init():
        acc_ref[...] = jnp.zeros_like(acc_ref)

    xb = x_ref[0, 0]
    cit = xb.shape[-1]
    hw = th * w
    for a in range(2):
        for b in range(2):
            slabs = [xb[a + r:a + r + th, b + s:b + s + w, :]
                     for r in range(2) for s in range(2)]
            patch = jnp.concatenate(slabs, axis=-1).reshape(hw, 4 * cit)
            acc_ref[a, b] += jnp.dot(patch, w_ref[a, b, 0],
                                     preferred_element_type=jnp.float32)

    @pl.when(ki == pl.num_programs(3) - 1)
    def _store():
        o_ref[0, 0] = (acc_ref[...] + b_ref[...]).astype(o_ref.dtype)


def _round_up(v, m):
    return (v + m - 1) // m * m


def _pick_th(h, w, cit, ct, n_ci, in_bytes, out_bytes, budget_bytes):
    """Largest divisor of h whose double-buffered blocks fit the VMEM budget."""
    def footprint(th):
        x_blk = (th + 2) * (w + 2) * cit * in_bytes
        w_blk = 2 * 2 * 4 * cit * ct * in_bytes
        o_blk = 2 * 2 * th * w * ct * out_bytes
        acc = 2 * 2 * th * w * ct * 4 if n_ci > 1 else 0
        bias = ct * 4
        return 2 * (x_blk + w_blk + o_blk + bias) + acc   # 2x = double buffering

    divs = [d for d in range(h, 0, -1) if h % d == 0]
    for th in divs:
        if footprint(th) <= budget_bytes:
            return th, footprint(th)
    return divs[-1], footprint(divs[-1])


def upsample_forward(x, weight, bias, with_conv=True, compute_dtype=jnp.bfloat16):
    """2x nearest upsample + optional 3x3 SAME conv (NCHW in/out)."""
    n, c, h, w = x.shape
    if not with_conv:
        return jnp.repeat(jnp.repeat(x, 2, axis=2), 2, axis=3)

    cout, cin = weight.shape[0], weight.shape[1]
    assert cin == c
    cd = jnp.float32 if compute_dtype is None else compute_dtype
    in_bytes = jnp.dtype(cd).itemsize
    out_bytes = jnp.dtype(x.dtype).itemsize

    # --- channel padding & tiling (lane-dense output, 128/256-wide tiles) ---
    cin_p = _round_up(cin, 128)
    cout_p = _round_up(cout, 128)
    cit = 256 if cin_p % 256 == 0 else 128     # v5e may prefer 128; fine either way
    ct = 256 if cout_p % 256 == 0 else 128
    n_ci = cin_p // cit
    n_co = cout_p // ct

    # --- spatial-row tiling (budget well under v7x's 64 MiB VMEM) ---
    th, fp = _pick_th(h, w, cit, ct, n_ci, in_bytes, out_bytes,
                      budget_bytes=36 << 20)
    n_h = h // th
    hw = th * w
    vmem_limit = int(min(max(fp + (8 << 20), 24 << 20), 60 << 20))

    # --- wrapper-side layout plumbing (single pass each; XLA fuses pad+transpose) ---
    x_nhwc = jnp.transpose(x, (0, 2, 3, 1)).astype(cd)
    x_pad = jnp.pad(x_nhwc, ((0, 0), (1, 1), (1, 1), (0, cin_p - cin)))
    if n_h == 1:
        x_t = x_pad[:, None]                                   # (n, 1, h+2, w+2, cin_p)
    else:                                                       # materialize 2-row halos
        x_t = jnp.stack([x_pad[:, i * th:i * th + th + 2] for i in range(n_h)], axis=1)

    # Folded weights, K-fused per Cin tile: (2, 2, n_ci, 4*cit, cout_p).
    w_fold = _fold_weights(weight)                              # (2,2,2,2,cin,cout) f32
    w_fold = jnp.pad(w_fold, ((0, 0),) * 4 + ((0, cin_p - cin), (0, cout_p - cout)))
    w5 = (w_fold.reshape(2, 2, 2, 2, n_ci, cit, cout_p)
                .transpose(0, 1, 4, 2, 3, 5, 6)
                .reshape(2, 2, n_ci, 4 * cit, cout_p)
                .astype(cd))
    b_row = jnp.pad(bias.astype(jnp.float32), (0, cout_p - cout)).reshape(1, cout_p)

    out_shape = jax.ShapeDtypeStruct((n, n_h, 2, 2, hw, cout_p), x.dtype)

    if n_ci == 1:
        kernel = functools.partial(_upconv_kernel_1k, th=th, w=w)
        grid = (n, n_h, n_co)
        in_specs = [
            pl.BlockSpec((1, 1, th + 2, w + 2, cit),
                         lambda ni, hi, co: (ni, hi, 0, 0, 0)),
            pl.BlockSpec((2, 2, 1, 4 * cit, ct),
                         lambda ni, hi, co: (0, 0, 0, 0, co)),
            pl.BlockSpec((1, ct), lambda ni, hi, co: (0, co)),
        ]
        out_specs = pl.BlockSpec((1, 1, 2, 2, hw, ct),
                                 lambda ni, hi, co: (ni, hi, 0, 0, 0, co))
        scratch = []
        dims = ("parallel", "parallel", "parallel")
    else:
        kernel = functools.partial(_upconv_kernel_nk, th=th, w=w)
        grid = (n, n_h, n_co, n_ci)
        in_specs = [
            pl.BlockSpec((1, 1, th + 2, w + 2, cit),
                         lambda ni, hi, co, ki: (ni, hi, 0, 0, ki)),
            pl.BlockSpec((2, 2, 1, 4 * cit, ct),
                         lambda ni, hi, co, ki: (0, 0, ki, 0, co)),
            pl.BlockSpec((1, ct), lambda ni, hi, co, ki: (0, co)),
        ]
        out_specs = pl.BlockSpec((1, 1, 2, 2, hw, ct),
                                 lambda ni, hi, co, ki: (ni, hi, 0, 0, 0, co))
        scratch = [pltpu.VMEM((2, 2, hw, ct), jnp.float32)]
        dims = ("parallel", "parallel", "parallel", "arbitrary")

    out_ph = pl.pallas_call(
        kernel,
        out_shape=out_shape,
        grid=grid,
        in_specs=in_specs,
        out_specs=out_specs,
        scratch_shapes=scratch,
        compiler_params=pltpu.CompilerParams(
            dimension_semantics=dims, vmem_limit_bytes=vmem_limit),
    )(x_t, w5, b_row)

    # Phase de-interleave: out_ph[n, hi, a, b, i*w+j, co] -> y[n, co, 2*(hi*th+i)+a, 2j+b].
    y = out_ph.reshape(n, n_h, 2, 2, th, w, cout_p)
    y = y.transpose(0, 6, 1, 4, 2, 5, 3).reshape(n, cout_p, 2 * h, 2 * w)
    return y[:, :cout]


if __name__ == "__main__":
    key = jax.random.PRNGKey(0)
    kx, kw, kb = jax.random.split(key, 3)

    N, C, H, W = 2, 4, 16, 16
    x = jax.random.normal(kx, (N, C, H, W), jnp.float32)

    # Deterministic Conv2d-style init: U(-1/sqrt(fan_in), 1/sqrt(fan_in))
    fan_in = C * 3 * 3
    bound = 1.0 / (fan_in ** 0.5)
    weight = jax.random.uniform(kw, (C, C, 3, 3), jnp.float32, -bound, bound)
    bias = jax.random.uniform(kb, (C,), jnp.float32, -bound, bound)

    def ref_conv(xin):
        xu = jnp.repeat(jnp.repeat(xin, 2, axis=2), 2, axis=3)
        return lax.conv_general_dilated(
            xu, weight, window_strides=(1, 1), padding="SAME",
            dimension_numbers=("NCHW", "OIHW", "NCHW")) + bias[None, :, None, None]

    # f32 compute path: tight check against the plain-JAX reference.
    out32 = jax.block_until_ready(
        upsample_forward(x, weight, bias, with_conv=True, compute_dtype=jnp.float32))
    ref32 = ref_conv(x)
    assert out32.shape == (N, C, 2 * H, 2 * W), out32.shape
    err32 = float(jnp.max(jnp.abs(out32 - ref32)))
    assert jnp.allclose(out32, ref32, atol=1e-4, rtol=1e-4), err32

    # bf16 (default) compute path: loosened tolerance (expected bf16 quantization).
    outbf = jax.block_until_ready(upsample_forward(x, weight, bias, with_conv=True))
    refbf = ref_conv(x.astype(jnp.bfloat16).astype(jnp.float32))
    errbf = float(jnp.max(jnp.abs(outbf - refbf)))
    assert jnp.allclose(outbf, refbf, atol=5e-2, rtol=5e-2), errbf

    # with_conv=False path (pure nearest upsample).
    out_nc = jax.block_until_ready(upsample_forward(x, weight, bias, with_conv=False))
    assert out_nc.shape == (N, C, 2 * H, 2 * W), out_nc.shape

    print("KERNEL_OK")
</pallas_src>

<mosaic_0001>
module attributes {stable_mosaic.version = 11 : i64} {
  func.func @_upconv_kernel_1k(%arg0: i32, %arg1: i32, %arg2: i32, %arg3: memref<1x1x18x18x128xf32, #tpu.memory_space<vmem>>, %arg4: memref<2x2x1x512x128xf32, #tpu.memory_space<vmem>>, %arg5: memref<1x128xf32, #tpu.memory_space<vmem>>, %arg6: memref<1x1x2x2x256x128xf32, #tpu.memory_space<vmem>>) attributes {dimension_semantics = [#tpu.dimension_semantics<parallel>, #tpu.dimension_semantics<parallel>, #tpu.dimension_semantics<parallel>], iteration_bounds = array<i64: 2, 1, 1>, scalar_prefetch = 0 : i64, scratch_operands = 0 : i64, tpu.core_type = #tpu.core_type<tc>, window_params = [{transform_indices = @transform_0, window_bounds = array<i64: 1, 1, 18, 18, 128>}, {transform_indices = @transform_1, window_bounds = array<i64: 2, 2, 1, 512, 128>}, {transform_indices = @transform_2, window_bounds = array<i64: 1, 128>}, {transform_indices = @transform_3, window_bounds = array<i64: 1, 1, 2, 2, 256, 128>}]} {
    %c0 = arith.constant 0 : index
    %c0_0 = arith.constant 0 : index
    %c0_1 = arith.constant 0 : index
    %c0_2 = arith.constant 0 : index
    %c0_3 = arith.constant 0 : index
    %0 = vector.load %arg3[%c0, %c0_0, %c0_1, %c0_2, %c0_3] : memref<1x1x18x18x128xf32, #tpu.memory_space<vmem>>, vector<1x1x18x18x128xf32>
    %1 = vector.shape_cast %0 : vector<1x1x18x18x128xf32> to vector<18x18x128xf32>
    %c0_4 = arith.constant 0 : index
    %c0_5 = arith.constant 0 : index
    %2 = vector.load %arg5[%c0_4, %c0_5] : memref<1x128xf32, #tpu.memory_space<vmem>>, vector<1x128xf32>
    %3 = vector.extract_strided_slice %1 {offsets = [0, 0, 0], sizes = [16, 16, 128], strides = [1, 1, 1]} : vector<18x18x128xf32> to vector<16x16x128xf32>
    %4 = vector.extract_strided_slice %1 {offsets = [0, 1, 0], sizes = [16, 16, 128], strides = [1, 1, 1]} : vector<18x18x128xf32> to vector<16x16x128xf32>
    %5 = vector.extract_strided_slice %1 {offsets = [1, 0, 0], sizes = [16, 16, 128], strides = [1, 1, 1]} : vector<18x18x128xf32> to vector<16x16x128xf32>
    %6 = vector.extract_strided_slice %1 {offsets = [1, 1, 0], sizes = [16, 16, 128], strides = [1, 1, 1]} : vector<18x18x128xf32> to vector<16x16x128xf32>
    %7 = tpu.concatenate %3, %4, %5, %6 in 2 : vector<16x16x128xf32>, vector<16x16x128xf32>, vector<16x16x128xf32>, vector<16x16x128xf32> -> vector<16x16x512xf32>
    %8 = vector.shape_cast %7 : vector<16x16x512xf32> to vector<256x512xf32>
    %c0_6 = arith.constant 0 : index
    %c0_7 = arith.constant 0 : index
    %c0_8 = arith.constant 0 : index
    %c0_9 = arith.constant 0 : index
    %c0_10 = arith.constant 0 : index
    %9 = vector.load %arg4[%c0_6, %c0_7, %c0_8, %c0_9, %c0_10] : memref<2x2x1x512x128xf32, #tpu.memory_space<vmem>>, vector<1x1x1x512x128xf32>
    %10 = vector.shape_cast %9 : vector<1x1x1x512x128xf32> to vector<512x128xf32>
    %cst = arith.constant dense<0.000000e+00> : vector<256x128xf32>
    %11 = tpu.matmul %8, %10, %cst {dimension_numbers = #tpu.dot_dimension_numbers<[1], [0], [0], [1], [0, 0, 1, 1], [], []>} : vector<256x512xf32>, vector<512x128xf32>, vector<256x128xf32> -> vector<256x128xf32>
    %12 = vector.broadcast %2 : vector<1x128xf32> to vector<256x128xf32>
    %13 = arith.addf %11, %12 : vector<256x128xf32>
    %c0_11 = arith.constant 0 : index
    %c0_12 = arith.constant 0 : index
    %c0_13 = arith.constant 0 : index
    %c0_14 = arith.constant 0 : index
    %c0_15 = arith.constant 0 : index
    %c0_16 = arith.constant 0 : index
    %14 = vector.load %arg6[%c0_11, %c0_12, %c0_13, %c0_14, %c0_15, %c0_16] : memref<1x1x2x2x256x128xf32, #tpu.memory_space<vmem>>, vector<1x1x1x1x256x128xf32>
    %15 = vector.shape_cast %14 : vector<1x1x1x1x256x128xf32> to vector<256x128xf32>
    %16 = vector.shape_cast %13 : vector<256x128xf32> to vector<1x1x1x1x256x128xf32>
    tpu.vector_store %arg6[%c0_11, %c0_12, %c0_13, %c0_14, %c0_15, %c0_16], %16 {strides = array<i32>} : memref<1x1x2x2x256x128xf32, #tpu.memory_space<vmem>>, vector<1x1x1x1x256x128xf32>,
    %17 = vector.extract_strided_slice %1 {offsets = [0, 1, 0], sizes = [16, 16, 128], strides = [1, 1, 1]} : vector<18x18x128xf32> to vector<16x16x128xf32>
    %18 = vector.extract_strided_slice %1 {offsets = [0, 2, 0], sizes = [16, 16, 128], strides = [1, 1, 1]} : vector<18x18x128xf32> to vector<16x16x128xf32>
    %19 = vector.extract_strided_slice %1 {offsets = [1, 1, 0], sizes = [16, 16, 128], strides = [1, 1, 1]} : vector<18x18x128xf32> to vector<16x16x128xf32>
    %20 = vector.extract_strided_slice %1 {offsets = [1, 2, 0], sizes = [16, 16, 128], strides = [1, 1, 1]} : vector<18x18x128xf32> to vector<16x16x128xf32>
    %21 = tpu.concatenate %17, %18, %19, %20 in 2 : vector<16x16x128xf32>, vector<16x16x128xf32>, vector<16x16x128xf32>, vector<16x16x128xf32> -> vector<16x16x512xf32>
    %22 = vector.shape_cast %21 : vector<16x16x512xf32> to vector<256x512xf32>
    %c0_17 = arith.constant 0 : index
    %c1 = arith.constant 1 : index
    %c0_18 = arith.constant 0 : index
    %c0_19 = arith.constant 0 : index
    %c0_20 = arith.constant 0 : index
    %23 = vector.load %arg4[%c0_17, %c1, %c0_18, %c0_19, %c0_20] : memref<2x2x1x512x128xf32, #tpu.memory_space<vmem>>, vector<1x1x1x512x128xf32>
    %24 = vector.shape_cast %23 : vector<1x1x1x512x128xf32> to vector<512x128xf32>
    %cst_21 = arith.constant dense<0.000000e+00> : vector<256x128xf32>
    %25 = tpu.matmul %22, %24, %cst_21 {dimension_numbers = #tpu.dot_dimension_numbers<[1], [0], [0], [1], [0, 0, 1, 1], [], []>} : vector<256x512xf32>, vector<512x128xf32>, vector<256x128xf32> -> vector<256x128xf32>
    %26 = vector.broadcast %2 : vector<1x128xf32> to vector<256x128xf32>
    %27 = arith.addf %25, %26 : vector<256x128xf32>
    %c0_22 = arith.constant 0 : index
    %c0_23 = arith.constant 0 : index
    %c0_24 = arith.constant 0 : index
    %c1_25 = arith.constant 1 : index
    %c0_26 = arith.constant 0 : index
    %c0_27 = arith.constant 0 : index
    %28 = vector.load %arg6[%c0_22, %c0_23, %c0_24, %c1_25, %c0_26, %c0_27] : memref<1x1x2x2x256x128xf32, #tpu.memory_space<vmem>>, vector<1x1x1x1x256x128xf32>
    %29 = vector.shape_cast %28 : vector<1x1x1x1x256x128xf32> to vector<256x128xf32>
    %30 = vector.shape_cast %27 : vector<256x128xf32> to vector<1x1x1x1x256x128xf32>
    tpu.vector_store %arg6[%c0_22, %c0_23, %c0_24, %c1_25, %c0_26, %c0_27], %30 {strides = array<i32>} : memref<1x1x2x2x256x128xf32, #tpu.memory_space<vmem>>, vector<1x1x1x1x256x128xf32>,
    %31 = vector.extract_strided_slice %1 {offsets = [1, 0, 0], sizes = [16, 16, 128], strides = [1, 1, 1]} : vector<18x18x128xf32> to vector<16x16x128xf32>
    %32 = vector.extract_strided_slice %1 {offsets = [1, 1, 0], sizes = [16, 16, 128], strides = [1, 1, 1]} : vector<18x18x128xf32> to vector<16x16x128xf32>
    %33 = vector.extract_strided_slice %1 {offsets = [2, 0, 0], sizes = [16, 16, 128], strides = [1, 1, 1]} : vector<18x18x128xf32> to vector<16x16x128xf32>
    %34 = vector.extract_strided_slice %1 {offsets = [2, 1, 0], sizes = [16, 16, 128], strides = [1, 1, 1]} : vector<18x18x128xf32> to vector<16x16x128xf32>
    %35 = tpu.concatenate %31, %32, %33, %34 in 2 : vector<16x16x128xf32>, vector<16x16x128xf32>, vector<16x16x128xf32>, vector<16x16x128xf32> -> vector<16x16x512xf32>
    %36 = vector.shape_cast %35 : vector<16x16x512xf32> to vector<256x512xf32>
    %c1_28 = arith.constant 1 : index
    %c0_29 = arith.constant 0 : index
    %c0_30 = arith.constant 0 : index
    %c0_31 = arith.constant 0 : index
    %c0_32 = arith.constant 0 : index
    %37 = vector.load %arg4[%c1_28, %c0_29, %c0_30, %c0_31, %c0_32] : memref<2x2x1x512x128xf32, #tpu.memory_space<vmem>>, vector<1x1x1x512x128xf32>
    %38 = vector.shape_cast %37 : vector<1x1x1x512x128xf32> to vector<512x128xf32>
    %cst_33 = arith.constant dense<0.000000e+00> : vector<256x128xf32>
    %39 = tpu.matmul %36, %38, %cst_33 {dimension_numbers = #tpu.dot_dimension_numbers<[1], [0], [0], [1], [0, 0, 1, 1], [], []>} : vector<256x512xf32>, vector<512x128xf32>, vector<256x128xf32> -> vector<256x128xf32>
    %40 = vector.broadcast %2 : vector<1x128xf32> to vector<256x128xf32>
    %41 = arith.addf %39, %40 : vector<256x128xf32>
    %c0_34 = arith.constant 0 : index
    %c0_35 = arith.constant 0 : index
    %c1_36 = arith.constant 1 : index
    %c0_37 = arith.constant 0 : index
    %c0_38 = arith.constant 0 : index
    %c0_39 = arith.constant 0 : index
    %42 = vector.load %arg6[%c0_34, %c0_35, %c1_36, %c0_37, %c0_38, %c0_39] : memref<1x1x2x2x256x128xf32, #tpu.memory_space<vmem>>, vector<1x1x1x1x256x128xf32>
    %43 = vector.shape_cast %42 : vector<1x1x1x1x256x128xf32> to vector<256x128xf32>
    %44 = vector.shape_cast %41 : vector<256x128xf32> to vector<1x1x1x1x256x128xf32>
    tpu.vector_store %arg6[%c0_34, %c0_35, %c1_36, %c0_37, %c0_38, %c0_39], %44 {strides = array<i32>} : memref<1x1x2x2x256x128xf32, #tpu.memory_space<vmem>>, vector<1x1x1x1x256x128xf32>,
    %45 = vector.extract_strided_slice %1 {offsets = [1, 1, 0], sizes = [16, 16, 128], strides = [1, 1, 1]} : vector<18x18x128xf32> to vector<16x16x128xf32>
    %46 = vector.extract_strided_slice %1 {offsets = [1, 2, 0], sizes = [16, 16, 128], strides = [1, 1, 1]} : vector<18x18x128xf32> to vector<16x16x128xf32>
    %47 = vector.extract_strided_slice %1 {offsets = [2, 1, 0], sizes = [16, 16, 128], strides = [1, 1, 1]} : vector<18x18x128xf32> to vector<16x16x128xf32>
    %48 = vector.extract_strided_slice %1 {offsets = [2, 2, 0], sizes = [16, 16, 128], strides = [1, 1, 1]} : vector<18x18x128xf32> to vector<16x16x128xf32>
    %49 = tpu.concatenate %45, %46, %47, %48 in 2 : vector<16x16x128xf32>, vector<16x16x128xf32>, vector<16x16x128xf32>, vector<16x16x128xf32> -> vector<16x16x512xf32>
    %50 = vector.shape_cast %49 : vector<16x16x512xf32> to vector<256x512xf32>
    %c1_40 = arith.constant 1 : index
    %c1_41 = arith.constant 1 : index
    %c0_42 = arith.constant 0 : index
    %c0_43 = arith.constant 0 : index
    %c0_44 = arith.constant 0 : index
    %51 = vector.load %arg4[%c1_40, %c1_41, %c0_42, %c0_43, %c0_44] : memref<2x2x1x512x128xf32, #tpu.memory_space<vmem>>, vector<1x1x1x512x128xf32>
    %52 = vector.shape_cast %51 : vector<1x1x1x512x128xf32> to vector<512x128xf32>
    %cst_45 = arith.constant dense<0.000000e+00> : vector<256x128xf32>
    %53 = tpu.matmul %50, %52, %cst_45 {dimension_numbers = #tpu.dot_dimension_numbers<[1], [0], [0], [1], [0, 0, 1, 1], [], []>} : vector<256x512xf32>, vector<512x128xf32>, vector<256x128xf32> -> vector<256x128xf32>
    %54 = vector.broadcast %2 : vector<1x128xf32> to vector<256x128xf32>
    %55 = arith.addf %53, %54 : vector<256x128xf32>
    %c0_46 = arith.constant 0 : index
    %c0_47 = arith.constant 0 : index
    %c1_48 = arith.constant 1 : index
    %c1_49 = arith.constant 1 : index
    %c0_50 = arith.constant 0 : index
    %c0_51 = arith.constant 0 : index
    %56 = vector.load %arg6[%c0_46, %c0_47, %c1_48, %c1_49, %c0_50, %c0_51] : memref<1x1x2x2x256x128xf32, #tpu.memory_space<vmem>>, vector<1x1x1x1x256x128xf32>
    %57 = vector.shape_cast %56 : vector<1x1x1x1x256x128xf32> to vector<256x128xf32>
    %58 = vector.shape_cast %55 : vector<256x128xf32> to vector<1x1x1x1x256x128xf32>
    tpu.vector_store %arg6[%c0_46, %c0_47, %c1_48, %c1_49, %c0_50, %c0_51], %58 {strides = array<i32>} : memref<1x1x2x2x256x128xf32, #tpu.memory_space<vmem>>, vector<1x1x1x1x256x128xf32>,
    return
  }
  func.func @transform_0(%arg0: i32, %arg1: i32, %arg2: i32) -> (i32, i32, i32, i32, i32) {
    %c0_i32 = arith.constant 0 : i32
    %c0_i32_0 = arith.constant 0 : i32
    %c0_i32_1 = arith.constant 0 : i32
    %c0_i32_2 = arith.constant 0 : i32
    return %arg0, %arg1, %c0_i32, %c0_i32_0, %c0_i32_1 : i32, i32, i32, i32, i32
  }
  func.func @transform_1(%arg0: i32, %arg1: i32, %arg2: i32) -> (i32, i32, i32, i32, i32) {
    %c0_i32 = arith.constant 0 : i32
    %c0_i32_0 = arith.constant 0 : i32
    %c0_i32_1 = arith.constant 0 : i32
    %c0_i32_2 = arith.constant 0 : i32
    %c0_i32_3 = arith.constant 0 : i32
    return %c0_i32, %c0_i32_0, %c0_i32_1, %c0_i32_2, %arg2 : i32, i32, i32, i32, i32
  }
  func.func @transform_2(%arg0: i32, %arg1: i32, %arg2: i32) -> (i32, i32) {
    %c0_i32 = arith.constant 0 : i32
    %c0_i32_0 = arith.constant 0 : i32
    return %c0_i32, %arg2 : i32, i32
  }
  func.func @transform_3(%arg0: i32, %arg1: i32, %arg2: i32) -> (i32, i32, i32, i32, i32, i32) {
    %c0_i32 = arith.constant 0 : i32
    %c0_i32_0 = arith.constant 0 : i32
    %c0_i32_1 = arith.constant 0 : i32
    %c0_i32_2 = arith.constant 0 : i32
    return %arg0, %arg1, %c0_i32, %c0_i32_0, %c0_i32_1, %arg2 : i32, i32, i32, i32, i32, i32
  }
}

</mosaic_0001>

<bundles_post_ra>
// kernel: tpu_custom_call.1
= control target key start
LH: loop header
LB: loop body
LE: loop exit
PB: predicated region body
PF: predicated region fallthrough
CT: control target
= control target key end

     0   :  { %8 = vsyncpa [#allocation3], 0  ;;  %s4877_s0 = inlined_call_operand.vmem [shape: f32[2,1,18,18,128], index: 0, kind: input, shape index: {}]   ;;  %s4878_s1 = inlined_call_operand.hbm [shape: f32[2,2,1,512,128], index: 1, kind: input, shape index: {}]   ;;  %s4879_s2 = inlined_call_operand.vmem [shape: f32[1,128], index: 2, kind: input, shape index: {}]   ;;  %s4880_s3 = inlined_call_operand.hbm [shape: f32[2,1,2,2,256,128], index: 3, kind: output, shape index: {}]  }
   0x1   :  { %9 = vsyncpa [#allocation4], 0 }
   0x2   :  { %11 = vsyncpa [#allocation4 + $0x1], 0  ;;  %s3284_s12 = smov 0   ;;  %s3286_s13 = smov 0  }
   0x3   :  { %s3288_s14 = smov 0   ;;  %s3290_s15 = smov 0  }
   0x4   :  { %s3292_s16 = smov 0   ;;  %s3294_s17 = smov 0  }
   0x5 LB: > { %s2929_s18 = sadd.s32 4294967295, %s3255_s17   ;;  %s2930_s19 = sadd.s32 4294967294, %s3255_s17   ;;  %s3255_s17 = sphi %s3294_s17, %s17_s17   ;;  %s3251_s16 = sphi %s3292_s16, %s5013_s16   ;;  %s3247_s15 = sphi %s3290_s15, %s5012_s15   ;;  %s3243_s14 = sphi %s3288_s14, %s5011_s14   ;;  %s3239_s13 = sphi %s3286_s13, %s5010_s13   ;;  %s3235_s12 = sphi %s3284_s12, %s5009_s12  }
   0x6   : > { %s36_s20 = sadd.s32 1, %s3251_s16  ;;  %s127_s21 = sadd.s32 1, %s3243_s14 }
   0x7   : > { %p38_p0 = scmp.ge.s32.totalorder %s36_s20, 2  ;;  %p137_p1 = scmp.ne.s32.totalorder %s3243_s14, %s3239_s13 }
   0x8   : > { %p138_p2 = scmp.eq.s32.totalorder %s2929_s18, 1  ;;  %p143_p3 = scmp.ne.s32.totalorder %s3239_s13, %s3235_s12 }
   0x9   : > { %s5015_s20 = smov (%p38_p0, %s36_s20), 0  ;;  %p144_p5 = scmp.eq.s32.totalorder %s2930_s19, 1 }
   0xa   : > { %p3324_p4 = por %p138_p2, %p137_p1  ;;  %s120_s23 = ssub.s32 %s3251_s16, %s5015_s20 }
   0xb   : > { %p2931_p6 = scmp.ge.s32.totalorder %s3255_s17, 1  ;;  %p125_p7 = scmp.eq.s32.totalorder %s120_s23, 0 }
   0xc   : > { %p3331_p8 = por %p144_p5, %p143_p3  ;;  %p151_p9 = scmp.lt.s32.totalorder %s3255_s17, 3 }
   0xd   : > { %s3337_s25 = scalar_select %p125_p7, %s3243_s14, %s127_s21  }
   0xe   : > { %p3339_p10 = pnand %p2931_p6, %p151_p9  ;;  %p3343_p11 = scmp.eq.s32.totalorder %s2929_s18, 0 }
   0xf   : > { %s3257_s28 = smov [#allocation2]  }
  0x10   : > { %p3049_p12 = pneg %p3339_p10  ;;  %s165_s29 = sshll.u32 %s3257_s28, 4  ;;  %s166_s29 = int_to_ptr.vmem [resolvable:$true] %s165_s29 }
  0x11   : > { %s3160_s30 = scalar_lea.vmem %s166_s29, 32768  ;;  %p3168_p5 = scmp.lt.s32.totalorder %s166_s29, %s166_s29 }
  0x12   : > { %p3050_p13 = pnand %p3343_p11, %p3049_p12  ;;  %p3161_p1 = scmp.ne.s32.totalorder %s166_s29, %s3160_s30 }
  0x13   : > { %p3169_p6 = scmp.lt.s32.totalorder %s3160_s30, %s3160_s30 }
  0x14   : > { %p3151_p0 = pneg %p3050_p13 }
  0x15   : > { %p3170_p7 = por %p3169_p6, %p3168_p5 }
  0x16   : > { %p3163_p2 = pnand %p3161_p1, %p3151_p0 }
  0x18   : > { %p3164_p3 = pneg %p3163_p2 }
  0x1a   : > { %p3171_p9 = pnand %p3170_p7, %p3164_p3 }
  0x1c   : > { %3174 = shalt.err (!%p3171_p9)
}
  0x1d   : > { %s3258_s4 = smov 128   ;;  %s3259_s5 = smov 8  }
  0x1e   : > { %3052 = dma.hbm_to_vmem [thread:$0]  (!%p3050_p13), %s4878_s1, 32768, %s166_s29, [#allocation3], %s3258_s4, %s3258_s4, %s3259_s5  }
  0x1f   : > { %199 = sbr.rel (%p3339_p10) target bundleno = 821 (0x335), region = 32 }
  0x24   : > { %3226 = dma.done.wait (%p3343_p11), [#allocation3], 32768  }
  0x25   : > { %3228 = vsyncadd (%p3343_p11), [#allocation3], 4294934528  ;;  %v3260_v0 = vmov 0.0   ;;  %v483_v1 = vld [vmem:[#allocation2 + $0x78] sm:$0xff]  ;;  %v482_v3 = vld [vmem:[#allocation2 + $0x70] sm:$0xff]  ;;  %p230_p10 = scmp.lt.s32.totalorder %s3247_s15, 1 }
  0x26   : > { %538 = vmatprep.subr.mxu0 %v3260_v0  ;;  %763 = vmatprep.subr.mxu1 %v3260_v0  ;;  %v515_v2 = vld [vmem:[#allocation2 + $0x178] sm:$0xff]  ;;  %v514_v4 = vld [vmem:[#allocation2 + $0x170] sm:$0xff]  ;;  %v481_v5 = vld [vmem:[#allocation2 + $0x68] sm:$0xff]  ;;  %vm345_vm0 = vcmask 1046528   ;;  %s227_s19 = sand.u32 1, %s3239_s13   ;;  %s3041_s5 = sshll.u32 %s3247_s15, 14 }
  0x27   : > { %539 = vmatpush1.msra.mxu0 %v483_v1  ;;  %764 = vmatpush1.msra.mxu1 %v515_v2  ;;  %v513_v6 = vld [vmem:[#allocation2 + $0x168] sm:$0xff]  ;;  %v480_v7 = vld [vmem:[#allocation2 + $0x60] sm:$0xff]  ;;  %v479_v9 = vld [vmem:[#allocation2 + $0x58] sm:$0xff]  ;;  %s231_s8 = scalar_select %p230_p10, %s3247_s15, 1 }
  0x28   : > { %540 = vmatprep.subr.mxu0 %v3260_v0  ;;  %765 = vmatprep.subr.mxu1 %v3260_v0  ;;  %v512_v8 = vld [vmem:[#allocation2 + $0x160] sm:$0xff]  ;;  %v511_v10 = vld [vmem:[#allocation2 + $0x158] sm:$0xff]  ;;  %v478_v11 = vld [vmem:[#allocation2 + $0x50] sm:$0xff]  ;;  %s2937_s26 = sshll.u32 %s227_s19, 10  ;;  %s4825_s11 = scalar_lea.hbm %s4880_s3, %s3041_s5 }
  0x29   : > { %541 = vmatpush1.msra.mxu0 %v482_v3  ;;  %766 = vmatpush1.msra.mxu1 %v514_v4  ;;  %v510_v12 = vld [vmem:[#allocation2 + $0x150] sm:$0xff]  ;;  %v477_v13 = vld [vmem:[#allocation2 + $0x48] sm:$0xff]  ;;  %v476_v15 = vld [vmem:[#allocation2 + $0x40] sm:$0xff]  ;;  %s3042_s9 = smul.u32 432, %s231_s8  ;;  %s4086_s27 = scalar_lea.vmem [#allocation5], %s2937_s26 }
  0x2a   : > { %542 = vmatprep.subr.mxu0 %v3260_v0  ;;  %767 = vmatprep.subr.mxu1 %v3260_v0  ;;  %v509_v14 = vld [vmem:[#allocation2 + $0x148] sm:$0xff]  ;;  %v508_v16 = vld [vmem:[#allocation2 + $0x140] sm:$0xff]  ;;  %v475_v17 = vld [vmem:[#allocation2 + $0x38] sm:$0xff]  ;;  %s2817_s6 = sshll.u32 %s4086_s27, 4  ;;  %s4832_s15 = scalar_lea.sflag [#allocation4], %s227_s19  ;;  %s4827_s6 = int_to_ptr.vmem [resolvable:$true] %s2817_s6 }
  0x2b   : > { %543 = vmatpush1.msra.mxu0 %v481_v5  ;;  %768 = vmatpush1.msra.mxu1 %v513_v6  ;;  %v507_v18 = vld [vmem:[#allocation2 + $0x138] sm:$0xff]  ;;  %v474_v19 = vld [vmem:[#allocation2 + $0x30] sm:$0xff]  ;;  %v473_v21 = vld [vmem:[#allocation2 + $0x28] sm:$0xff]  ;;  %s3415_s18 = scalar_lea.vmem %s4877_s0, %s3042_s9  ;;  %s3261_s21 = smov [#allocation5]  }
  0x2c   : > { %544 = vmatprep.subr.mxu0 %v3260_v0  ;;  %769 = vmatprep.subr.mxu1 %v3260_v0  ;;  %v506_v20 = vld [vmem:[#allocation2 + $0x130] sm:$0xff]  ;;  %v505_v22 = vld [vmem:[#allocation2 + $0x128] sm:$0xff]  ;;  %v472_v23 = vld [vmem:[#allocation2 + $0x20] sm:$0xff]  ;;  %s3179_s23 = sshll.u32 %s3261_s21, 4  ;;  %s3180_s23 = int_to_ptr.vmem [resolvable:$false] %s3179_s23 }
  0x2d   : > { %545 = vmatpush1.msra.mxu0 %v480_v7  ;;  %770 = vmatpush1.msra.mxu1 %v512_v8  ;;  %v504_v24 = vld [vmem:[#allocation2 + $0x120] sm:$0xff]  ;;  %v471_v25 = vld [vmem:[#allocation2 + $0x18] sm:$0xff]  ;;  %v470_v27 = vld [vmem:[#allocation2 + $0x10] sm:$0xff]  ;;  %s3181_s26 = scalar_lea.vmem %s3180_s23, 32768  ;;  %p3182_p0 = scmp.lt.s32.totalorder %s4827_s6, %s3180_s23 }
  0x2e   : > { %546 = vmatprep.subr.mxu0 %v3260_v0  ;;  %771 = vmatprep.subr.mxu1 %v3260_v0  ;;  %v503_v26 = vld [vmem:[#allocation2 + $0x118] sm:$0xff]  ;;  %v502_v28 = vld [vmem:[#allocation2 + $0x110] sm:$0xff]  ;;  %v469_v29 = vld [vmem:[#allocation2 + $0x8] sm:$0xff] }
  0x2f   : > { %547 = vmatpush1.msra.mxu0 %v479_v9  ;;  %772 = vmatpush1.msra.mxu1 %v511_v10  ;;  %v501_v30 = vld [vmem:[#allocation2 + $0x108] sm:$0xff]  ;;  %v468_v31 = vld [vmem:[#allocation2] sm:$0xff]  ;;  %v499_v33 = vld [vmem:[#allocation2 + $0xf8] sm:$0xff] }
  0x30   : > { %548 = vmatprep.subr.mxu0 %v3260_v0  ;;  %773 = vmatprep.subr.mxu1 %v3260_v0  ;;  %v500_v32 = vld [vmem:[#allocation2 + $0x100] sm:$0xff]  ;;  %v531_v34 = vld [vmem:[#allocation2 + $0x1f8] sm:$0xff]  ;;  %v498_v35 = vld [vmem:[#allocation2 + $0xf0] sm:$0xff] }
  0x31   : > { %549 = vmatpush1.msra.mxu0 %v478_v11  ;;  %774 = vmatpush1.msra.mxu1 %v510_v12  ;;  %v530_v36 = vld [vmem:[#allocation2 + $0x1f0] sm:$0xff]  ;;  %v497_v37 = vld [vmem:[#allocation2 + $0xe8] sm:$0xff]  ;;  %v496_v39 = vld [vmem:[#allocation2 + $0xe0] sm:$0xff] }
  0x32   : > { %550 = vmatprep.subr.mxu0 %v3260_v0  ;;  %775 = vmatprep.subr.mxu1 %v3260_v0  ;;  %v529_v38 = vld [vmem:[#allocation2 + $0x1e8] sm:$0xff]  ;;  %v528_v40 = vld [vmem:[#allocation2 + $0x1e0] sm:$0xff]  ;;  %v495_v41 = vld [vmem:[#allocation2 + $0xd8] sm:$0xff] }
  0x33   : > { %551 = vmatpush1.msra.mxu0 %v477_v13  ;;  %776 = vmatpush1.msra.mxu1 %v509_v14  ;;  %v527_v42 = vld [vmem:[#allocation2 + $0x1d8] sm:$0xff]  ;;  %v494_v43 = vld [vmem:[#allocation2 + $0xd0] sm:$0xff]  ;;  %v493_v45 = vld [vmem:[#allocation2 + $0xc8] sm:$0xff] }
  0x34   : > { %552 = vmatprep.subr.mxu0 %v3260_v0  ;;  %777 = vmatprep.subr.mxu1 %v3260_v0  ;;  %v526_v44 = vld [vmem:[#allocation2 + $0x1d0] sm:$0xff]  ;;  %v525_v46 = vld [vmem:[#allocation2 + $0x1c8] sm:$0xff]  ;;  %v492_v47 = vld [vmem:[#allocation2 + $0xc0] sm:$0xff] }
  0x35   : > { %553 = vmatpush1.msra.mxu0 %v476_v15  ;;  %778 = vmatpush1.msra.mxu1 %v508_v16  ;;  %v524_v48 = vld [vmem:[#allocation2 + $0x1c0] sm:$0xff]  ;;  %v491_v49 = vld [vmem:[#allocation2 + $0xb8] sm:$0xff]  ;;  %v490_v51 = vld [vmem:[#allocation2 + $0xb0] sm:$0xff] }
  0x36   : > { %554 = vmatprep.subr.mxu0 %v3260_v0  ;;  %779 = vmatprep.subr.mxu1 %v3260_v0  ;;  %v523_v50 = vld [vmem:[#allocation2 + $0x1b8] sm:$0xff]  ;;  %v522_v52 = vld [vmem:[#allocation2 + $0x1b0] sm:$0xff]  ;;  %v489_v53 = vld [vmem:[#allocation2 + $0xa8] sm:$0xff] }
  0x37   : > { %555 = vmatpush1.msra.mxu0 %v475_v17  ;;  %780 = vmatpush1.msra.mxu1 %v507_v18  ;;  %v521_v54 = vld [vmem:[#allocation2 + $0x1a8] sm:$0xff]  ;;  %v488_v55 = vld [vmem:[#allocation2 + $0xa0] sm:$0xff]  ;;  %v487_v59 = vld [vmem:[#allocation2 + $0x98] sm:$0xff] }
  0x38   : > { %556 = vmatprep.subr.mxu0 %v3260_v0  ;;  %781 = vmatprep.subr.mxu1 %v3260_v0  ;;  %v520_v56 = vld [vmem:[#allocation2 + $0x1a0] sm:$0xff]  ;;  %v243_v58 = vld [vmem:[%s3415_s18 + $0x8] sm:$0xff]  ;;  %v519_v60 = vld [vmem:[#allocation2 + $0x198] sm:$0xff] }
  0x39   : > { %557 = vmatpush1.msra.mxu0 %v474_v19  ;;  %782 = vmatpush1.msra.mxu1 %v506_v20  ;;  %v242_v57 = vld [vmem:[%s3415_s18] sm:$0xff]  ;;  %v347_v62 = vrot.slane %v243_v58, 1  ;;  %v3426_v63 = vld [vmem:[%s3415_s18 + $0x18] sm:$0xff]  ;;  %v486_v2 = vld [vmem:[#allocation2 + $0x90] sm:$0xff] }
  0x3a   : > { %558 = vmatprep.subr.mxu0 %v3260_v0  ;;  %783 = vmatprep.subr.mxu1 %v3260_v0  ;;  %v346_v61 = vrot.slane %v242_v57, 1  ;;  %v3429_v1 = vld [vmem:[%s3415_s18 + $0x20] sm:$0xff]  ;;  %v518_v3 = vld [vmem:[#allocation2 + $0x190] sm:$0xff]  ;;  %v485_v5 = vld [vmem:[#allocation2 + $0x88] sm:$0xff]  ;;  %v351_v7 = vrot.slane %v3426_v63, 1 }
  0x3b   : > { %559 = vmatpush1.msra.mxu0 %v473_v21  ;;  %784 = vmatpush1.msra.mxu1 %v505_v22  ;;  %v3434_v4 = vld [vmem:[%s3415_s18 + $0x10] sm:$0x3]  ;;  %v517_v6 = vld [vmem:[#allocation2 + $0x188] sm:$0xff]  ;;  %v352_v8 = vrot.slane %v3429_v1, 1  ;;  %v484_v11 = vld [vmem:[#allocation2 + $0x80] sm:$0xff] }
  0x3c   : > { %560 = vmatprep.subr.mxu0 %v3260_v0  ;;  %785 = vmatprep.subr.mxu1 %v3260_v0  ;;  %v3441_v9 = vsel %vm345_vm0, %v346_v61, %v347_v62  ;;  %v3444_v10 = vld [vmem:[%s3415_s18 + $0x28] sm:$0x3]  ;;  %v4896_v12 = vrot.slane %v3434_v4, 1  ;;  %v516_v13 = vld [vmem:[#allocation2 + $0x180] sm:$0xff]  ;;  %v1155_v16 = vld [vmem:[#allocation2 + $0x278] sm:$0xff] }
  0x3d   : > { %561 = vmatpush1.msra.mxu0 %v472_v23  ;;  %786 = vmatpush1.msra.mxu1 %v504_v24  ;;  %v3452_v14 = vsel %vm345_vm0, %v351_v7, %v352_v8  ;;  %v4895_v15 = vrot.slane %v3444_v10, 1  ;;  %v248_v17 = vld [vmem:[%s3415_s18 + $0x30] sm:$0xff]  ;;  %v3458_v18 = vld [vmem:[%s3415_s18 + $0x38] sm:$0xff]  ;;  %v3558_v61 = vld [vmem:[%s3415_s18 + $0x88] sm:$0x3] }
  0x3e   : > { %562 = vmatprep.subr.mxu0 %v3260_v0  ;;  %787 = vmatprep.subr.mxu1 %v3260_v0  ;;  %v3463_v19 = vsel %vm345_vm0, %v347_v62, %v4896_v12  ;;  %v1187_v20 = vld [vmem:[#allocation2 + $0x378] sm:$0xff]  ;;  %v356_v22 = vrot.slane %v248_v17, 1  ;;  %v357_v23 = vrot.slane %v3458_v18, 1  ;;  %v1154_v24 = vld [vmem:[#allocation2 + $0x270] sm:$0xff]  ;;  %v1180_v62 = vld [vmem:[#allocation2 + $0x340] sm:$0xff]  ;;  %v1023_v12 = vrot.slane %v3452_v14, 1 }
  0x3f   : > { %563 = vmatpush1.msra.mxu0 %v471_v25  ;;  %788 = vmatpush1.msra.mxu1 %v503_v26  ;;  %v3471_v21 = vsel %vm345_vm0, %v352_v8, %v4895_v15  ;;  %v3477_v25 = vld [vmem:[%s3415_s18 + $0x40] sm:$0x3]  ;;  %v1186_v26 = vld [vmem:[#allocation2 + $0x370] sm:$0xff]  ;;  %v1021_v15 = vrot.slane %v3463_v19, 1 }
  0x40   : > { %564 = vmatprep.subr.mxu0 %v3260_v0  ;;  %789 = vmatprep.subr.mxu1 %v3260_v0 }
  0x41   : > { %565 = vmatpush1.msra.mxu0 %v470_v27  ;;  %790 = vmatpush1.msra.mxu1 %v502_v28  ;;  %v3483_v27 = vsel %vm345_vm0, %v356_v22, %v357_v23  ;;  %v4893_v28 = vrot.slane %v3477_v25, 1  ;;  %v1145_v22 = vld [vmem:[#allocation2 + $0x228] sm:$0xff] }
  0x42   : > { %566 = vmatprep.subr.mxu0 %v3260_v0  ;;  %791 = vmatprep.subr.mxu1 %v3260_v0 }
  0x43   : > { %567 = vmatpush1.msra.mxu0 %v469_v29  ;;  %792 = vmatpush1.msra.mxu1 %v501_v30  ;;  %v1153_v29 = vld [vmem:[#allocation2 + $0x268] sm:$0xff] }
  0x44   : > { %568 = vmatprep.subr.mxu0 %v3260_v0  ;;  %793 = vmatprep.subr.mxu1 %v3260_v0  ;;  %v251_v30 = vld [vmem:[%s3415_s18 + $0x48] sm:$0xff] }
  0x45   : > { %569 = vmatpush1.msra.mxu0 %v468_v31  ;;  %794 = vmatpush1.msra.mxu1 %v500_v32  ;;  %v3490_v31 = vld [vmem:[%s3415_s18 + $0x50] sm:$0xff]  ;;  %v1185_v32 = vld [vmem:[#allocation2 + $0x368] sm:$0xff] }
  0x46   : > { %570 = vmatprep.subr.mxu0 %v3260_v0  ;;  %795 = vmatprep.subr.mxu1 %v3260_v0 }
  0x47   : > { %571 = vmatpush2.msra.mxu0 %v499_v33  ;;  %796 = vmatpush2.msra.mxu1 %v531_v34  ;;  %v3498_v33 = vsel %vm345_vm0, %v357_v23, %v4893_v28  ;;  %v361_v34 = vrot.slane %v251_v30, 1  ;;  %v263_v23 = vld [vmem:[%s3415_s18 + $0xa8] sm:$0xff] }
  0x48   : > { %572 = vmatprep.subr.mxu0 %v3260_v0  ;;  %797 = vmatprep.subr.mxu1 %v3260_v0 }
  0x49   : > { %573 = vmatpush2.msra.mxu0 %v498_v35  ;;  %798 = vmatpush2.msra.mxu1 %v530_v36  ;;  %v362_v35 = vrot.slane %v3490_v31, 1  ;;  %v1152_v36 = vld [vmem:[#allocation2 + $0x260] sm:$0xff] }
  0x4a   : > { %574 = vmatprep.subr.mxu0 %v3260_v0  ;;  %799 = vmatprep.subr.mxu1 %v3260_v0 }
  0x4b   : > { %575 = vmatpush2.msra.mxu0 %v497_v37  ;;  %800 = vmatpush2.msra.mxu1 %v529_v38  ;;  %v3504_v37 = vld [vmem:[%s3415_s18 + $0x58] sm:$0x3]  ;;  %v1184_v38 = vld [vmem:[#allocation2 + $0x360] sm:$0xff] }
  0x4c   : > { %576 = vmatprep.subr.mxu0 %v3260_v0  ;;  %801 = vmatprep.subr.mxu1 %v3260_v0 }
  0x4d   : > { %577 = vmatpush2.msra.mxu0 %v496_v39  ;;  %802 = vmatpush2.msra.mxu1 %v528_v40  ;;  %v3511_v39 = vsel %vm345_vm0, %v361_v34, %v362_v35  ;;  %v4892_v40 = vrot.slane %v3504_v37, 1  ;;  %v3612_v34 = vld [vmem:[%s3415_s18 + $0xb8] sm:$0x3] }
  0x4e   : > { %578 = vmatprep.subr.mxu0 %v3260_v0  ;;  %803 = vmatprep.subr.mxu1 %v3260_v0 }
  0x4f   : > { %579 = vmatpush2.msra.mxu0 %v495_v41  ;;  %804 = vmatpush2.msra.mxu1 %v527_v42  ;;  %v1151_v41 = vld [vmem:[#allocation2 + $0x258] sm:$0xff]  ;;  %v254_v42 = vld [vmem:[%s3415_s18 + $0x60] sm:$0xff] }
  0x50   : > { %580 = vmatprep.subr.mxu0 %v3260_v0  ;;  %805 = vmatprep.subr.mxu1 %v3260_v0 }
  0x51   : > { %581 = vmatpush2.msra.mxu0 %v494_v43  ;;  %806 = vmatpush2.msra.mxu1 %v526_v44  ;;  %v3518_v43 = vld [vmem:[%s3415_s18 + $0x68] sm:$0xff]  ;;  %v1183_v44 = vld [vmem:[#allocation2 + $0x358] sm:$0xff] }
  0x52   : > { %582 = vmatprep.subr.mxu0 %v3260_v0  ;;  %807 = vmatprep.subr.mxu1 %v3260_v0 }
  0x53   : > { %583 = vmatpush2.msra.mxu0 %v493_v45  ;;  %808 = vmatpush2.msra.mxu1 %v525_v46  ;;  %v3525_v45 = vsel %vm345_vm0, %v362_v35, %v4892_v40  ;;  %v366_v46 = vrot.slane %v254_v42, 1  ;;  %v1176_v35 = vld [vmem:[#allocation2 + $0x320] sm:$0xff] }
  0x54   : > { %584 = vmatprep.subr.mxu0 %v3260_v0  ;;  %809 = vmatprep.subr.mxu1 %v3260_v0 }
  0x55   : > { %585 = vmatpush2.msra.mxu0 %v492_v47  ;;  %810 = vmatpush2.msra.mxu1 %v524_v48  ;;  %v367_v47 = vrot.slane %v3518_v43, 1  ;;  %v1150_v48 = vld [vmem:[#allocation2 + $0x250] sm:$0xff] }
  0x56   : > { %586 = vmatprep.subr.mxu0 %v3260_v0  ;;  %811 = vmatprep.subr.mxu1 %v3260_v0 }
  0x57   : > { %587 = vmatpush2.msra.mxu0 %v491_v49  ;;  %812 = vmatpush2.msra.mxu1 %v523_v50  ;;  %v3531_v49 = vld [vmem:[%s3415_s18 + $0x70] sm:$0x3] }
  0x58   : > { %588 = vmatprep.subr.mxu0 %v3260_v0  ;;  %813 = vmatprep.subr.mxu1 %v3260_v0  ;;  %v1182_v50 = vld [vmem:[#allocation2 + $0x350] sm:$0xff] }
  0x59   : > { %589 = vmatpush2.msra.mxu0 %v490_v51  ;;  %814 = vmatpush2.msra.mxu1 %v522_v52  ;;  %v3538_v51 = vsel %vm345_vm0, %v366_v46, %v367_v47  ;;  %v4891_v52 = vrot.slane %v3531_v49, 1 }
  0x5a   : > { %590 = vmatprep.subr.mxu0 %v3260_v0  ;;  %815 = vmatprep.subr.mxu1 %v3260_v0 }
  0x5b   : > { %591 = vmatpush2.msra.mxu0 %v489_v53  ;;  %816 = vmatpush2.msra.mxu1 %v521_v54  ;;  %v1149_v53 = vld [vmem:[#allocation2 + $0x248] sm:$0xff]  ;;  %v257_v54 = vld [vmem:[%s3415_s18 + $0x78] sm:$0xff] }
  0x5c   : > { %592 = vmatprep.subr.mxu0 %v3260_v0  ;;  %817 = vmatprep.subr.mxu1 %v3260_v0 }
  0x5d   : > { %593 = vmatpush2.msra.mxu0 %v488_v55  ;;  %818 = vmatpush2.msra.mxu1 %v520_v56  ;;  %v3545_v55 = vld [vmem:[%s3415_s18 + $0x80] sm:$0xff]  ;;  %v1181_v56 = vld [vmem:[#allocation2 + $0x348] sm:$0xff] }
  0x5e   : > { %594 = vmatprep.subr.mxu0 %v3260_v0  ;;  %819 = vmatprep.subr.mxu1 %v3260_v0 }
  0x5f   : > { %595 = vmatpush2.msra.mxu0 %v487_v59  ;;  %820 = vmatpush2.msra.mxu1 %v519_v60  ;;  %v372_v59 = vrot.slane %v3545_v55, 1  ;;  %v1148_v60 = vld [vmem:[#allocation2 + $0x240] sm:$0xff] }
  0x60   : > { %596 = vmatprep.subr.mxu0 %v3260_v0  ;;  %821 = vmatprep.subr.mxu1 %v3260_v0 }
  0x61   : > { %597 = vmatpush2.msra.mxu0 %v486_v2  ;;  %822 = vmatpush2.msra.mxu1 %v518_v3  ;;  %v1147_v2 = vld [vmem:[#allocation2 + $0x238] sm:$0xff]  ;;  %v260_v3 = vld [vmem:[%s3415_s18 + $0x90] sm:$0xff] }
  0x62   : > { %598 = vmatprep.subr.mxu0 %v3260_v0  ;;  %823 = vmatprep.subr.mxu1 %v3260_v0  ;;  %v376_v8 = vrot.slane %v260_v3, 1 }
  0x63   : > { %599 = vmatpush2.msra.mxu0 %v485_v5  ;;  %824 = vmatpush2.msra.mxu1 %v517_v6  ;;  %v3572_v5 = vld [vmem:[%s3415_s18 + $0x98] sm:$0xff] }
  0x64   : > { %600 = vmatprep.subr.mxu0 %v3260_v0  ;;  %602 = vmatprep.mubr.f32.mxu0 %v3441_v9  ;;  %v1179_v6 = vld [vmem:[#allocation2 + $0x338] sm:$0xff] }
  0x65   : > { %601 = vmatpush2.msra.mxu0 %v484_v11  ;;  %825 = vmatprep.subr.mxu1 %v3260_v0  ;;  %v377_v11 = vrot.slane %v3572_v5, 1 }
  0x66   : > { %603 = vmatmul.mubr.f32.vlgmr.msra.gmra.mxu0 %v242_v57  ;;  %826 = vmatpush2.msra.mxu1 %v516_v13  ;;  %v3552_v57 = vsel %vm345_vm0, %v367_v47, %v4891_v52  ;;  %v1146_v13 = vld [vmem:[#allocation2 + $0x230] sm:$0xff]  ;;  %v291_v52 = vld [vmem:[%s3415_s18 + $0x188] sm:$0xff] }
  0x67   : > { %827 = vmatprep.mubr.f32.mxu1 %v3452_v14  ;;  %1204 = vmatprep.subr.mxu0 %v3260_v0  ;;  %v462_v28 = vrot.slane %v291_v52, 1 }
  0x68   : > { %828 = vmatmul.mubr.f32.vlgmr.msra.gmra.mxu1 %v3426_v63  ;;  %1205 = vmatpush1.msra.mxu0 %v1155_v16  ;;  %v3585_v16 = vld [vmem:[%s3415_s18 + $0xa0] sm:$0x3] }
  0x69   : > { %1429 = vmatprep.subr.mxu1 %v3260_v0  ;;  %607 = vmatprep.mubr.f32.mxu0 %v3463_v19 }
  0x6a   : > { %1430 = vmatpush1.msra.mxu1 %v1187_v20  ;;  %608 = vmatmul.mubr.f32.gmra.mxu0 %v243_v58  ;;  %v371_v58 = vrot.slane %v257_v54, 1  ;;  %v4888_v20 = vrot.slane %v3585_v16, 1 }
  0x6b   : > { %832 = vmatprep.mubr.f32.mxu1 %v3471_v21  ;;  %1206 = vmatprep.subr.mxu0 %v3260_v0 }
  0x6c   : > { %833 = vmatmul.mubr.f32.gmra.mxu1 %v3429_v1  ;;  %1207 = vmatpush1.msra.mxu0 %v1154_v24  ;;  %v3599_v24 = vld [vmem:[%s3415_s18 + $0xb0] sm:$0xff] }
  0x6d   : > { %1431 = vmatprep.subr.mxu1 %v3260_v0  ;;  %612 = vmatprep.mubr.f32.mxu0 %v3452_v14 }
  0x6e   : > { %1432 = vmatpush1.msra.mxu1 %v1186_v26  ;;  %613 = vmatmul.mubr.f32.gmra.mxu0 %v3426_v63  ;;  %v3565_v63 = vsel %vm345_vm0, %v371_v58, %v372_v59  ;;  %v1177_v26 = vld [vmem:[#allocation2 + $0x328] sm:$0xff] }
  0x6f   : > { %837 = vmatprep.mubr.f32.mxu1 %v3483_v27  ;;  %1208 = vmatprep.subr.mxu0 %v3260_v0  ;;  %v1141_v58 = vld [vmem:[#allocation2 + $0x208] sm:$0xff] }
  0x70   : > { %838 = vmatmul.mubr.f32.gmra.mxu1 %v248_v17  ;;  %1209 = vmatpush1.msra.mxu0 %v1153_v29  ;;  %v3606_v29 = vsel %vm345_vm0, %v377_v11, %v4888_v20 }
  0x71   : > { %1433 = vmatprep.subr.mxu1 %v3260_v0  ;;  %617 = vmatprep.mubr.f32.mxu0 %v3471_v21 }
  0x72   : > { %1434 = vmatpush1.msra.mxu1 %v1185_v32  ;;  %618 = vmatmul.mubr.f32.gmra.mxu0 %v3429_v1  ;;  %v4889_v1 = vrot.slane %v3558_v61, 1  ;;  %v1144_v32 = vld [vmem:[#allocation2 + $0x220] sm:$0xff] }
  0x73   : > { %842 = vmatprep.mubr.f32.mxu1 %v3498_v33  ;;  %1210 = vmatprep.subr.mxu0 %v3260_v0 }
  0x74   : > { %843 = vmatmul.mubr.f32.gmra.mxu1 %v3458_v18  ;;  %1211 = vmatpush1.msra.mxu0 %v1152_v36  ;;  %v3579_v7 = vsel %vm345_vm0, %v372_v59, %v4889_v1  ;;  %v269_v59 = vld [vmem:[%s3415_s18 + $0xd8] sm:$0xff] }
  0x75   : > { %1435 = vmatprep.subr.mxu1 %v3260_v0  ;;  %622 = vmatprep.mubr.f32.mxu0 %v3483_v27 }
  0x76   : > { %1436 = vmatpush1.msra.mxu1 %v1184_v38  ;;  %623 = vmatmul.mubr.f32.gmra.mxu0 %v248_v17  ;;  %v1178_v17 = vld [vmem:[#allocation2 + $0x330] sm:$0xff]  ;;  %v4887_v38 = vrot.slane %v3612_v34, 1 }
  0x77   : > { %847 = vmatprep.mubr.f32.mxu1 %v3511_v39  ;;  %1212 = vmatprep.subr.mxu0 %v3260_v0 }
  0x78   : > { %848 = vmatmul.mubr.f32.gmra.mxu1 %v251_v30  ;;  %1213 = vmatpush1.msra.mxu0 %v1151_v41  ;;  %v1143_v41 = vld [vmem:[#allocation2 + $0x218] sm:$0xff] }
  0x79   : > { %1437 = vmatprep.subr.mxu1 %v3260_v0  ;;  %627 = vmatprep.mubr.f32.mxu0 %v3498_v33 }
  0x7a   : > { %1438 = vmatpush1.msra.mxu1 %v1183_v44  ;;  %628 = vmatmul.mubr.f32.gmra.mxu0 %v3458_v18  ;;  %v3592_v18 = vsel %vm345_vm0, %v376_v8, %v377_v11  ;;  %v1175_v44 = vld [vmem:[#allocation2 + $0x318] sm:$0xff]  ;;  %v3666_v8 = vld [vmem:[%s3415_s18 + $0xe8] sm:$0x3]  ;;  %v1172_v11 = vld [vmem:[#allocation2 + $0x300] sm:$0xff] }
  0x7b   : > { %852 = vmatprep.mubr.f32.mxu1 %v3525_v45  ;;  %1214 = vmatprep.subr.mxu0 %v3260_v0 }
  0x7c   : > { %853 = vmatmul.mubr.f32.gmra.mxu1 %v3490_v31  ;;  %1215 = vmatpush1.msra.mxu0 %v1150_v48 }
  0x7d   : > { %1439 = vmatprep.subr.mxu1 %v3260_v0  ;;  %632 = vmatprep.mubr.f32.mxu0 %v3511_v39 }
  0x7e   : > { %1440 = vmatpush1.msra.mxu1 %v1182_v50  ;;  %633 = vmatmul.mubr.f32.gmra.mxu0 %v251_v30  ;;  %v381_v30 = vrot.slane %v263_v23, 1  ;;  %v1142_v50 = vld [vmem:[#allocation2 + $0x210] sm:$0xff] }
  0x7f   : > { %857 = vmatprep.mubr.f32.mxu1 %v3538_v51  ;;  %1216 = vmatprep.subr.mxu0 %v3260_v0 }
  0x80   : > { %858 = vmatmul.mubr.f32.gmra.mxu1 %v254_v42  ;;  %1217 = vmatpush1.msra.mxu0 %v1149_v53  ;;  %v3639_v53 = vld [vmem:[%s3415_s18 + $0xd0] sm:$0x3] }
  0x81   : > { %1441 = vmatprep.subr.mxu1 %v3260_v0  ;;  %637 = vmatprep.mubr.f32.mxu0 %v3525_v45 }
  0x82   : > { %1442 = vmatpush1.msra.mxu1 %v1181_v56  ;;  %638 = vmatmul.mubr.f32.gmra.mxu0 %v3490_v31  ;;  %v382_v31 = vrot.slane %v3599_v24, 1  ;;  %v4885_v56 = vrot.slane %v3639_v53, 1 }
  0x83   : > { %862 = vmatprep.mubr.f32.mxu1 %v3552_v57  ;;  %1218 = vmatprep.subr.mxu0 %v3260_v0 }
  0x84   : > { %863 = vmatmul.mubr.f32.gmra.mxu1 %v3518_v43  ;;  %1219 = vmatpush1.msra.mxu0 %v1148_v60  ;;  %v3619_v36 = vsel %vm345_vm0, %v381_v30, %v382_v31  ;;  %v3633_v46 = vsel %vm345_vm0, %v382_v31, %v4887_v38  ;;  %v3653_v60 = vld [vmem:[%s3415_s18 + $0xe0] sm:$0xff]  ;;  %v3815_v38 = vld [vmem:[%s3415_s18 + $0x170] sm:$0xff] }
  0x85   : > { %1443 = vmatprep.subr.mxu1 %v3260_v0  ;;  %642 = vmatprep.mubr.f32.mxu0 %v3538_v51  ;;  %v422_v1 = vrot.slane %v3815_v38, 1 }
  0x86   : > { %1444 = vmatpush1.msra.mxu1 %v1180_v62  ;;  %643 = vmatmul.mubr.f32.gmra.mxu0 %v254_v42  ;;  %v266_v42 = vld [vmem:[%s3415_s18 + $0xc0] sm:$0xff]  ;;  %v1173_v62 = vld [vmem:[#allocation2 + $0x308] sm:$0xff] }
  0x87   : > { %867 = vmatprep.mubr.f32.mxu1 %v3565_v63  ;;  %1220 = vmatprep.subr.mxu0 %v3260_v0  ;;  %v386_v47 = vrot.slane %v266_v42, 1 }
  0x88   : > { %868 = vmatmul.mubr.f32.gmra.mxu1 %v257_v54  ;;  %1221 = vmatpush1.msra.mxu0 %v1147_v2 }
  0x89   : > { %1445 = vmatprep.subr.mxu1 %v3260_v0  ;;  %647 = vmatprep.mubr.f32.mxu0 %v3552_v57 }
  0x8a   : > { %1446 = vmatpush1.msra.mxu1 %v1179_v6  ;;  %648 = vmatmul.mubr.f32.gmra.mxu0 %v3518_v43  ;;  %v3626_v43 = vld [vmem:[%s3415_s18 + $0xc8] sm:$0xff]  ;;  %v1140_v6 = vld [vmem:[#allocation2 + $0x200] sm:$0xff] }
  0x8b   : > { %872 = vmatprep.mubr.f32.mxu1 %v3579_v7  ;;  %1222 = vmatprep.subr.mxu0 %v3260_v0  ;;  %v387_v48 = vrot.slane %v3626_v43, 1 }
  0x8c   : > { %873 = vmatmul.mubr.f32.gmra.mxu1 %v3545_v55  ;;  %1223 = vmatpush1.msra.mxu0 %v1146_v13 }
  0x8d   : > { %1447 = vmatprep.subr.mxu1 %v3260_v0  ;;  %652 = vmatprep.mubr.f32.mxu0 %v3565_v63  ;;  %v3660_v2 = vsel %vm345_vm0, %v387_v48, %v4885_v56 }
  0x8e   : > { %1448 = vmatpush1.msra.mxu1 %v1178_v17  ;;  %653 = vmatmul.mubr.f32.gmra.mxu0 %v257_v54  ;;  %v1174_v54 = vld [vmem:[#allocation2 + $0x310] sm:$0xff]  ;;  %v4884_v17 = vrot.slane %v3666_v8, 1 }
  0x8f   : > { %877 = vmatprep.mubr.f32.mxu1 %v3592_v18  ;;  %1224 = vmatprep.subr.mxu0 %v3260_v0 }
  0x90   : > { %878 = vmatmul.mubr.f32.gmra.mxu1 %v260_v3  ;;  %1225 = vmatpush1.msra.mxu0 %v1145_v22  ;;  %v1171_v22 = vld [vmem:[#allocation2 + $0x2f8] sm:$0xff] }
  0x91   : > { %1449 = vmatprep.subr.mxu1 %v3260_v0  ;;  %657 = vmatprep.mubr.f32.mxu0 %v3579_v7 }
  0x92   : > { %1450 = vmatpush1.msra.mxu1 %v1177_v26  ;;  %658 = vmatmul.mubr.f32.gmra.mxu0 %v3545_v55  ;;  %v3646_v55 = vsel %vm345_vm0, %v386_v47, %v387_v48  ;;  %v1203_v26 = vld [vmem:[#allocation2 + $0x3f8] sm:$0xff]  ;;  %v1169_v48 = vld [vmem:[#allocation2 + $0x2e8] sm:$0xff] }
  0x93   : > { %882 = vmatprep.mubr.f32.mxu1 %v3606_v29  ;;  %1226 = vmatprep.subr.mxu0 %v3260_v0 }
  0x94   : > { %883 = vmatmul.mubr.f32.gmra.mxu1 %v3572_v5  ;;  %1227 = vmatpush1.msra.mxu0 %v1144_v32 }
  0x95   : > { %1451 = vmatprep.subr.mxu1 %v3260_v0  ;;  %662 = vmatprep.mubr.f32.mxu0 %v3592_v18 }
  0x96   : > { %1452 = vmatpush1.msra.mxu1 %v1176_v35  ;;  %663 = vmatmul.mubr.f32.gmra.mxu0 %v260_v3  ;;  %v391_v3 = vrot.slane %v269_v59, 1  ;;  %v1170_v35 = vld [vmem:[#allocation2 + $0x2f0] sm:$0xff] }
  0x97   : > { %887 = vmatprep.mubr.f32.mxu1 %v3619_v36  ;;  %1228 = vmatprep.subr.mxu0 %v3260_v0 }
  0x98   : > { %888 = vmatmul.mubr.f32.gmra.mxu1 %v263_v23  ;;  %1229 = vmatpush1.msra.mxu0 %v1143_v41  ;;  %v3693_v41 = vld [vmem:[%s3415_s18 + $0x100] sm:$0x3] }
  0x99   : > { %1453 = vmatprep.subr.mxu1 %v3260_v0  ;;  %667 = vmatprep.mubr.f32.mxu0 %v3606_v29  ;;  %v4883_v47 = vrot.slane %v3693_v41, 1 }
  0x9a   : > { %1454 = vmatpush1.msra.mxu1 %v1175_v44  ;;  %668 = vmatmul.mubr.f32.gmra.mxu0 %v3572_v5  ;;  %v392_v5 = vrot.slane %v3653_v60, 1 }
  0x9b   : > { %892 = vmatprep.mubr.f32.mxu1 %v3633_v46  ;;  %1230 = vmatprep.subr.mxu0 %v3260_v0 }
  0x9c   : > { %893 = vmatmul.mubr.f32.gmra.mxu1 %v3599_v24  ;;  %1231 = vmatpush1.msra.mxu0 %v1142_v50  ;;  %v3673_v13 = vsel %vm345_vm0, %v391_v3, %v392_v5  ;;  %v3687_v30 = vsel %vm345_vm0, %v392_v5, %v4884_v17  ;;  %v3707_v50 = vld [vmem:[%s3415_s18 + $0x110] sm:$0xff]  ;;  %v3720_v5 = vld [vmem:[%s3415_s18 + $0x118] sm:$0x3] }
  0x9d   : > { %1455 = vmatprep.subr.mxu1 %v3260_v0  ;;  %672 = vmatprep.mubr.f32.mxu0 %v3619_v36  ;;  %v402_v3 = vrot.slane %v3707_v50, 1 }
  0x9e   : > { %1456 = vmatpush1.msra.mxu1 %v1174_v54  ;;  %673 = vmatmul.mubr.f32.gmra.mxu0 %v263_v23  ;;  %v272_v23 = vld [vmem:[%s3415_s18 + $0xf0] sm:$0xff]  ;;  %v1201_v54 = vld [vmem:[#allocation2 + $0x3e8] sm:$0xff] }
  0x9f   : > { %897 = vmatprep.mubr.f32.mxu1 %v3646_v55  ;;  %1232 = vmatprep.subr.mxu0 %v3260_v0  ;;  %v396_v31 = vrot.slane %v272_v23, 1 }
  0xa0   : > { %898 = vmatmul.mubr.f32.gmra.mxu1 %v266_v42  ;;  %1233 = vmatpush1.msra.mxu0 %v1141_v58 }
  0xa1   : > { %1457 = vmatprep.subr.mxu1 %v3260_v0  ;;  %677 = vmatprep.mubr.f32.mxu0 %v3633_v46 }
  0xa2   : > { %1458 = vmatpush1.msra.mxu1 %v1173_v62  ;;  %678 = vmatmul.mubr.f32.gmra.mxu0 %v3599_v24  ;;  %v3680_v24 = vld [vmem:[%s3415_s18 + $0xf8] sm:$0xff] }
  0xa3   : > { %902 = vmatprep.mubr.f32.mxu1 %v3660_v2  ;;  %1234 = vmatprep.subr.mxu0 %v3260_v0  ;;  %v397_v32 = vrot.slane %v3680_v24, 1 }
  0xa4   : > { %903 = vmatmul.mubr.f32.gmra.mxu1 %v3626_v43  ;;  %1235 = vmatpush1.msra.mxu0 %v1140_v6  ;;  %v1200_v6 = vld [vmem:[#allocation2 + $0x3e0] sm:$0xff] }
  0xa5   : > { %1459 = vmatprep.subr.mxu1 %v3260_v0  ;;  %682 = vmatprep.mubr.f32.mxu0 %v3646_v55  ;;  %v3700_v44 = vsel %vm345_vm0, %v396_v31, %v397_v32  ;;  %v3714_v58 = vsel %vm345_vm0, %v397_v32, %v4883_v47  ;;  %v3734_v31 = vld [vmem:[%s3415_s18 + $0x128] sm:$0xff]  ;;  %v1199_v32 = vld [vmem:[#allocation2 + $0x3d8] sm:$0xff] }
  0xa6   : > { %1460 = vmatpush1.msra.mxu1 %v1172_v11  ;;  %683 = vmatmul.mubr.f32.gmra.mxu0 %v266_v42  ;;  %v1202_v42 = vld [vmem:[#allocation2 + $0x3f0] sm:$0xff]  ;;  %v3788_v47 = vld [vmem:[%s3415_s18 + $0x158] sm:$0xff] }
  0xa7   : > { %907 = vmatprep.mubr.f32.mxu1 %v3673_v13  ;;  %1236 = vmatprep.subr.mxu0 %v3260_v0  ;;  %v417_v56 = vrot.slane %v3788_v47, 1 }
  0xa8   : > { %908 = vmatmul.mubr.f32.gmra.mxu1 %v269_v59  ;;  %1237 = vmatpush2.msra.mxu0 %v1171_v22  ;;  %v4881_v22 = vrot.slane %v3720_v5, 1 }
  0xa9   : > { %1461 = vmatprep.subr.mxu1 %v3260_v0  ;;  %687 = vmatprep.mubr.f32.mxu0 %v3660_v2 }
  0xaa   : > { %1462 = vmatpush2.msra.mxu1 %v1203_v26  ;;  %688 = vmatmul.mubr.f32.gmra.mxu0 %v3626_v43  ;;  %v275_v43 = vld [vmem:[%s3415_s18 + $0x108] sm:$0xff]  ;;  %v1167_v26 = vld [vmem:[#allocation2 + $0x2d8] sm:$0xff] }
  0xab   : > { %912 = vmatprep.mubr.f32.mxu1 %v3687_v30  ;;  %1238 = vmatprep.subr.mxu0 %v3260_v0  ;;  %v401_v62 = vrot.slane %v275_v43, 1 }
  0xac   : > { %913 = vmatmul.mubr.f32.gmra.mxu1 %v3653_v60  ;;  %1239 = vmatpush2.msra.mxu0 %v1170_v35  ;;  %v3741_v35 = vsel %vm345_vm0, %v402_v3, %v4881_v22 }
  0xad   : > { %1463 = vmatprep.subr.mxu1 %v3260_v0  ;;  %692 = vmatprep.mubr.f32.mxu0 %v3673_v13  ;;  %v3727_v11 = vsel %vm345_vm0, %v401_v62, %v402_v3  ;;  %v1198_v62 = vld [vmem:[#allocation2 + $0x3d0] sm:$0xff] }
  0xae   : > { %1464 = vmatpush2.msra.mxu1 %v1202_v42  ;;  %693 = vmatmul.mubr.f32.gmra.mxu0 %v269_v59  ;;  %v1168_v59 = vld [vmem:[#allocation2 + $0x2e0] sm:$0xff] }
  0xaf   : > { %917 = vmatprep.mubr.f32.mxu1 %v3700_v44  ;;  %1240 = vmatprep.subr.mxu0 %v3260_v0 }
  0xb0   : > { %918 = vmatmul.mubr.f32.gmra.mxu1 %v272_v23  ;;  %1241 = vmatpush2.msra.mxu0 %v1169_v48  ;;  %v407_v48 = vrot.slane %v3734_v31, 1 }
  0xb1   : > { %1465 = vmatprep.subr.mxu1 %v3260_v0  ;;  %697 = vmatprep.mubr.f32.mxu0 %v3687_v30 }
  0xb2   : > { %1466 = vmatpush2.msra.mxu1 %v1201_v54  ;;  %698 = vmatmul.mubr.f32.gmra.mxu0 %v3653_v60  ;;  %v278_v60 = vld [vmem:[%s3415_s18 + $0x120] sm:$0xff]  ;;  %v3747_v54 = vld [vmem:[%s3415_s18 + $0x130] sm:$0x3] }
  0xb3   : > { %922 = vmatprep.mubr.f32.mxu1 %v3714_v58  ;;  %1242 = vmatprep.subr.mxu0 %v3260_v0  ;;  %v406_v42 = vrot.slane %v278_v60, 1 }
  0xb4   : > { %923 = vmatmul.mubr.f32.gmra.mxu1 %v3680_v24  ;;  %1243 = vmatpush2.msra.mxu0 %v1168_v59  ;;  %v4882_v59 = vrot.slane %v3747_v54, 1 }
  0xb5   : > { %1467 = vmatprep.subr.mxu1 %v3260_v0  ;;  %702 = vmatprep.mubr.f32.mxu0 %v3700_v44  ;;  %v3754_v3 = vsel %vm345_vm0, %v406_v42, %v407_v48 }
  0xb6   : > { %1468 = vmatpush2.msra.mxu1 %v1200_v6  ;;  %703 = vmatmul.mubr.f32.gmra.mxu0 %v272_v23  ;;  %v1166_v23 = vld [vmem:[#allocation2 + $0x2d0] sm:$0xff]  ;;  %v1165_v6 = vld [vmem:[#allocation2 + $0x2c8] sm:$0xff]  ;;  %v3768_v42 = vsel %vm345_vm0, %v407_v48, %v4882_v59  ;;  %v1196_v48 = vld [vmem:[#allocation2 + $0x3c0] sm:$0xff] }
  0xb7   : > { %927 = vmatprep.mubr.f32.mxu1 %v3727_v11  ;;  %1244 = vmatprep.subr.mxu0 %v3260_v0 }
  0xb8   : > { %928 = vmatmul.mubr.f32.gmra.mxu1 %v275_v43  ;;  %1245 = vmatpush2.msra.mxu0 %v1167_v26  ;;  %v3761_v26 = vld [vmem:[%s3415_s18 + $0x140] sm:$0xff] }
  0xb9   : > { %1469 = vmatprep.subr.mxu1 %v3260_v0  ;;  %707 = vmatprep.mubr.f32.mxu0 %v3714_v58  ;;  %v412_v22 = vrot.slane %v3761_v26, 1 }
  0xba   : > { %1470 = vmatpush2.msra.mxu1 %v1199_v32  ;;  %708 = vmatmul.mubr.f32.gmra.mxu0 %v3680_v24  ;;  %v281_v24 = vld [vmem:[%s3415_s18 + $0x138] sm:$0xff]  ;;  %v1197_v32 = vld [vmem:[#allocation2 + $0x3c8] sm:$0xff] }
  0xbb   : > { %932 = vmatprep.mubr.f32.mxu1 %v3741_v35  ;;  %1246 = vmatprep.subr.mxu0 %v3260_v0 }
  0xbc   : > { %933 = vmatmul.mubr.f32.gmra.mxu1 %v3707_v50  ;;  %1247 = vmatpush2.msra.mxu0 %v1166_v23  ;;  %v411_v23 = vrot.slane %v281_v24, 1 }
  0xbd   : > { %1471 = vmatprep.subr.mxu1 %v3260_v0  ;;  %712 = vmatprep.mubr.f32.mxu0 %v3727_v11 }
  0xbe   : > { %1472 = vmatpush2.msra.mxu1 %v1198_v62  ;;  %713 = vmatmul.mubr.f32.gmra.mxu0 %v275_v43  ;;  %v1164_v43 = vld [vmem:[#allocation2 + $0x2c0] sm:$0xff]  ;;  %v3774_v62 = vld [vmem:[%s3415_s18 + $0x148] sm:$0x3] }
  0xbf   : > { %937 = vmatprep.mubr.f32.mxu1 %v3754_v3  ;;  %1248 = vmatprep.subr.mxu0 %v3260_v0  ;;  %v4886_v59 = vrot.slane %v3774_v62, 1 }
  0xc0   : > { %938 = vmatmul.mubr.f32.gmra.mxu1 %v278_v60  ;;  %1249 = vmatpush2.msra.mxu0 %v1165_v6  ;;  %v3781_v6 = vsel %vm345_vm0, %v411_v23, %v412_v22 }
  0xc1   : > { %1473 = vmatprep.subr.mxu1 %v3260_v0  ;;  %717 = vmatprep.mubr.f32.mxu0 %v3741_v35  ;;  %v3795_v23 = vsel %vm345_vm0, %v412_v22, %v4886_v59  ;;  %v1194_v22 = vld [vmem:[#allocation2 + $0x3b0] sm:$0xff] }
  0xc2   : > { %1474 = vmatpush2.msra.mxu1 %v1197_v32  ;;  %718 = vmatmul.mubr.f32.gmra.mxu0 %v3707_v50  ;;  %v1163_v32 = vld [vmem:[#allocation2 + $0x2b8] sm:$0xff]  ;;  %v284_v50 = vld [vmem:[%s3415_s18 + $0x150] sm:$0xff] }
  0xc3   : > { %942 = vmatprep.mubr.f32.mxu1 %v3768_v42  ;;  %1250 = vmatprep.subr.mxu0 %v3260_v0  ;;  %v416_v17 = vrot.slane %v284_v50, 1 }
  0xc4   : > { %943 = vmatmul.mubr.f32.gmra.mxu1 %v3734_v31  ;;  %1251 = vmatpush2.msra.mxu0 %v1164_v43  ;;  %v1195_v43 = vld [vmem:[#allocation2 + $0x3b8] sm:$0xff] }
  0xc5   : > { %1475 = vmatprep.subr.mxu1 %v3260_v0  ;;  %722 = vmatprep.mubr.f32.mxu0 %v3754_v3 }
  0xc6   : > { %1476 = vmatpush2.msra.mxu1 %v1196_v48  ;;  %723 = vmatmul.mubr.f32.gmra.mxu0 %v278_v60  ;;  %v1162_v60 = vld [vmem:[#allocation2 + $0x2b0] sm:$0xff]  ;;  %v3801_v48 = vld [vmem:[%s3415_s18 + $0x160] sm:$0x3] }
  0xc7   : > { %947 = vmatprep.mubr.f32.mxu1 %v3781_v6  ;;  %1252 = vmatprep.subr.mxu0 %v3260_v0  ;;  %v4890_v59 = vrot.slane %v3801_v48, 1 }
  0xc8   : > { %948 = vmatmul.mubr.f32.gmra.mxu1 %v281_v24  ;;  %1253 = vmatpush2.msra.mxu0 %v1163_v32  ;;  %v3808_v32 = vsel %vm345_vm0, %v416_v17, %v417_v56 }
  0xc9   : > { %1477 = vmatprep.subr.mxu1 %v3260_v0  ;;  %727 = vmatprep.mubr.f32.mxu0 %v3768_v42  ;;  %v3822_v17 = vsel %vm345_vm0, %v417_v56, %v4890_v59  ;;  %v1192_v56 = vld [vmem:[#allocation2 + $0x3a0] sm:$0xff] }
  0xca   : > { %1478 = vmatpush2.msra.mxu1 %v1195_v43  ;;  %728 = vmatmul.mubr.f32.gmra.mxu0 %v3734_v31  ;;  %v1161_v43 = vld [vmem:[#allocation2 + $0x2a8] sm:$0xff] }
  0xcb   : > { %952 = vmatprep.mubr.f32.mxu1 %v3795_v23  ;;  %1254 = vmatprep.subr.mxu0 %v3260_v0  ;;  %v287_v31 = vld [vmem:[%s3415_s18 + $0x168] sm:$0xff] }
  0xcc   : > { %953 = vmatmul.mubr.f32.gmra.mxu1 %v3761_v26  ;;  %1255 = vmatpush2.msra.mxu0 %v1162_v60  ;;  %v1193_v60 = vld [vmem:[#allocation2 + $0x3a8] sm:$0xff]  ;;  %v421_v20 = vrot.slane %v287_v31, 1 }
  0xcd   : > { %1479 = vmatprep.subr.mxu1 %v3260_v0  ;;  %732 = vmatprep.mubr.f32.mxu0 %v3781_v6 }
  0xce   : > { %1480 = vmatpush2.msra.mxu1 %v1194_v22  ;;  %733 = vmatmul.mubr.f32.gmra.mxu0 %v281_v24  ;;  %v1160_v24 = vld [vmem:[#allocation2 + $0x2a0] sm:$0xff]  ;;  %v3828_v22 = vld [vmem:[%s3415_s18 + $0x178] sm:$0x3] }
  0xcf   : > { %957 = vmatprep.mubr.f32.mxu1 %v3808_v32  ;;  %1256 = vmatprep.subr.mxu0 %v3260_v0  ;;  %4946 = vst [vmem:[#allocation8_spill] sm:$0xff] %v3828_v22  ;;  %v4894_v59 = vrot.slane %v3828_v22, 1  ;;  %v1024_v22 = vrot.slane %v3471_v21, 1 }
  0xd0   : > { %958 = vmatmul.mubr.f32.gmra.mxu1 %v284_v50  ;;  %1257 = vmatpush2.msra.mxu0 %v1161_v43  ;;  %v3835_v43 = vsel %vm345_vm0, %v421_v20, %v422_v1 }
  0xd1   : > { %1481 = vmatprep.subr.mxu1 %v3260_v0  ;;  %737 = vmatprep.mubr.f32.mxu0 %v3795_v23  ;;  %4947 = vst [vmem:[#allocation9_spill] sm:$0xff] %v3835_v43  ;;  %v3847_v20 = vsel %vm345_vm0, %v422_v1, %v4894_v59 }
  0xd2   : > { %1482 = vmatpush2.msra.mxu1 %v1193_v60  ;;  %738 = vmatmul.mubr.f32.gmra.mxu0 %v3761_v26  ;;  %v1159_v60 = vld [vmem:[#allocation2 + $0x298] sm:$0xff]  ;;  %v290_v26 = vld [vmem:[%s3415_s18 + $0x180] sm:$0xff]  ;;  %4948 = vst [vmem:[#allocation10_spill] sm:$0xff] %v3847_v20 }
  0xd3   : > { %962 = vmatprep.mubr.f32.mxu1 %v3822_v17  ;;  %1258 = vmatprep.subr.mxu0 %v3260_v0  ;;  %v461_v40 = vrot.slane %v290_v26, 1 }
  0xd4   : > { %963 = vmatmul.mubr.f32.gmra.mxu1 %v3788_v47  ;;  %1259 = vmatpush2.msra.mxu0 %v1160_v24  ;;  %v1191_v24 = vld [vmem:[#allocation2 + $0x398] sm:$0xff] }
  0xd5   : > { %1483 = vmatprep.subr.mxu1 %v3260_v0  ;;  %742 = vmatprep.mubr.f32.mxu0 %v3808_v32  ;;  %v3859_v1 = vsel %vm345_vm0, %v461_v40, %v462_v28 }
  0xd6   : > { %1484 = vmatpush2.msra.mxu1 %v1192_v56  ;;  %743 = vmatmul.mubr.f32.gmra.mxu0 %v284_v50  ;;  %v1158_v56 = vld [vmem:[#allocation2 + $0x290] sm:$0xff] }
  0xd7   : > { %967 = vmatprep.mubr.f32.mxu1 %v3835_v43  ;;  %1260 = vmatprep.subr.mxu0 %v3260_v0  ;;  %v3852_v50 = vld [vmem:[%s3415_s18 + $0x190] sm:$0x3] }
  0xd8   : > { %968 = vmatmul.mubr.f32.gmra.mxu1 %v287_v31  ;;  %1261 = vmatpush2.msra.mxu0 %v1159_v60  ;;  %4949 = vst [vmem:[#allocation11_spill] sm:$0xff] %v3852_v50  ;;  %v1190_v60 = vld [vmem:[#allocation2 + $0x390] sm:$0xff]  ;;  %v4898_v59 = vrot.slane %v3852_v50, 1  ;;  %v4951_v50 = vrot.slane %v3444_v10, 1 }
  0xd9   : > { %1485 = vmatprep.subr.mxu1 %v3260_v0  ;;  %747 = vmatprep.mubr.f32.mxu0 %v3822_v17 }
  0xda   : > { %1486 = vmatpush2.msra.mxu1 %v1191_v24  ;;  %748 = vmatmul.mubr.f32.gmra.mxu0 %v3788_v47  ;;  %v1157_v24 = vld [vmem:[#allocation2 + $0x288] sm:$0xff]  ;;  %v1020_v47 = vrot.slane %v3441_v9, 1  ;;  %v3871_v40 = vsel %vm345_vm0, %v462_v28, %v4898_v59  ;;  %v1188_v28 = vld [vmem:[#allocation2 + $0x380] sm:$0xff]  ;;  %v3884_v59 = vsel %vm345_vm0, %v1023_v12, %v1024_v22  ;;  %v1030_v12 = vrot.slane %v3483_v27, 1 }
  0xdb   : > { %972 = vmatprep.mubr.f32.mxu1 %v3847_v20  ;;  %1262 = vmatprep.subr.mxu0 %v3260_v0 }
  0xdc   : > { %973 = vmatmul.mubr.f32.gmra.mxu1 %v3815_v38  ;;  %1263 = vmatpush2.msra.mxu0 %v1158_v56  ;;  %v1189_v56 = vld [vmem:[#allocation2 + $0x388] sm:$0xff] }
  0xdd   : > { %1487 = vmatprep.subr.mxu1 %v3260_v0  ;;  %752 = vmatprep.mubr.f32.mxu0 %v3835_v43 }
  0xde   : > { %1488 = vmatpush2.msra.mxu1 %v1190_v60  ;;  %753 = vmatmul.mubr.f32.gmra.mxu0 %v287_v31  ;;  %v1156_v31 = vld [vmem:[#allocation2 + $0x280] sm:$0xff]  ;;  %v4950_v60 = vrot.slane %v3434_v4, 1 }
  0xdf   : > { %977 = vmatprep.mubr.f32.mxu1 %v3859_v1  ;;  %1264 = vmatprep.subr.mxu0 %v3260_v0 }
  0xe0   : > { %978 = vmatmul.mubr.f32.gmra.mxu1 %v290_v26  ;;  %1265 = vmatpush2.msra.mxu0 %v1157_v24  ;;  %v1022_v26 = vsel %vm345_vm0, %v1020_v47, %v1021_v15  ;;  %v1026_v24 = vrot.slane %v4950_v60, 1  ;;  %v4952_v47 = vrot.slane %v3477_v25, 1  ;;  %v1035_v25 = vrot.slane %v3511_v39, 1 }
  0xe1   : > { %1489 = vmatprep.subr.mxu1 %v3260_v0  ;;  %757 = vmatprep.mubr.f32.mxu0 %v3847_v20 }
  0xe2   : > { %1490 = vmatpush2.msra.mxu1 %v1189_v56  ;;  %758 = vmatmul.mubr.f32.gmra.mxu0 %v3815_v38  ;;  %v1028_v56 = vrot.slane %v4951_v50, 1  ;;  %v1713_v38 = vld [vmem:[#allocation2 + $0x478] sm:$0xff]  ;;  %v1027_v4 = vsel %vm345_vm0, %v1021_v15, %v1026_v24  ;;  %v1031_v50 = vrot.slane %v3498_v33, 1  ;;  %v1744_v15 = vld [vmem:[#allocation2 + $0x570] sm:$0xff]  ;;  %v1036_v24 = vrot.slane %v3525_v45, 1 }
  0xe3   : > { %982 = vmatprep.mubr.f32.mxu1 %v3871_v40  ;;  %1266 = vmatprep.subr.mxu0 %v3260_v0 }
  0xe4   : > { %983 = vmatmul.mubr.f32.gmra.mxu1 %v291_v52  ;;  %1267 = vmatpush2.msra.mxu0 %v1156_v31  ;;  %v1745_v52 = vld [vmem:[#allocation2 + $0x578] sm:$0xff]  ;;  %v3895_v10 = vsel %vm345_vm0, %v1024_v22, %v1028_v56  ;;  %v3905_v22 = vsel %vm345_vm0, %v1030_v12, %v1031_v50  ;;  %v1033_v31 = vrot.slane %v4952_v47, 1  ;;  %v1742_v56 = vld [vmem:[#allocation2 + $0x560] sm:$0xff]  ;;  %v1708_v47 = vld [vmem:[#allocation2 + $0x450] sm:$0xff] }
  0xe5   : > { %1491 = vmatprep.subr.mxu1 %v3260_v0  ;;  %1268 = vmatprep.mubr.f32.mxu0 %v1022_v26  ;;  %v1711_v26 = vld [vmem:[#allocation2 + $0x468] sm:$0xff]  ;;  %v1709_v12 = vld [vmem:[#allocation2 + $0x458] sm:$0xff] }
  0xe6   : > { %1492 = vmatpush2.msra.mxu1 %v1188_v28  ;;  %1269 = vmatmul.mubr.f32.vlgmr.msra.gmra.mxu0 %v3441_v9  ;;  %v1712_v9 = vld [vmem:[#allocation2 + $0x470] sm:$0xff]  ;;  %v3916_v60 = vsel %vm345_vm0, %v1031_v50, %v1033_v31  ;;  %v1710_v28 = vld [vmem:[#allocation2 + $0x460] sm:$0xff]  ;;  %v1741_v50 = vld [vmem:[#allocation2 + $0x558] sm:$0xff] }
  0xe7   : > { %1493 = vmatprep.mubr.f32.mxu1 %v3884_v59  ;;  %1762 = vmatprep.subr.mxu0 %v3260_v0  ;;  %v1740_v31 = vld [vmem:[#allocation2 + $0x550] sm:$0xff] }
  0xe8   : > { %1494 = vmatmul.mubr.f32.vlgmr.msra.gmra.mxu1 %v3452_v14  ;;  %1763 = vmatpush1.msra.mxu0 %v1713_v38  ;;  %v3927_v38 = vsel %vm345_vm0, %v1035_v25, %v1036_v24 }
  0xe9   : > { %1987 = vmatprep.subr.mxu1 %v3260_v0  ;;  %1273 = vmatprep.mubr.f32.mxu0 %v1027_v4  ;;  %v4953_v4 = vrot.slane %v3504_v37, 1  ;;  %v1040_v37 = vrot.slane %v3538_v51, 1 }
  0xea   : > { %1988 = vmatpush1.msra.mxu1 %v1745_v52  ;;  %1274 = vmatmul.mubr.f32.gmra.mxu0 %v3463_v19  ;;  %v1743_v19 = vld [vmem:[#allocation2 + $0x568] sm:$0xff] }
  0xeb   : > { %1498 = vmatprep.mubr.f32.mxu1 %v3895_v10  ;;  %1764 = vmatprep.subr.mxu0 %v3260_v0  ;;  %v1038_v52 = vrot.slane %v4953_v4, 1  ;;  %v1046_v4 = vrot.slane %v3579_v7, 1 }
  0xec   : > { %1499 = vmatmul.mubr.f32.gmra.mxu1 %v3471_v21  ;;  %1765 = vmatpush1.msra.mxu0 %v1712_v9 }
  0xed   : > { %1989 = vmatprep.subr.mxu1 %v3260_v0  ;;  %1278 = vmatprep.mubr.f32.mxu0 %v3884_v59  ;;  %v3938_v9 = vsel %vm345_vm0, %v1036_v24, %v1038_v52  ;;  %v1707_v24 = vld [vmem:[#allocation2 + $0x448] sm:$0xff]  ;;  %v1706_v52 = vld [vmem:[#allocation2 + $0x440] sm:$0xff] }
  0xee   : > { %1990 = vmatpush1.msra.mxu1 %v1744_v15  ;;  %1279 = vmatmul.mubr.f32.gmra.mxu0 %v3452_v14  ;;  %v1041_v15 = vrot.slane %v3552_v57, 1 }
  0xef   : > { %1503 = vmatprep.mubr.f32.mxu1 %v3905_v22  ;;  %1766 = vmatprep.subr.mxu0 %v3260_v0 }
  0xf0   : > { %1504 = vmatmul.mubr.f32.gmra.mxu1 %v3483_v27  ;;  %1767 = vmatpush1.msra.mxu0 %v1711_v26  ;;  %v3949_v26 = vsel %vm345_vm0, %v1040_v37, %v1041_v15  ;;  %v4955_v37 = vrot.slane %v3558_v61, 1  ;;  %v1050_v61 = vrot.slane %v3592_v18, 1 }
  0xf1   : > { %1991 = vmatprep.subr.mxu1 %v3260_v0  ;;  %1283 = vmatprep.mubr.f32.mxu0 %v3895_v10 }
  0xf2   : > { %1992 = vmatpush1.msra.mxu1 %v1743_v19  ;;  %1284 = vmatmul.mubr.f32.gmra.mxu0 %v3471_v21  ;;  %v4954_v19 = vrot.slane %v3531_v49, 1  ;;  %v1045_v49 = vrot.slane %v3565_v63, 1 }
  0xf3   : > { %1508 = vmatprep.mubr.f32.mxu1 %v3916_v60  ;;  %1768 = vmatprep.subr.mxu0 %v3260_v0 }
  0xf4   : > { %1509 = vmatmul.mubr.f32.gmra.mxu1 %v3498_v33  ;;  %1769 = vmatpush1.msra.mxu0 %v1710_v28  ;;  %v1043_v25 = vrot.slane %v4954_v19, 1  ;;  %v1739_v28 = vld [vmem:[#allocation2 + $0x548] sm:$0xff] }
  0xf5   : > { %1993 = vmatprep.subr.mxu1 %v3260_v0  ;;  %1288 = vmatprep.mubr.f32.mxu0 %v3905_v22 }
  0xf6   : > { %1994 = vmatpush1.msra.mxu1 %v1742_v56  ;;  %1289 = vmatmul.mubr.f32.gmra.mxu0 %v3483_v27  ;;  %v3960_v56 = vsel %vm345_vm0, %v1041_v15, %v1043_v25  ;;  %v1048_v15 = vrot.slane %v4955_v37, 1  ;;  %v1051_v25 = vrot.slane %v3606_v29, 1  ;;  %v1735_v37 = vld [vmem:[#allocation2 + $0x528] sm:$0xff] }
  0xf7   : > { %1513 = vmatprep.mubr.f32.mxu1 %v3927_v38  ;;  %1770 = vmatprep.subr.mxu0 %v3260_v0 }
  0xf8   : > { %1514 = vmatmul.mubr.f32.gmra.mxu1 %v3511_v39  ;;  %1771 = vmatpush1.msra.mxu0 %v1709_v12  ;;  %v1738_v12 = vld [vmem:[#allocation2 + $0x540] sm:$0xff]  ;;  %v3982_v19 = vsel %vm345_vm0, %v1046_v4, %v1048_v15 }
  0xf9   : > { %1995 = vmatprep.subr.mxu1 %v3260_v0  ;;  %1293 = vmatprep.mubr.f32.mxu0 %v3916_v60  ;;  %4956 = vst [vmem:[#allocation12_spill] sm:$0xff] %v3982_v19 }
  0xfa   : > { %1996 = vmatpush1.msra.mxu1 %v1741_v50  ;;  %1294 = vmatmul.mubr.f32.gmra.mxu0 %v3498_v33  ;;  %v3971_v50 = vsel %vm345_vm0, %v1045_v49, %v1046_v4  ;;  %v3993_v49 = vsel %vm345_vm0, %v1050_v61, %v1051_v25  ;;  %v4958_v4 = vrot.slane %v3585_v16, 1  ;;  %v1055_v16 = vrot.slane %v3619_v36, 1  ;;  %v1734_v61 = vld [vmem:[#allocation2 + $0x520] sm:$0xff] }
  0xfb   : > { %1518 = vmatprep.mubr.f32.mxu1 %v3938_v9  ;;  %1772 = vmatprep.subr.mxu0 %v3260_v0  ;;  %4957 = vst [vmem:[#allocation13_spill] sm:$0xff] %v3993_v49 }
  0xfc   : > { %1519 = vmatmul.mubr.f32.gmra.mxu1 %v3525_v45  ;;  %1773 = vmatpush1.msra.mxu0 %v1708_v47  ;;  %v1705_v47 = vld [vmem:[#allocation2 + $0x438] sm:$0xff] }
  0xfd   : > { %1997 = vmatprep.subr.mxu1 %v3260_v0  ;;  %1298 = vmatprep.mubr.f32.mxu0 %v3927_v38 }
  0xfe   : > { %1998 = vmatpush1.msra.mxu1 %v1740_v31  ;;  %1299 = vmatmul.mubr.f32.gmra.mxu0 %v3511_v39  ;;  %v1737_v31 = vld [vmem:[#allocation2 + $0x538] sm:$0xff] }
  0xff   : > { %1523 = vmatprep.mubr.f32.mxu1 %v3949_v26  ;;  %1774 = vmatprep.subr.mxu0 %v3260_v0 }
 0x100   : > { %1524 = vmatmul.mubr.f32.gmra.mxu1 %v3538_v51  ;;  %1775 = vmatpush1.msra.mxu0 %v1707_v24  ;;  %v1704_v24 = vld [vmem:[#allocation2 + $0x430] sm:$0xff] }
 0x101   : > { %1999 = vmatprep.subr.mxu1 %v3260_v0  ;;  %1303 = vmatprep.mubr.f32.mxu0 %v3938_v9 }
 0x102   : > { %2000 = vmatpush1.msra.mxu1 %v1739_v28  ;;  %1304 = vmatmul.mubr.f32.gmra.mxu0 %v3525_v45  ;;  %v1736_v28 = vld [vmem:[#allocation2 + $0x530] sm:$0xff] }
 0x103   : > { %1528 = vmatprep.mubr.f32.mxu1 %v3960_v56  ;;  %1776 = vmatprep.subr.mxu0 %v3260_v0 }
 0x104   : > { %1529 = vmatmul.mubr.f32.gmra.mxu1 %v3552_v57  ;;  %1777 = vmatpush1.msra.mxu0 %v1706_v52  ;;  %v1053_v52 = vrot.slane %v4958_v4, 1  ;;  %v1701_v4 = vld [vmem:[#allocation2 + $0x418] sm:$0xff] }
 0x105   : > { %2001 = vmatprep.subr.mxu1 %v3260_v0  ;;  %1308 = vmatprep.mubr.f32.mxu0 %v3949_v26 }
 0x106   : > { %2002 = vmatpush1.msra.mxu1 %v1738_v12  ;;  %1309 = vmatmul.mubr.f32.gmra.mxu0 %v3538_v51  ;;  %v1703_v12 = vld [vmem:[#allocation2 + $0x428] sm:$0xff]  ;;  %v4004_v15 = vsel %vm345_vm0, %v1051_v25, %v1053_v52  ;;  %v1733_v52 = vld [vmem:[#allocation2 + $0x518] sm:$0xff] }
 0x107   : > { %1533 = vmatprep.mubr.f32.mxu1 %v3971_v50  ;;  %1778 = vmatprep.subr.mxu0 %v3260_v0  ;;  %4959 = vst [vmem:[#allocation14_spill] sm:$0xff] %v4004_v15 }
 0x108   : > { %1534 = vmatmul.mubr.f32.gmra.mxu1 %v3565_v63  ;;  %1779 = vmatpush1.msra.mxu0 %v1705_v47  ;;  %v1056_v47 = vrot.slane %v3633_v46, 1 }
 0x109   : > { %2003 = vmatprep.subr.mxu1 %v3260_v0  ;;  %1313 = vmatprep.mubr.f32.mxu0 %v3960_v56 }
 0x10a   : > { %2004 = vmatpush1.msra.mxu1 %v1737_v31  ;;  %1314 = vmatmul.mubr.f32.gmra.mxu0 %v3552_v57  ;;  %v1702_v31 = vld [vmem:[#allocation2 + $0x420] sm:$0xff]  ;;  %v4015_v25 = vsel %vm345_vm0, %v1055_v16, %v1056_v47  ;;  %v1700_v16 = vld [vmem:[#allocation2 + $0x410] sm:$0xff] }
 0x10b   : > { %1538 = vmatprep.mubr.f32.mxu1 %v3982_v19  ;;  %1780 = vmatprep.subr.mxu0 %v3260_v0  ;;  %4960 = vst [vmem:[#allocation15_spill] sm:$0xff] %v4015_v25 }
 0x10c   : > { %1539 = vmatmul.mubr.f32.gmra.mxu1 %v3579_v7  ;;  %1781 = vmatpush1.msra.mxu0 %v1704_v24  ;;  %v4961_v24 = vrot.slane %v3612_v34, 1  ;;  %v1060_v34 = vrot.slane %v3646_v55, 1 }
 0x10d   : > { %2005 = vmatprep.subr.mxu1 %v3260_v0  ;;  %1318 = vmatprep.mubr.f32.mxu0 %v3971_v50 }
 0x10e   : > { %2006 = vmatpush1.msra.mxu1 %v1736_v28  ;;  %1319 = vmatmul.mubr.f32.gmra.mxu0 %v3565_v63  ;;  %v1058_v28 = vrot.slane %v4961_v24, 1 }
 0x10f   : > { %1543 = vmatprep.mubr.f32.mxu1 %v3993_v49  ;;  %1782 = vmatprep.subr.mxu0 %v3260_v0 }
 0x110   : > { %1544 = vmatmul.mubr.f32.gmra.mxu1 %v3592_v18  ;;  %1783 = vmatpush1.msra.mxu0 %v1703_v12  ;;  %v4026_v12 = vsel %vm345_vm0, %v1056_v47, %v1058_v28  ;;  %v1699_v28 = vld [vmem:[#allocation2 + $0x408] sm:$0xff] }
 0x111   : > { %2007 = vmatprep.subr.mxu1 %v3260_v0  ;;  %1323 = vmatprep.mubr.f32.mxu0 %v3982_v19  ;;  %4962 = vst [vmem:[#allocation16_spill] sm:$0xff] %v4026_v12 }
 0x112   : > { %2008 = vmatpush1.msra.mxu1 %v1735_v37  ;;  %1324 = vmatmul.mubr.f32.gmra.mxu0 %v3579_v7  ;;  %v1061_v37 = vrot.slane %v3660_v2, 1 }
 0x113   : > { %1548 = vmatprep.mubr.f32.mxu1 %v4004_v15  ;;  %1784 = vmatprep.subr.mxu0 %v3260_v0 }
 0x114   : > { %1549 = vmatmul.mubr.f32.gmra.mxu1 %v3606_v29  ;;  %1785 = vmatpush1.msra.mxu0 %v1702_v31  ;;  %v1732_v31 = vld [vmem:[#allocation2 + $0x510] sm:$0xff]  ;;  %v4037_v47 = vsel %vm345_vm0, %v1060_v34, %v1061_v37  ;;  %v1066_v34 = vrot.slane %v3687_v30, 1 }
 0x115   : > { %2009 = vmatprep.subr.mxu1 %v3260_v0  ;;  %1328 = vmatprep.mubr.f32.mxu0 %v3993_v49  ;;  %4963 = vst [vmem:[#allocation17_spill] sm:$0xff] %v4037_v47 }
 0x116   : > { %2010 = vmatpush1.msra.mxu1 %v1734_v61  ;;  %1329 = vmatmul.mubr.f32.gmra.mxu0 %v3592_v18  ;;  %v4964_v61 = vrot.slane %v3639_v53, 1 }
 0x117   : > { %1553 = vmatprep.mubr.f32.mxu1 %v4015_v25  ;;  %1786 = vmatprep.subr.mxu0 %v3260_v0 }
 0x118   : > { %1554 = vmatmul.mubr.f32.gmra.mxu1 %v3619_v36  ;;  %1787 = vmatpush1.msra.mxu0 %v1701_v4  ;;  %v1063_v24 = vrot.slane %v4964_v61, 1  ;;  %v1731_v4 = vld [vmem:[#allocation2 + $0x508] sm:$0xff] }
 0x119   : > { %2011 = vmatprep.subr.mxu1 %v3260_v0  ;;  %1333 = vmatprep.mubr.f32.mxu0 %v4004_v15 }
 0x11a   : > { %2012 = vmatpush1.msra.mxu1 %v1733_v52  ;;  %1334 = vmatmul.mubr.f32.gmra.mxu0 %v3606_v29  ;;  %v4048_v53 = vsel %vm345_vm0, %v1061_v37, %v1063_v24  ;;  %v1065_v52 = vrot.slane %v3673_v13, 1  ;;  %v1730_v37 = vld [vmem:[#allocation2 + $0x500] sm:$0xff]  ;;  %v4966_v24 = vrot.slane %v3666_v8, 1 }
 0x11b   : > { %1558 = vmatprep.mubr.f32.mxu1 %v4026_v12  ;;  %1788 = vmatprep.subr.mxu0 %v3260_v0  ;;  %4965 = vst [vmem:[#allocation18_spill] sm:$0xff] %v4048_v53 }
 0x11c   : > { %1559 = vmatmul.mubr.f32.gmra.mxu1 %v3633_v46  ;;  %1789 = vmatpush1.msra.mxu0 %v1700_v16  ;;  %v1698_v16 = vld [vmem:[#allocation2 + $0x400] sm:$0xff]  ;;  %v4065_v61 = vsel %vm345_vm0, %v1065_v52, %v1066_v34  ;;  %v1761_v52 = vld [vmem:[#allocation2 + $0x5f8] sm:$0xff] }
 0x11d   : > { %2013 = vmatprep.subr.mxu1 %v3260_v0  ;;  %1338 = vmatprep.mubr.f32.mxu0 %v4015_v25  ;;  %v1071_v25 = vrot.slane %v3714_v58, 1 }
 0x11e   : > { %2014 = vmatpush1.msra.mxu1 %v1732_v31  ;;  %1339 = vmatmul.mubr.f32.gmra.mxu0 %v3619_v36  ;;  %v4062_v31 = vld [vmem:[%s4879_s2] ss:$0 sm:$0xff] }
 0x11f   : > { %1563 = vmatprep.mubr.f32.mxu1 %v4037_v47  ;;  %1790 = vmatprep.subr.mxu0 %v3260_v0 }
 0x120   : > { %1564 = vmatmul.mubr.f32.gmra.mxu1 %v3646_v55  ;;  %1791 = vmatpush1.msra.mxu0 %v1699_v28  ;;  %v1068_v28 = vrot.slane %v4966_v24, 1 }
 0x121   : > { %2015 = vmatprep.subr.mxu1 %v3260_v0  ;;  %1343 = vmatprep.mubr.f32.mxu0 %v4026_v12 }
 0x122   : > { %2016 = vmatpush1.msra.mxu1 %v1731_v4  ;;  %1344 = vmatmul.mubr.f32.gmra.mxu0 %v3633_v46  ;;  %v1729_v4 = vld [vmem:[#allocation2 + $0x4f8] sm:$0xff] }
 0x123   : > { %1568 = vmatprep.mubr.f32.mxu1 %v4048_v53  ;;  %1792 = vmatprep.subr.mxu0 %v3260_v0 }
 0x124   : > { %1569 = vmatmul.mubr.f32.gmra.mxu1 %v3660_v2  ;;  %1793 = vmatpush1.msra.mxu0 %v1698_v16 }
 0x125   : > { %2017 = vmatprep.subr.mxu1 %v3260_v0  ;;  %1348 = vmatprep.mubr.f32.mxu0 %v4037_v47  ;;  %v4079_v47 = vsel %vm345_vm0, %v1066_v34, %v1068_v28 }
 0x126   : > { %2018 = vmatpush1.msra.mxu1 %v1730_v37  ;;  %v604_v16 = vpop.f32.mrf.mxu0  ;;  %1349 = vmatmul.mubr.f32.gmra.mxu0 %v3646_v55  ;;  %4967 = vst [vmem:[#allocation19_spill] sm:$0xff] %v4079_v47  ;;  %v1070_v37 = vrot.slane %v3700_v44, 1 }
 0x127   : > { %v605_v12 = vadd.f32 %v4062_v31, %v604_v16  ;;  %1573 = vmatprep.mubr.f32.mxu1 %v4065_v61  ;;  %1794 = vmatprep.subr.mxu0 %v3260_v0  ;;  %v1728_v16 = vld [vmem:[#allocation2 + $0x4f0] sm:$0xff] }
 0x128   : > { %v829_v8 = vpop.f32.mrf.mxu1  ;;  %1574 = vmatmul.mubr.f32.gmra.mxu1 %v3673_v13  ;;  %1795 = vmatpush2.msra.mxu0 %v1729_v4  ;;  %v606_v24 = vpop.f32.mrf.mxu0  ;;  %v4094_v4 = vsel %vm345_vm0, %v1070_v37, %v1071_v25 }
 0x129   : > { %v830_v15 = vadd.f32 %v829_v8, %v605_v12  ;;  %2019 = vmatprep.subr.mxu1 %v3260_v0  ;;  %1353 = vmatprep.mubr.f32.mxu0 %v4048_v53  ;;  %v1760_v12 = vld [vmem:[#allocation2 + $0x5f0] sm:$0xff] }
 0x12a   : > { %v831_v49 = vpop.f32.mrf.mxu1  ;;  %2020 = vmatpush2.msra.mxu1 %v1761_v52  ;;  %v609_v19 = vpop.f32.mrf.mxu0  ;;  %1354 = vmatmul.mubr.f32.gmra.mxu0 %v3660_v2  ;;  %v4968_v52 = vrot.slane %v3693_v41, 1  ;;  %v1759_v41 = vld [vmem:[#allocation2 + $0x5e8] sm:$0xff] }
 0x12b   : > { %988 = vst [vmem:[%s4086_s27] sm:$0xff] %v830_v15  ;;  %v610_v34 = vadd.f32 %v4062_v31, %v609_v19  ;;  %1578 = vmatprep.mubr.f32.mxu1 %v4079_v47  ;;  %1796 = vmatprep.subr.mxu0 %v3260_v0  ;;  %v1727_v19 = vld [vmem:[#allocation2 + $0x4e8] sm:$0xff] }
 0x12c   : > { %v834_v28 = vpop.f32.mrf.mxu1  ;;  %1579 = vmatmul.mubr.f32.gmra.mxu1 %v3687_v30  ;;  %1797 = vmatpush2.msra.mxu0 %v1728_v16  ;;  %v611_v49 = vpop.f32.mrf.mxu0  ;;  %v1073_v8 = vrot.slane %v4968_v52, 1 }
 0x12d   : > { %v835_v15 = vadd.f32 %v834_v28, %v610_v34  ;;  %2021 = vmatprep.subr.mxu1 %v3260_v0  ;;  %1358 = vmatprep.mubr.f32.mxu0 %v4065_v61  ;;  %v1076_v49 = vrot.slane %v3741_v35, 1 }
 0x12e   : > { %v836_v24 = vpop.f32.mrf.mxu1  ;;  %2022 = vmatpush2.msra.mxu1 %v1760_v12  ;;  %v614_v53 = vpop.f32.mrf.mxu0  ;;  %1359 = vmatmul.mubr.f32.gmra.mxu0 %v3673_v13  ;;  %v4107_v28 = vsel %vm345_vm0, %v1071_v25, %v1073_v8  ;;  %v1075_v12 = vrot.slane %v3727_v11, 1  ;;  %v1758_v25 = vld [vmem:[#allocation2 + $0x5e0] sm:$0xff] }
 0x12f   : > { %989 = vst [vmem:[%s4086_s27 + $0x8] sm:$0xff] %v835_v15  ;;  %v615_v16 = vadd.f32 %v4062_v31, %v614_v53  ;;  %1583 = vmatprep.mubr.f32.mxu1 %v4094_v4  ;;  %1798 = vmatprep.subr.mxu0 %v3260_v0  ;;  %4969 = vst [vmem:[#allocation20_spill] sm:$0xff] %v4107_v28  ;;  %v1726_v53 = vld [vmem:[#allocation2 + $0x4e0] sm:$0xff] }
 0x130   : > { %v839_v37 = vpop.f32.mrf.mxu1  ;;  %1584 = vmatmul.mubr.f32.gmra.mxu1 %v3700_v44  ;;  %1799 = vmatpush2.msra.mxu0 %v1727_v19  ;;  %v616_v34 = vpop.f32.mrf.mxu0 }
 0x131   : > { %v840_v52 = vadd.f32 %v839_v37, %v615_v16  ;;  %2023 = vmatprep.subr.mxu1 %v3260_v0  ;;  %1363 = vmatprep.mubr.f32.mxu0 %v4079_v47  ;;  %v4120_v37 = vsel %vm345_vm0, %v1075_v12, %v1076_v49 }
 0x132   : > { %v841_v15 = vpop.f32.mrf.mxu1  ;;  %2024 = vmatpush2.msra.mxu1 %v1759_v41  ;;  %v619_v24 = vpop.f32.mrf.mxu0  ;;  %1364 = vmatmul.mubr.f32.gmra.mxu0 %v3687_v30  ;;  %v4970_v41 = vrot.slane %v3720_v5, 1  ;;  %v1757_v5 = vld [vmem:[#allocation2 + $0x5d8] sm:$0xff] }
 0x133   : > { %990 = vst [vmem:[%s4086_s27 + $0x10] sm:$0xff] %v840_v52  ;;  %v620_v19 = vadd.f32 %v4062_v31, %v619_v24  ;;  %1588 = vmatprep.mubr.f32.mxu1 %v4107_v28  ;;  %1800 = vmatprep.subr.mxu0 %v3260_v0  ;;  %v1725_v15 = vld [vmem:[#allocation2 + $0x4d8] sm:$0xff] }
 0x134   : > { %v844_v8 = vpop.f32.mrf.mxu1  ;;  %1589 = vmatmul.mubr.f32.gmra.mxu1 %v3714_v58  ;;  %1801 = vmatpush2.msra.mxu0 %v1726_v53  ;;  %v621_v16 = vpop.f32.mrf.mxu0  ;;  %v1078_v34 = vrot.slane %v4970_v41, 1 }
 0x135   : > { %v845_v52 = vadd.f32 %v844_v8, %v620_v19  ;;  %2025 = vmatprep.subr.mxu1 %v3260_v0  ;;  %1368 = vmatprep.mubr.f32.mxu0 %v4094_v4  ;;  %v1081_v16 = vrot.slane %v3768_v42, 1 }
 0x136   : > { %v846_v24 = vpop.f32.mrf.mxu1  ;;  %2026 = vmatpush2.msra.mxu1 %v1758_v25  ;;  %v624_v47 = vpop.f32.mrf.mxu0  ;;  %1369 = vmatmul.mubr.f32.gmra.mxu0 %v3700_v44  ;;  %v4133_v8 = vsel %vm345_vm0, %v1076_v49, %v1078_v34  ;;  %v1080_v25 = vrot.slane %v3754_v3, 1  ;;  %v1756_v49 = vld [vmem:[#allocation2 + $0x5d0] sm:$0xff] }
 0x137   : > { %991 = vst [vmem:[%s4086_s27 + $0x18] sm:$0xff] %v845_v52  ;;  %v625_v53 = vadd.f32 %v4062_v31, %v624_v47  ;;  %1593 = vmatprep.mubr.f32.mxu1 %v4120_v37  ;;  %1802 = vmatprep.subr.mxu0 %v3260_v0  ;;  %4971 = vst [vmem:[#allocation21_spill] sm:$0xff] %v4133_v8  ;;  %v1724_v47 = vld [vmem:[#allocation2 + $0x4d0] sm:$0xff] }
 0x138   : > { %v849_v12 = vpop.f32.mrf.mxu1  ;;  %1594 = vmatmul.mubr.f32.gmra.mxu1 %v3727_v11  ;;  %1803 = vmatpush2.msra.mxu0 %v1725_v15  ;;  %v626_v19 = vpop.f32.mrf.mxu0 }
 0x139   : > { %v850_v41 = vadd.f32 %v849_v12, %v625_v53  ;;  %2027 = vmatprep.subr.mxu1 %v3260_v0  ;;  %1373 = vmatprep.mubr.f32.mxu0 %v4107_v28  ;;  %v4146_v12 = vsel %vm345_vm0, %v1080_v25, %v1081_v16 }
 0x13a   : > { %v851_v52 = vpop.f32.mrf.mxu1  ;;  %2028 = vmatpush2.msra.mxu1 %v1757_v5  ;;  %v629_v24 = vpop.f32.mrf.mxu0  ;;  %1374 = vmatmul.mubr.f32.gmra.mxu0 %v3714_v58  ;;  %v4972_v5 = vrot.slane %v3747_v54, 1  ;;  %v1755_v54 = vld [vmem:[#allocation2 + $0x5c8] sm:$0xff] }
 0x13b   : > { %992 = vst [vmem:[%s4086_s27 + $0x20] sm:$0xff] %v850_v41  ;;  %v630_v15 = vadd.f32 %v4062_v31, %v629_v24  ;;  %1598 = vmatprep.mubr.f32.mxu1 %v4133_v8  ;;  %1804 = vmatprep.subr.mxu0 %v3260_v0  ;;  %v1723_v52 = vld [vmem:[#allocation2 + $0x4c8] sm:$0xff] }
 0x13c   : > { %v854_v34 = vpop.f32.mrf.mxu1  ;;  %1599 = vmatmul.mubr.f32.gmra.mxu1 %v3741_v35  ;;  %1805 = vmatpush2.msra.mxu0 %v1724_v47  ;;  %v631_v53 = vpop.f32.mrf.mxu0  ;;  %v1083_v19 = vrot.slane %v4972_v5, 1 }
 0x13d   : > { %v855_v41 = vadd.f32 %v854_v34, %v630_v15  ;;  %2029 = vmatprep.subr.mxu1 %v3260_v0  ;;  %1378 = vmatprep.mubr.f32.mxu0 %v4120_v37  ;;  %v1086_v53 = vrot.slane %v3795_v23, 1 }
 0x13e   : > { %v856_v24 = vpop.f32.mrf.mxu1  ;;  %2030 = vmatpush2.msra.mxu1 %v1756_v49  ;;  %v634_v28 = vpop.f32.mrf.mxu0  ;;  %1379 = vmatmul.mubr.f32.gmra.mxu0 %v3727_v11  ;;  %v4159_v34 = vsel %vm345_vm0, %v1081_v16, %v1083_v19  ;;  %v1085_v49 = vrot.slane %v3781_v6, 1  ;;  %v1754_v16 = vld [vmem:[#allocation2 + $0x5c0] sm:$0xff] }
 0x13f   : > { %993 = vst [vmem:[%s4086_s27 + $0x28] sm:$0xff] %v855_v41  ;;  %v635_v47 = vadd.f32 %v4062_v31, %v634_v28  ;;  %1603 = vmatprep.mubr.f32.mxu1 %v4146_v12  ;;  %1806 = vmatprep.subr.mxu0 %v3260_v0  ;;  %4973 = vst [vmem:[#allocation22_spill] sm:$0xff] %v4159_v34  ;;  %v1722_v28 = vld [vmem:[#allocation2 + $0x4c0] sm:$0xff] }
 0x140   : > { %v859_v25 = vpop.f32.mrf.mxu1  ;;  %1604 = vmatmul.mubr.f32.gmra.mxu1 %v3754_v3  ;;  %1807 = vmatpush2.msra.mxu0 %v1723_v52  ;;  %v636_v15 = vpop.f32.mrf.mxu0 }
 0x141   : > { %v860_v5 = vadd.f32 %v859_v25, %v635_v47  ;;  %2031 = vmatprep.subr.mxu1 %v3260_v0  ;;  %1383 = vmatprep.mubr.f32.mxu0 %v4133_v8  ;;  %v4172_v25 = vsel %vm345_vm0, %v1085_v49, %v1086_v53 }
 0x142   : > { %v861_v41 = vpop.f32.mrf.mxu1  ;;  %2032 = vmatpush2.msra.mxu1 %v1755_v54  ;;  %v639_v24 = vpop.f32.mrf.mxu0  ;;  %1384 = vmatmul.mubr.f32.gmra.mxu0 %v3741_v35  ;;  %4974 = vst [vmem:[#allocation23_spill] sm:$0xff] %v4172_v25  ;;  %v4975_v54 = vrot.slane %v3774_v62, 1  ;;  %v1753_v62 = vld [vmem:[#allocation2 + $0x5b8] sm:$0xff] }
 0x143   : > { %994 = vst [vmem:[%s4086_s27 + $0x30] sm:$0xff] %v860_v5  ;;  %v640_v52 = vadd.f32 %v4062_v31, %v639_v24  ;;  %1608 = vmatprep.mubr.f32.mxu1 %v4159_v34  ;;  %1808 = vmatprep.subr.mxu0 %v3260_v0  ;;  %v1721_v41 = vld [vmem:[#allocation2 + $0x4b8] sm:$0xff] }
 0x144   : > { %v864_v19 = vpop.f32.mrf.mxu1  ;;  %1609 = vmatmul.mubr.f32.gmra.mxu1 %v3768_v42  ;;  %1809 = vmatpush2.msra.mxu0 %v1722_v28  ;;  %v641_v47 = vpop.f32.mrf.mxu0  ;;  %v1088_v15 = vrot.slane %v4975_v54, 1 }
 0x145   : > { %v865_v5 = vadd.f32 %v864_v19, %v640_v52  ;;  %2033 = vmatprep.subr.mxu1 %v3260_v0  ;;  %1388 = vmatprep.mubr.f32.mxu0 %v4146_v12  ;;  %v1091_v47 = vrot.slane %v3822_v17, 1 }
 0x146   : > { %v866_v24 = vpop.f32.mrf.mxu1  ;;  %2034 = vmatpush2.msra.mxu1 %v1754_v16  ;;  %v644_v8 = vpop.f32.mrf.mxu0  ;;  %1389 = vmatmul.mubr.f32.gmra.mxu0 %v3754_v3  ;;  %v4185_v19 = vsel %vm345_vm0, %v1086_v53, %v1088_v15  ;;  %v1090_v16 = vrot.slane %v3808_v32, 1  ;;  %v1752_v53 = vld [vmem:[#allocation2 + $0x5b0] sm:$0xff] }
 0x147   : > { %995 = vst [vmem:[%s4086_s27 + $0x38] sm:$0xff] %v865_v5  ;;  %v645_v28 = vadd.f32 %v4062_v31, %v644_v8  ;;  %1613 = vmatprep.mubr.f32.mxu1 %v4172_v25  ;;  %1810 = vmatprep.subr.mxu0 %v3260_v0  ;;  %4976 = vst [vmem:[#allocation24_spill] sm:$0xff] %v4185_v19  ;;  %v1720_v8 = vld [vmem:[#allocation2 + $0x4b0] sm:$0xff] }
 0x148   : > { %v869_v49 = vpop.f32.mrf.mxu1  ;;  %1614 = vmatmul.mubr.f32.gmra.mxu1 %v3781_v6  ;;  %1811 = vmatpush2.msra.mxu0 %v1721_v41  ;;  %v646_v52 = vpop.f32.mrf.mxu0 }
 0x149   : > { %v870_v54 = vadd.f32 %v869_v49, %v645_v28  ;;  %2035 = vmatprep.subr.mxu1 %v3260_v0  ;;  %1393 = vmatprep.mubr.f32.mxu0 %v4159_v34  ;;  %v4198_v49 = vsel %vm345_vm0, %v1090_v16, %v1091_v47 }
 0x14a   : > { %v871_v5 = vpop.f32.mrf.mxu1  ;;  %2036 = vmatpush2.msra.mxu1 %v1753_v62  ;;  %v649_v24 = vpop.f32.mrf.mxu0  ;;  %1394 = vmatmul.mubr.f32.gmra.mxu0 %v3768_v42  ;;  %4977 = vst [vmem:[#allocation25_spill] sm:$0xff] %v4198_v49  ;;  %v4978_v62 = vrot.slane %v3801_v48, 1  ;;  %v1751_v48 = vld [vmem:[#allocation2 + $0x5a8] sm:$0xff] }
 0x14b   : > { %996 = vst [vmem:[%s4086_s27 + $0x40] sm:$0xff] %v870_v54  ;;  %v650_v41 = vadd.f32 %v4062_v31, %v649_v24  ;;  %1618 = vmatprep.mubr.f32.mxu1 %v4185_v19  ;;  %1812 = vmatprep.subr.mxu0 %v3260_v0  ;;  %v1719_v5 = vld [vmem:[#allocation2 + $0x4a8] sm:$0xff] }
 0x14c   : > { %v874_v15 = vpop.f32.mrf.mxu1  ;;  %1619 = vmatmul.mubr.f32.gmra.mxu1 %v3795_v23  ;;  %1813 = vmatpush2.msra.mxu0 %v1720_v8  ;;  %v651_v28 = vpop.f32.mrf.mxu0  ;;  %v1093_v52 = vrot.slane %v4978_v62, 1 }
 0x14d   : > { %v875_v54 = vadd.f32 %v874_v15, %v650_v41  ;;  %2037 = vmatprep.subr.mxu1 %v3260_v0  ;;  %1398 = vmatprep.mubr.f32.mxu0 %v4172_v25  ;;  %v1096_v28 = vrot.slane %v3847_v20, 1 }
 0x14e   : > { %v876_v24 = vpop.f32.mrf.mxu1  ;;  %2038 = vmatpush2.msra.mxu1 %v1752_v53  ;;  %v654_v34 = vpop.f32.mrf.mxu0  ;;  %1399 = vmatmul.mubr.f32.gmra.mxu0 %v3781_v6  ;;  %v4211_v15 = vsel %vm345_vm0, %v1091_v47, %v1093_v52  ;;  %v1095_v53 = vrot.slane %v3835_v43, 1  ;;  %v1750_v47 = vld [vmem:[#allocation2 + $0x5a0] sm:$0xff] }
 0x14f   : > { %997 = vst [vmem:[%s4086_s27 + $0x48] sm:$0xff] %v875_v54  ;;  %v655_v8 = vadd.f32 %v4062_v31, %v654_v34  ;;  %1623 = vmatprep.mubr.f32.mxu1 %v4198_v49  ;;  %1814 = vmatprep.subr.mxu0 %v3260_v0  ;;  %4979 = vst [vmem:[#allocation26_spill] sm:$0xff] %v4211_v15  ;;  %v1718_v34 = vld [vmem:[#allocation2 + $0x4a0] sm:$0xff] }
 0x150   : > { %v879_v16 = vpop.f32.mrf.mxu1  ;;  %1624 = vmatmul.mubr.f32.gmra.mxu1 %v3808_v32  ;;  %1815 = vmatpush2.msra.mxu0 %v1719_v5  ;;  %v656_v41 = vpop.f32.mrf.mxu0 }
 0x151   : > { %v880_v62 = vadd.f32 %v879_v16, %v655_v8  ;;  %2039 = vmatprep.subr.mxu1 %v3260_v0  ;;  %1403 = vmatprep.mubr.f32.mxu0 %v4185_v19  ;;  %v4224_v16 = vsel %vm345_vm0, %v1095_v53, %v1096_v28  ;;  %v1749_v53 = vld [vmem:[#allocation2 + $0x598] sm:$0xff] }
 0x152   : > { %v881_v54 = vpop.f32.mrf.mxu1  ;;  %2040 = vmatpush2.msra.mxu1 %v1751_v48  ;;  %v659_v24 = vpop.f32.mrf.mxu0  ;;  %1404 = vmatmul.mubr.f32.gmra.mxu0 %v3795_v23  ;;  %4980 = vst [vmem:[#allocation27_spill] sm:$0xff] %v4224_v16  ;;  %v4981_v48 = vld [vmem:[#allocation8_spill] sm:$0xff] }
 0x153   : > { %998 = vst [vmem:[%s4086_s27 + $0x50] sm:$0xff] %v880_v62  ;;  %v660_v5 = vadd.f32 %v4062_v31, %v659_v24  ;;  %1628 = vmatprep.mubr.f32.mxu1 %v4211_v15  ;;  %1816 = vmatprep.subr.mxu0 %v3260_v0  ;;  %v4982_v41 = vrot.slane %v4981_v48, 1  ;;  %v1717_v24 = vld [vmem:[#allocation2 + $0x498] sm:$0xff] }
 0x154   : > { %v884_v52 = vpop.f32.mrf.mxu1  ;;  %1629 = vmatmul.mubr.f32.gmra.mxu1 %v3822_v17  ;;  %1817 = vmatpush2.msra.mxu0 %v1718_v34  ;;  %v661_v8 = vpop.f32.mrf.mxu0 }
 0x155   : > { %v1098_v54 = vrot.slane %v4982_v41, 1  ;;  %v885_v62 = vadd.f32 %v884_v52, %v660_v5  ;;  %2041 = vmatprep.subr.mxu1 %v3260_v0  ;;  %1408 = vmatprep.mubr.f32.mxu0 %v4198_v49  ;;  %v1101_v8 = vrot.slane %v3871_v40, 1 }
 0x156   : > { %v886_v19 = vpop.f32.mrf.mxu1  ;;  %2042 = vmatpush2.msra.mxu1 %v1750_v47  ;;  %v664_v25 = vpop.f32.mrf.mxu0  ;;  %1409 = vmatmul.mubr.f32.gmra.mxu0 %v3808_v32  ;;  %v1100_v47 = vrot.slane %v3859_v1, 1 }
 0x157   : > { %999 = vst [vmem:[%s4086_s27 + $0x58] sm:$0xff] %v885_v62  ;;  %v665_v34 = vadd.f32 %v4062_v31, %v664_v25  ;;  %1633 = vmatprep.mubr.f32.mxu1 %v4224_v16  ;;  %1818 = vmatprep.subr.mxu0 %v3260_v0  ;;  %v4237_v19 = vsel %vm345_vm0, %v1096_v28, %v1098_v54  ;;  %v1716_v25 = vld [vmem:[#allocation2 + $0x490] sm:$0xff] }
 0x158   : > { %v889_v5 = vpop.f32.mrf.mxu1  ;;  %1634 = vmatmul.mubr.f32.gmra.mxu1 %v3835_v43  ;;  %1819 = vmatpush2.msra.mxu0 %v1717_v24  ;;  %v666_v52 = vpop.f32.mrf.mxu0  ;;  %4983 = vst [vmem:[#allocation8_spill] sm:$0xff] %v4237_v19  ;;  %v1748_v28 = vld [vmem:[#allocation2 + $0x590] sm:$0xff] }
 0x159   : > { %v890_v48 = vadd.f32 %v889_v5, %v665_v34  ;;  %2043 = vmatprep.subr.mxu1 %v3260_v0  ;;  %1413 = vmatprep.mubr.f32.mxu0 %v4211_v15  ;;  %v4250_v5 = vsel %vm345_vm0, %v1100_v47, %v1101_v8  ;;  %v1747_v47 = vld [vmem:[#allocation2 + $0x588] sm:$0xff] }
 0x15a   : > { %v891_v41 = vpop.f32.mrf.mxu1  ;;  %2044 = vmatpush2.msra.mxu1 %v1749_v53  ;;  %v669_v62 = vpop.f32.mrf.mxu0  ;;  %1414 = vmatmul.mubr.f32.gmra.mxu0 %v3822_v17  ;;  %4984 = vst [vmem:[#allocation28_spill] sm:$0xff] %v4250_v5  ;;  %v4985_v53 = vld [vmem:[#allocation11_spill] sm:$0xff] }
 0x15b   : > { %1000 = vst [vmem:[%s4086_s27 + $0x60] sm:$0xff] %v890_v48  ;;  %v670_v24 = vadd.f32 %v4062_v31, %v669_v62  ;;  %1638 = vmatprep.mubr.f32.mxu1 %v4237_v19  ;;  %1820 = vmatprep.subr.mxu0 %v3260_v0  ;;  %v4986_v52 = vrot.slane %v4985_v53, 1  ;;  %v1715_v62 = vld [vmem:[#allocation2 + $0x488] sm:$0xff] }
 0x15c   : > { %v894_v54 = vpop.f32.mrf.mxu1  ;;  %1639 = vmatmul.mubr.f32.gmra.mxu1 %v3847_v20  ;;  %1821 = vmatpush2.msra.mxu0 %v1716_v25  ;;  %v671_v34 = vpop.f32.mrf.mxu0 }
 0x15d   : > { %v1103_v41 = vrot.slane %v4986_v52, 1  ;;  %v895_v48 = vadd.f32 %v894_v54, %v670_v24  ;;  %2045 = vmatprep.subr.mxu1 %v3260_v0  ;;  %1418 = vmatprep.mubr.f32.mxu0 %v4224_v16 }
 0x15e   : > { %v896_v15 = vpop.f32.mrf.mxu1  ;;  %2046 = vmatpush2.msra.mxu1 %v1748_v28  ;;  %v674_v49 = vpop.f32.mrf.mxu0  ;;  %1419 = vmatmul.mubr.f32.gmra.mxu0 %v3835_v43 }
 0x15f   : > { %1001 = vst [vmem:[%s4086_s27 + $0x68] sm:$0xff] %v895_v48  ;;  %v675_v25 = vadd.f32 %v4062_v31, %v674_v49  ;;  %1643 = vmatprep.mubr.f32.mxu1 %v4250_v5  ;;  %1822 = vmatprep.subr.mxu0 %v3260_v0  ;;  %v4263_v15 = vsel %vm345_vm0, %v1101_v8, %v1103_v41  ;;  %v1714_v49 = vld [vmem:[#allocation2 + $0x480] sm:$0xff] }
 0x160   : > { %v899_v24 = vpop.f32.mrf.mxu1  ;;  %1644 = vmatmul.mubr.f32.gmra.mxu1 %v3859_v1  ;;  %1823 = vmatpush2.msra.mxu0 %v1715_v62  ;;  %v676_v54 = vpop.f32.mrf.mxu0  ;;  %4987 = vst [vmem:[#allocation11_spill] sm:$0xff] %v4263_v15  ;;  %v1746_v8 = vld [vmem:[#allocation2 + $0x580] sm:$0xff] }
 0x161   : > { %v900_v28 = vadd.f32 %v899_v24, %v675_v25  ;;  %2047 = vmatprep.subr.mxu1 %v3260_v0  ;;  %1423 = vmatprep.mubr.f32.mxu0 %v4237_v19  ;;  %v2268_v25 = vld [vmem:[#allocation2 + $0x678] sm:$0xff] }
 0x162   : > { %v901_v34 = vpop.f32.mrf.mxu1  ;;  %2048 = vmatpush2.msra.mxu1 %v1747_v47  ;;  %v679_v53 = vpop.f32.mrf.mxu0  ;;  %1424 = vmatmul.mubr.f32.gmra.mxu0 %v3847_v20  ;;  %v3114_v54 = vld [vmem:[%s3415_s18 + $0x18] sm:$0xff] }
 0x163   : > { %1002 = vst [vmem:[%s4086_s27 + $0x70] sm:$0xff] %v900_v28  ;;  %v680_v52 = vadd.f32 %v4062_v31, %v679_v53  ;;  %1648 = vmatprep.mubr.f32.mxu1 %v4263_v15  ;;  %1824 = vmatprep.subr.mxu0 %v3260_v0  ;;  %v3115_v53 = vld [vmem:[%s3415_s18 + $0x30] sm:$0xff] }
 0x164   : > { %v904_v41 = vpop.f32.mrf.mxu1  ;;  %1649 = vmatmul.mubr.f32.gmra.mxu1 %v3871_v40  ;;  %1825 = vmatpush2.msra.mxu0 %v1714_v49  ;;  %v681_v48 = vpop.f32.mrf.mxu0  ;;  %v2300_v49 = vld [vmem:[#allocation2 + $0x778] sm:$0xff] }
 0x165   : > { %v905_v62 = vadd.f32 %v904_v41, %v680_v52  ;;  %2049 = vmatprep.subr.mxu1 %v3260_v0  ;;  %1826 = vmatprep.mubr.f32.mxu0 %v3452_v14  ;;  %v2267_v41 = vld [vmem:[#allocation2 + $0x670] sm:$0xff] }
 0x166   : > { %v906_v47 = vpop.f32.mrf.mxu1  ;;  %2050 = vmatpush2.msra.mxu1 %v1746_v8  ;;  %v684_v24 = vpop.f32.mrf.mxu0  ;;  %1827 = vmatmul.mubr.f32.vlgmr.msra.gmra.mxu0 %v3114_v54 }
 0x167   : > { %1003 = vst [vmem:[%s4086_s27 + $0x78] sm:$0xff] %v905_v62  ;;  %v685_v28 = vadd.f32 %v4062_v31, %v684_v24  ;;  %2051 = vmatprep.mubr.f32.mxu1 %v3483_v27  ;;  %2317 = vmatprep.subr.mxu0 %v3260_v0  ;;  %v3116_v47 = vld [vmem:[%s3415_s18 + $0x20] sm:$0xff] }
 0x168   : > { %v909_v34 = vpop.f32.mrf.mxu1  ;;  %2052 = vmatmul.mubr.f32.vlgmr.msra.gmra.mxu1 %v3115_v53  ;;  %2318 = vmatpush1.msra.mxu0 %v2268_v25  ;;  %v686_v52 = vpop.f32.mrf.mxu0  ;;  %v2299_v25 = vld [vmem:[#allocation2 + $0x770] sm:$0xff] }
 0x169   : > { %v910_v8 = vadd.f32 %v909_v34, %v685_v28  ;;  %2542 = vmatprep.subr.mxu1 %v3260_v0  ;;  %1831 = vmatprep.mubr.f32.mxu0 %v3471_v21  ;;  %v3117_v28 = vld [vmem:[%s3415_s18 + $0x38] sm:$0xff] }
 0x16a   : > { %v911_v48 = vpop.f32.mrf.mxu1  ;;  %2543 = vmatpush1.msra.mxu1 %v2300_v49  ;;  %v689_v62 = vpop.f32.mrf.mxu0  ;;  %1832 = vmatmul.mubr.f32.gmra.mxu0 %v3116_v47  ;;  %v2266_v49 = vld [vmem:[#allocation2 + $0x668] sm:$0xff] }
 0x16b   : > { %1004 = vst [vmem:[%s4086_s27 + $0x80] sm:$0xff] %v910_v8  ;;  %v690_v24 = vadd.f32 %v4062_v31, %v689_v62  ;;  %2056 = vmatprep.mubr.f32.mxu1 %v3498_v33  ;;  %2319 = vmatprep.subr.mxu0 %v3260_v0 }
 0x16c   : > { %v914_v54 = vpop.f32.mrf.mxu1  ;;  %2057 = vmatmul.mubr.f32.gmra.mxu1 %v3117_v28  ;;  %2320 = vmatpush1.msra.mxu0 %v2267_v41  ;;  %v691_v34 = vpop.f32.mrf.mxu0  ;;  %v2298_v41 = vld [vmem:[#allocation2 + $0x768] sm:$0xff] }
 0x16d   : > { %v915_v52 = vadd.f32 %v914_v54, %v690_v24  ;;  %2544 = vmatprep.subr.mxu1 %v3260_v0  ;;  %1836 = vmatprep.mubr.f32.mxu0 %v3483_v27  ;;  %v3118_v24 = vld [vmem:[%s3415_s18 + $0x48] sm:$0xff] }
 0x16e   : > { %v916_v8 = vpop.f32.mrf.mxu1  ;;  %2545 = vmatpush1.msra.mxu1 %v2299_v25  ;;  %v694_v48 = vpop.f32.mrf.mxu0  ;;  %1837 = vmatmul.mubr.f32.gmra.mxu0 %v3115_v53  ;;  %v2265_v53 = vld [vmem:[#allocation2 + $0x660] sm:$0xff] }
 0x16f   : > { %1005 = vst [vmem:[%s4086_s27 + $0x88] sm:$0xff] %v915_v52  ;;  %v695_v62 = vadd.f32 %v4062_v31, %v694_v48  ;;  %2061 = vmatprep.mubr.f32.mxu1 %v3511_v39  ;;  %2321 = vmatprep.subr.mxu0 %v3260_v0 }
 0x170   : > { %v919_v47 = vpop.f32.mrf.mxu1  ;;  %2062 = vmatmul.mubr.f32.gmra.mxu1 %v3118_v24  ;;  %2322 = vmatpush1.msra.mxu0 %v2266_v49  ;;  %v696_v54 = vpop.f32.mrf.mxu0  ;;  %v2297_v49 = vld [vmem:[#allocation2 + $0x760] sm:$0xff] }
 0x171   : > { %v920_v34 = vadd.f32 %v919_v47, %v695_v62  ;;  %2546 = vmatprep.subr.mxu1 %v3260_v0  ;;  %1841 = vmatprep.mubr.f32.mxu0 %v3498_v33  ;;  %v3119_v62 = vld [vmem:[%s3415_s18 + $0x50] sm:$0xff] }
 0x172   : > { %v921_v25 = vpop.f32.mrf.mxu1  ;;  %2547 = vmatpush1.msra.mxu1 %v2298_v41  ;;  %v699_v52 = vpop.f32.mrf.mxu0  ;;  %1842 = vmatmul.mubr.f32.gmra.mxu0 %v3117_v28  ;;  %v2264_v28 = vld [vmem:[#allocation2 + $0x658] sm:$0xff] }
 0x173   : > { %1006 = vst [vmem:[%s4086_s27 + $0x90] sm:$0xff] %v920_v34  ;;  %v700_v8 = vadd.f32 %v4062_v31, %v699_v52  ;;  %2066 = vmatprep.mubr.f32.mxu1 %v3525_v45  ;;  %2323 = vmatprep.subr.mxu0 %v3260_v0 }
 0x174   : > { %v924_v48 = vpop.f32.mrf.mxu1  ;;  %2067 = vmatmul.mubr.f32.gmra.mxu1 %v3119_v62  ;;  %2324 = vmatpush1.msra.mxu0 %v2265_v53  ;;  %v701_v47 = vpop.f32.mrf.mxu0  ;;  %v2296_v53 = vld [vmem:[#allocation2 + $0x758] sm:$0xff] }
 0x175   : > { %v925_v54 = vadd.f32 %v924_v48, %v700_v8  ;;  %2548 = vmatprep.subr.mxu1 %v3260_v0  ;;  %1846 = vmatprep.mubr.f32.mxu0 %v3511_v39  ;;  %v3120_v8 = vld [vmem:[%s3415_s18 + $0x60] sm:$0xff] }
 0x176   : > { %v926_v41 = vpop.f32.mrf.mxu1  ;;  %2549 = vmatpush1.msra.mxu1 %v2297_v49  ;;  %v704_v34 = vpop.f32.mrf.mxu0  ;;  %1847 = vmatmul.mubr.f32.gmra.mxu0 %v3118_v24  ;;  %v2263_v24 = vld [vmem:[#allocation2 + $0x650] sm:$0xff] }
 0x177   : > { %1007 = vst [vmem:[%s4086_s27 + $0x98] sm:$0xff] %v925_v54  ;;  %v705_v25 = vadd.f32 %v4062_v31, %v704_v34  ;;  %2071 = vmatprep.mubr.f32.mxu1 %v3538_v51  ;;  %2325 = vmatprep.subr.mxu0 %v3260_v0 }
 0x178   : > { %v929_v52 = vpop.f32.mrf.mxu1  ;;  %2072 = vmatmul.mubr.f32.gmra.mxu1 %v3120_v8  ;;  %2326 = vmatpush1.msra.mxu0 %v2264_v28  ;;  %v706_v48 = vpop.f32.mrf.mxu0  ;;  %v2295_v28 = vld [vmem:[#allocation2 + $0x750] sm:$0xff] }
 0x179   : > { %v930_v47 = vadd.f32 %v929_v52, %v705_v25  ;;  %2550 = vmatprep.subr.mxu1 %v3260_v0  ;;  %1851 = vmatprep.mubr.f32.mxu0 %v3525_v45  ;;  %v3121_v25 = vld [vmem:[%s3415_s18 + $0x68] sm:$0xff] }
 0x17a   : > { %v931_v49 = vpop.f32.mrf.mxu1  ;;  %2551 = vmatpush1.msra.mxu1 %v2296_v53  ;;  %v709_v54 = vpop.f32.mrf.mxu0  ;;  %1852 = vmatmul.mubr.f32.gmra.mxu0 %v3119_v62  ;;  %v2262_v62 = vld [vmem:[#allocation2 + $0x648] sm:$0xff] }
 0x17b   : > { %1008 = vst [vmem:[%s4086_s27 + $0xa0] sm:$0xff] %v930_v47  ;;  %v710_v41 = vadd.f32 %v4062_v31, %v709_v54  ;;  %2076 = vmatprep.mubr.f32.mxu1 %v3552_v57  ;;  %2327 = vmatprep.subr.mxu0 %v3260_v0 }
 0x17c   : > { %v934_v34 = vpop.f32.mrf.mxu1  ;;  %2077 = vmatmul.mubr.f32.gmra.mxu1 %v3121_v25  ;;  %2328 = vmatpush1.msra.mxu0 %v2263_v24  ;;  %v711_v52 = vpop.f32.mrf.mxu0  ;;  %v2294_v24 = vld [vmem:[#allocation2 + $0x748] sm:$0xff] }
 0x17d   : > { %v935_v48 = vadd.f32 %v934_v34, %v710_v41  ;;  %2552 = vmatprep.subr.mxu1 %v3260_v0  ;;  %1856 = vmatprep.mubr.f32.mxu0 %v3538_v51  ;;  %v3122_v41 = vld [vmem:[%s3415_s18 + $0x78] sm:$0xff] }
 0x17e   : > { %v936_v53 = vpop.f32.mrf.mxu1  ;;  %2553 = vmatpush1.msra.mxu1 %v2295_v28  ;;  %v714_v47 = vpop.f32.mrf.mxu0  ;;  %1857 = vmatmul.mubr.f32.gmra.mxu0 %v3120_v8  ;;  %v2261_v8 = vld [vmem:[#allocation2 + $0x640] sm:$0xff] }
 0x17f   : > { %1009 = vst [vmem:[%s4086_s27 + $0xa8] sm:$0xff] %v935_v48  ;;  %v715_v49 = vadd.f32 %v4062_v31, %v714_v47  ;;  %2081 = vmatprep.mubr.f32.mxu1 %v3565_v63  ;;  %2329 = vmatprep.subr.mxu0 %v3260_v0 }
 0x180   : > { %v939_v54 = vpop.f32.mrf.mxu1  ;;  %2082 = vmatmul.mubr.f32.gmra.mxu1 %v3122_v41  ;;  %2330 = vmatpush1.msra.mxu0 %v2262_v62  ;;  %v716_v34 = vpop.f32.mrf.mxu0  ;;  %v2293_v62 = vld [vmem:[#allocation2 + $0x740] sm:$0xff] }
 0x181   : > { %v940_v52 = vadd.f32 %v939_v54, %v715_v49  ;;  %2554 = vmatprep.subr.mxu1 %v3260_v0  ;;  %1861 = vmatprep.mubr.f32.mxu0 %v3552_v57  ;;  %v3123_v49 = vld [vmem:[%s3415_s18 + $0x80] sm:$0xff] }
 0x182   : > { %v941_v28 = vpop.f32.mrf.mxu1  ;;  %2555 = vmatpush1.msra.mxu1 %v2294_v24  ;;  %v719_v48 = vpop.f32.mrf.mxu0  ;;  %1862 = vmatmul.mubr.f32.gmra.mxu0 %v3121_v25  ;;  %v2260_v25 = vld [vmem:[#allocation2 + $0x638] sm:$0xff] }
 0x183   : > { %1010 = vst [vmem:[%s4086_s27 + $0xb0] sm:$0xff] %v940_v52  ;;  %v720_v53 = vadd.f32 %v4062_v31, %v719_v48  ;;  %2086 = vmatprep.mubr.f32.mxu1 %v3579_v7  ;;  %2331 = vmatprep.subr.mxu0 %v3260_v0 }
 0x184   : > { %v944_v47 = vpop.f32.mrf.mxu1  ;;  %2087 = vmatmul.mubr.f32.gmra.mxu1 %v3123_v49  ;;  %2332 = vmatpush1.msra.mxu0 %v2261_v8  ;;  %v721_v54 = vpop.f32.mrf.mxu0  ;;  %v2292_v8 = vld [vmem:[#allocation2 + $0x738] sm:$0xff] }
 0x185   : > { %v945_v34 = vadd.f32 %v944_v47, %v720_v53  ;;  %2556 = vmatprep.subr.mxu1 %v3260_v0  ;;  %1866 = vmatprep.mubr.f32.mxu0 %v3565_v63  ;;  %v3124_v53 = vld [vmem:[%s3415_s18 + $0x90] sm:$0xff] }
 0x186   : > { %v946_v24 = vpop.f32.mrf.mxu1  ;;  %2557 = vmatpush1.msra.mxu1 %v2293_v62  ;;  %v724_v52 = vpop.f32.mrf.mxu0  ;;  %1867 = vmatmul.mubr.f32.gmra.mxu0 %v3122_v41  ;;  %v2259_v41 = vld [vmem:[#allocation2 + $0x630] sm:$0xff] }
 0x187   : > { %1011 = vst [vmem:[%s4086_s27 + $0xb8] sm:$0xff] %v945_v34  ;;  %v725_v28 = vadd.f32 %v4062_v31, %v724_v52  ;;  %2091 = vmatprep.mubr.f32.mxu1 %v3592_v18  ;;  %2333 = vmatprep.subr.mxu0 %v3260_v0 }
 0x188   : > { %v949_v48 = vpop.f32.mrf.mxu1  ;;  %2092 = vmatmul.mubr.f32.gmra.mxu1 %v3124_v53  ;;  %2334 = vmatpush1.msra.mxu0 %v2260_v25  ;;  %v726_v47 = vpop.f32.mrf.mxu0  ;;  %v2291_v25 = vld [vmem:[#allocation2 + $0x730] sm:$0xff] }
 0x189   : > { %v950_v54 = vadd.f32 %v949_v48, %v725_v28  ;;  %2558 = vmatprep.subr.mxu1 %v3260_v0  ;;  %1871 = vmatprep.mubr.f32.mxu0 %v3579_v7  ;;  %v3125_v28 = vld [vmem:[%s3415_s18 + $0x98] sm:$0xff] }
 0x18a   : > { %v951_v62 = vpop.f32.mrf.mxu1  ;;  %2559 = vmatpush1.msra.mxu1 %v2292_v8  ;;  %v729_v34 = vpop.f32.mrf.mxu0  ;;  %1872 = vmatmul.mubr.f32.gmra.mxu0 %v3123_v49  ;;  %v2258_v49 = vld [vmem:[#allocation2 + $0x628] sm:$0xff] }
 0x18b   : > { %1012 = vst [vmem:[%s4086_s27 + $0xc0] sm:$0xff] %v950_v54  ;;  %v730_v24 = vadd.f32 %v4062_v31, %v729_v34  ;;  %2096 = vmatprep.mubr.f32.mxu1 %v3606_v29  ;;  %2335 = vmatprep.subr.mxu0 %v3260_v0 }
 0x18c   : > { %v954_v52 = vpop.f32.mrf.mxu1  ;;  %2097 = vmatmul.mubr.f32.gmra.mxu1 %v3125_v28  ;;  %2336 = vmatpush1.msra.mxu0 %v2259_v41  ;;  %v731_v48 = vpop.f32.mrf.mxu0  ;;  %v2290_v41 = vld [vmem:[#allocation2 + $0x728] sm:$0xff] }
 0x18d   : > { %v955_v47 = vadd.f32 %v954_v52, %v730_v24  ;;  %2560 = vmatprep.subr.mxu1 %v3260_v0  ;;  %1876 = vmatprep.mubr.f32.mxu0 %v3592_v18  ;;  %v3126_v24 = vld [vmem:[%s3415_s18 + $0xa8] sm:$0xff] }
 0x18e   : > { %v956_v8 = vpop.f32.mrf.mxu1  ;;  %2561 = vmatpush1.msra.mxu1 %v2291_v25  ;;  %v734_v54 = vpop.f32.mrf.mxu0  ;;  %1877 = vmatmul.mubr.f32.gmra.mxu0 %v3124_v53  ;;  %v2257_v53 = vld [vmem:[#allocation2 + $0x620] sm:$0xff] }
 0x18f   : > { %1013 = vst [vmem:[%s4086_s27 + $0xc8] sm:$0xff] %v955_v47  ;;  %v735_v62 = vadd.f32 %v4062_v31, %v734_v54  ;;  %2101 = vmatprep.mubr.f32.mxu1 %v3619_v36  ;;  %2337 = vmatprep.subr.mxu0 %v3260_v0 }
 0x190   : > { %v959_v34 = vpop.f32.mrf.mxu1  ;;  %2102 = vmatmul.mubr.f32.gmra.mxu1 %v3126_v24  ;;  %2338 = vmatpush1.msra.mxu0 %v2258_v49  ;;  %v736_v52 = vpop.f32.mrf.mxu0  ;;  %v2289_v49 = vld [vmem:[#allocation2 + $0x720] sm:$0xff] }
 0x191   : > { %v960_v48 = vadd.f32 %v959_v34, %v735_v62  ;;  %2562 = vmatprep.subr.mxu1 %v3260_v0  ;;  %1881 = vmatprep.mubr.f32.mxu0 %v3606_v29  ;;  %v3127_v62 = vld [vmem:[%s3415_s18 + $0xb0] sm:$0xff] }
 0x192   : > { %v961_v25 = vpop.f32.mrf.mxu1  ;;  %2563 = vmatpush1.msra.mxu1 %v2290_v41  ;;  %v739_v47 = vpop.f32.mrf.mxu0  ;;  %1882 = vmatmul.mubr.f32.gmra.mxu0 %v3125_v28  ;;  %v2256_v28 = vld [vmem:[#allocation2 + $0x618] sm:$0xff] }
 0x193   : > { %1014 = vst [vmem:[%s4086_s27 + $0xd0] sm:$0xff] %v960_v48  ;;  %v740_v8 = vadd.f32 %v4062_v31, %v739_v47  ;;  %2106 = vmatprep.mubr.f32.mxu1 %v3633_v46  ;;  %2339 = vmatprep.subr.mxu0 %v3260_v0  ;;  %v4365_v48 = vld [vmem:[%s4879_s2] ss:$0 sm:$0xff]  ;;  %v2288_v25 = vld [vmem:[#allocation2 + $0x718] sm:$0xff] }
 0x194   : > { %v964_v54 = vpop.f32.mrf.mxu1  ;;  %2107 = vmatmul.mubr.f32.gmra.mxu1 %v3127_v62  ;;  %2340 = vmatpush1.msra.mxu0 %v2257_v53  ;;  %v741_v34 = vpop.f32.mrf.mxu0 }
 0x195   : > { %v965_v52 = vadd.f32 %v964_v54, %v740_v8  ;;  %2564 = vmatprep.subr.mxu1 %v3260_v0  ;;  %1886 = vmatprep.mubr.f32.mxu0 %v3619_v36  ;;  %v3129_v8 = vld [vmem:[%s3415_s18 + $0xc0] sm:$0xff]  ;;  %v2255_v54 = vld [vmem:[#allocation2 + $0x610] sm:$0xff] }
 0x196   : > { %v966_v41 = vpop.f32.mrf.mxu1  ;;  %2565 = vmatpush1.msra.mxu1 %v2289_v49  ;;  %v744_v31 = vpop.f32.mrf.mxu0  ;;  %1887 = vmatmul.mubr.f32.gmra.mxu0 %v3126_v24 }
 0x197   : > { %1015 = vst [vmem:[%s4086_s27 + $0xd8] sm:$0xff] %v965_v52  ;;  %v745_v53 = vadd.f32 %v4365_v48, %v744_v31  ;;  %2111 = vmatprep.mubr.f32.mxu1 %v3646_v55  ;;  %2341 = vmatprep.subr.mxu0 %v3260_v0 }
 0x198   : > { %v969_v47 = vpop.f32.mrf.mxu1  ;;  %2112 = vmatmul.mubr.f32.gmra.mxu1 %v3129_v8  ;;  %2342 = vmatpush1.msra.mxu0 %v2256_v28  ;;  %v746_v24 = vpop.f32.mrf.mxu0  ;;  %v2287_v28 = vld [vmem:[#allocation2 + $0x710] sm:$0xff] }
 0x199   : > { %v970_v49 = vadd.f32 %v969_v47, %v745_v53  ;;  %2566 = vmatprep.subr.mxu1 %v3260_v0  ;;  %1891 = vmatprep.mubr.f32.mxu0 %v3633_v46  ;;  %v3130_v53 = vld [vmem:[%s3415_s18 + $0xc8] sm:$0xff] }
 0x19a   : > { %v971_v34 = vpop.f32.mrf.mxu1  ;;  %2567 = vmatpush1.msra.mxu1 %v2288_v25  ;;  %v749_v52 = vpop.f32.mrf.mxu0  ;;  %1892 = vmatmul.mubr.f32.gmra.mxu0 %v3127_v62  ;;  %v2254_v62 = vld [vmem:[#allocation2 + $0x608] sm:$0xff] }
 0x19b   : > { %1016 = vst [vmem:[%s4086_s27 + $0xe0] sm:$0xff] %v970_v49  ;;  %v750_v41 = vadd.f32 %v4365_v48, %v749_v52  ;;  %2116 = vmatprep.mubr.f32.mxu1 %v3660_v2  ;;  %2343 = vmatprep.subr.mxu0 %v3260_v0 }
 0x19c   : > { %v974_v31 = vpop.f32.mrf.mxu1  ;;  %2117 = vmatmul.mubr.f32.gmra.mxu1 %v3130_v53  ;;  %2344 = vmatpush1.msra.mxu0 %v2255_v54  ;;  %v751_v47 = vpop.f32.mrf.mxu0  ;;  %v2286_v54 = vld [vmem:[#allocation2 + $0x708] sm:$0xff] }
 0x19d   : > { %v975_v24 = vadd.f32 %v974_v31, %v750_v41  ;;  %2568 = vmatprep.subr.mxu1 %v3260_v0  ;;  %1896 = vmatprep.mubr.f32.mxu0 %v3646_v55  ;;  %v3131_v41 = vld [vmem:[%s3415_s18 + $0xd8] sm:$0xff] }
 0x19e   : > { %v976_v25 = vpop.f32.mrf.mxu1  ;;  %2569 = vmatpush1.msra.mxu1 %v2287_v28  ;;  %v754_v49 = vpop.f32.mrf.mxu0  ;;  %1897 = vmatmul.mubr.f32.gmra.mxu0 %v3129_v8  ;;  %v2253_v8 = vld [vmem:[#allocation2 + $0x600] sm:$0xff] }
 0x19f   : > { %1017 = vst [vmem:[%s4086_s27 + $0xe8] sm:$0xff] %v975_v24  ;;  %v755_v34 = vadd.f32 %v4365_v48, %v754_v49  ;;  %2121 = vmatprep.mubr.f32.mxu1 %v3673_v13  ;;  %2345 = vmatprep.subr.mxu0 %v3260_v0 }
 0x1a0   : > { %v979_v52 = vpop.f32.mrf.mxu1  ;;  %2122 = vmatmul.mubr.f32.gmra.mxu1 %v3131_v41  ;;  %2346 = vmatpush1.msra.mxu0 %v2254_v62  ;;  %v756_v31 = vpop.f32.mrf.mxu0  ;;  %v2285_v62 = vld [vmem:[#allocation2 + $0x700] sm:$0xff] }
 0x1a1   : > { %v980_v47 = vadd.f32 %v979_v52, %v755_v34  ;;  %2570 = vmatprep.subr.mxu1 %v3260_v0  ;;  %1901 = vmatprep.mubr.f32.mxu0 %v3660_v2  ;;  %v3132_v34 = vld [vmem:[%s3415_s18 + $0xe0] sm:$0xff] }
 0x1a2   : > { %v981_v28 = vpop.f32.mrf.mxu1  ;;  %2571 = vmatpush1.msra.mxu1 %v2286_v54  ;;  %v759_v24 = vpop.f32.mrf.mxu0  ;;  %1902 = vmatmul.mubr.f32.gmra.mxu0 %v3130_v53  ;;  %v2284_v53 = vld [vmem:[#allocation2 + $0x6f8] sm:$0xff] }
 0x1a3   : > { %1018 = vst [vmem:[%s4086_s27 + $0xf0] sm:$0xff] %v980_v47  ;;  %v760_v25 = vadd.f32 %v4365_v48, %v759_v24  ;;  %2126 = vmatprep.mubr.f32.mxu1 %v3687_v30  ;;  %2347 = vmatprep.subr.mxu0 %v3260_v0 }
 0x1a4   : > { %v984_v49 = vpop.f32.mrf.mxu1  ;;  %2127 = vmatmul.mubr.f32.gmra.mxu1 %v3132_v34  ;;  %2348 = vmatpush1.msra.mxu0 %v2253_v8  ;;  %v761_v52 = vpop.f32.mrf.mxu0  ;;  %v2316_v8 = vld [vmem:[#allocation2 + $0x7f8] sm:$0xff] }
 0x1a5   : > { %v985_v31 = vadd.f32 %v984_v49, %v760_v25  ;;  %2572 = vmatprep.subr.mxu1 %v3260_v0  ;;  %1906 = vmatprep.mubr.f32.mxu0 %v3673_v13  ;;  %v3133_v25 = vld [vmem:[%s3415_s18 + $0xf0] sm:$0xff] }
 0x1a6   : > { %v986_v54 = vpop.f32.mrf.mxu1  ;;  %2573 = vmatpush1.msra.mxu1 %v2285_v62  ;;  %v1270_v47 = vpop.f32.mrf.mxu0  ;;  %1907 = vmatmul.mubr.f32.gmra.mxu0 %v3131_v41  ;;  %v2283_v41 = vld [vmem:[#allocation2 + $0x6f0] sm:$0xff] }
 0x1a7   : > { %1019 = vst [vmem:[%s4086_s27 + $0xf8] sm:$0xff] %v985_v31  ;;  %v1271_v28 = vadd.f32 %v4365_v48, %v1270_v47  ;;  %2131 = vmatprep.mubr.f32.mxu1 %v3700_v44  ;;  %2349 = vmatprep.subr.mxu0 %v3260_v0 }
 0x1a8   : > { %v1495_v24 = vpop.f32.mrf.mxu1  ;;  %2132 = vmatmul.mubr.f32.gmra.mxu1 %v3133_v25  ;;  %2350 = vmatpush2.msra.mxu0 %v2284_v53  ;;  %v1272_v49 = vpop.f32.mrf.mxu0  ;;  %v2315_v53 = vld [vmem:[#allocation2 + $0x7f0] sm:$0xff] }
 0x1a9   : > { %v1496_v52 = vadd.f32 %v1495_v24, %v1271_v28  ;;  %2574 = vmatprep.subr.mxu1 %v3260_v0  ;;  %1911 = vmatprep.mubr.f32.mxu0 %v3687_v30  ;;  %v3134_v28 = vld [vmem:[%s3415_s18 + $0xf8] sm:$0xff] }
 0x1aa   : > { %v1497_v62 = vpop.f32.mrf.mxu1  ;;  %2575 = vmatpush2.msra.mxu1 %v2316_v8  ;;  %v1275_v31 = vpop.f32.mrf.mxu0  ;;  %1912 = vmatmul.mubr.f32.gmra.mxu0 %v3132_v34  ;;  %v2282_v34 = vld [vmem:[#allocation2 + $0x6e8] sm:$0xff] }
 0x1ab   : > { %2940 = vst [vmem:[%s4086_s27 + $0x100] sm:$0xff] %v1496_v52  ;;  %v1276_v54 = vadd.f32 %v4365_v48, %v1275_v31  ;;  %2136 = vmatprep.mubr.f32.mxu1 %v3714_v58  ;;  %2351 = vmatprep.subr.mxu0 %v3260_v0 }
 0x1ac   : > { %v1500_v47 = vpop.f32.mrf.mxu1  ;;  %2137 = vmatmul.mubr.f32.gmra.mxu1 %v3134_v28  ;;  %2352 = vmatpush2.msra.mxu0 %v2283_v41  ;;  %v1277_v24 = vpop.f32.mrf.mxu0  ;;  %v2314_v41 = vld [vmem:[#allocation2 + $0x7e8] sm:$0xff] }
 0x1ad   : > { %v1501_v49 = vadd.f32 %v1500_v47, %v1276_v54  ;;  %2576 = vmatprep.subr.mxu1 %v3260_v0  ;;  %1916 = vmatprep.mubr.f32.mxu0 %v3700_v44  ;;  %v3135_v54 = vld [vmem:[%s3415_s18 + $0x108] sm:$0xff] }
 0x1ae   : > { %v1502_v8 = vpop.f32.mrf.mxu1  ;;  %2577 = vmatpush2.msra.mxu1 %v2315_v53  ;;  %v1280_v52 = vpop.f32.mrf.mxu0  ;;  %1917 = vmatmul.mubr.f32.gmra.mxu0 %v3133_v25  ;;  %v2281_v25 = vld [vmem:[#allocation2 + $0x6e0] sm:$0xff] }
 0x1af   : > { %2941 = vst [vmem:[%s4086_s27 + $0x108] sm:$0xff] %v1501_v49  ;;  %v1281_v62 = vadd.f32 %v4365_v48, %v1280_v52  ;;  %2141 = vmatprep.mubr.f32.mxu1 %v3727_v11  ;;  %2353 = vmatprep.subr.mxu0 %v3260_v0 }
 0x1b0   : > { %v1505_v31 = vpop.f32.mrf.mxu1  ;;  %2142 = vmatmul.mubr.f32.gmra.mxu1 %v3135_v54  ;;  %2354 = vmatpush2.msra.mxu0 %v2282_v34  ;;  %v1282_v47 = vpop.f32.mrf.mxu0  ;;  %v2313_v34 = vld [vmem:[#allocation2 + $0x7e0] sm:$0xff] }
 0x1b1   : > { %v1506_v24 = vadd.f32 %v1505_v31, %v1281_v62  ;;  %2578 = vmatprep.subr.mxu1 %v3260_v0  ;;  %1921 = vmatprep.mubr.f32.mxu0 %v3714_v58  ;;  %v3136_v62 = vld [vmem:[%s3415_s18 + $0x110] sm:$0xff] }
 0x1b2   : > { %v1507_v53 = vpop.f32.mrf.mxu1  ;;  %2579 = vmatpush2.msra.mxu1 %v2314_v41  ;;  %v1285_v49 = vpop.f32.mrf.mxu0  ;;  %1922 = vmatmul.mubr.f32.gmra.mxu0 %v3134_v28  ;;  %v2280_v28 = vld [vmem:[#allocation2 + $0x6d8] sm:$0xff] }
 0x1b3   : > { %2942 = vst [vmem:[%s4086_s27 + $0x110] sm:$0xff] %v1506_v24  ;;  %v1286_v8 = vadd.f32 %v4365_v48, %v1285_v49  ;;  %2146 = vmatprep.mubr.f32.mxu1 %v3741_v35  ;;  %2355 = vmatprep.subr.mxu0 %v3260_v0 }
 0x1b4   : > { %v1510_v52 = vpop.f32.mrf.mxu1  ;;  %2147 = vmatmul.mubr.f32.gmra.mxu1 %v3136_v62  ;;  %2356 = vmatpush2.msra.mxu0 %v2281_v25  ;;  %v1287_v31 = vpop.f32.mrf.mxu0  ;;  %v2312_v25 = vld [vmem:[#allocation2 + $0x7d8] sm:$0xff] }
 0x1b5   : > { %v1511_v47 = vadd.f32 %v1510_v52, %v1286_v8  ;;  %2580 = vmatprep.subr.mxu1 %v3260_v0  ;;  %1926 = vmatprep.mubr.f32.mxu0 %v3727_v11  ;;  %v3137_v8 = vld [vmem:[%s3415_s18 + $0x120] sm:$0xff] }
 0x1b6   : > { %v1512_v41 = vpop.f32.mrf.mxu1  ;;  %2581 = vmatpush2.msra.mxu1 %v2313_v34  ;;  %v1290_v24 = vpop.f32.mrf.mxu0  ;;  %1927 = vmatmul.mubr.f32.gmra.mxu0 %v3135_v54  ;;  %v2279_v54 = vld [vmem:[#allocation2 + $0x6d0] sm:$0xff] }
 0x1b7   : > { %2943 = vst [vmem:[%s4086_s27 + $0x118] sm:$0xff] %v1511_v47  ;;  %v1291_v53 = vadd.f32 %v4365_v48, %v1290_v24  ;;  %2151 = vmatprep.mubr.f32.mxu1 %v3754_v3  ;;  %2357 = vmatprep.subr.mxu0 %v3260_v0 }
 0x1b8   : > { %v1515_v49 = vpop.f32.mrf.mxu1  ;;  %2152 = vmatmul.mubr.f32.gmra.mxu1 %v3137_v8  ;;  %2358 = vmatpush2.msra.mxu0 %v2280_v28  ;;  %v1292_v52 = vpop.f32.mrf.mxu0  ;;  %v2311_v28 = vld [vmem:[#allocation2 + $0x7d0] sm:$0xff] }
 0x1b9   : > { %v1516_v31 = vadd.f32 %v1515_v49, %v1291_v53  ;;  %2582 = vmatprep.subr.mxu1 %v3260_v0  ;;  %1931 = vmatprep.mubr.f32.mxu0 %v3741_v35  ;;  %v3138_v53 = vld [vmem:[%s3415_s18 + $0x128] sm:$0xff] }
 0x1ba   : > { %v1517_v34 = vpop.f32.mrf.mxu1  ;;  %2583 = vmatpush2.msra.mxu1 %v2312_v25  ;;  %v1295_v47 = vpop.f32.mrf.mxu0  ;;  %1932 = vmatmul.mubr.f32.gmra.mxu0 %v3136_v62  ;;  %v2278_v62 = vld [vmem:[#allocation2 + $0x6c8] sm:$0xff] }
 0x1bb   : > { %2944 = vst [vmem:[%s4086_s27 + $0x120] sm:$0xff] %v1516_v31  ;;  %v1296_v41 = vadd.f32 %v4365_v48, %v1295_v47  ;;  %2156 = vmatprep.mubr.f32.mxu1 %v3768_v42  ;;  %2359 = vmatprep.subr.mxu0 %v3260_v0 }
 0x1bc   : > { %v1520_v24 = vpop.f32.mrf.mxu1  ;;  %2157 = vmatmul.mubr.f32.gmra.mxu1 %v3138_v53  ;;  %2360 = vmatpush2.msra.mxu0 %v2279_v54  ;;  %v1297_v49 = vpop.f32.mrf.mxu0  ;;  %v2310_v54 = vld [vmem:[#allocation2 + $0x7c8] sm:$0xff] }
 0x1bd   : > { %v1521_v52 = vadd.f32 %v1520_v24, %v1296_v41  ;;  %2584 = vmatprep.subr.mxu1 %v3260_v0  ;;  %1936 = vmatprep.mubr.f32.mxu0 %v3754_v3  ;;  %v3139_v41 = vld [vmem:[%s3415_s18 + $0x138] sm:$0xff] }
 0x1be   : > { %v1522_v25 = vpop.f32.mrf.mxu1  ;;  %2585 = vmatpush2.msra.mxu1 %v2311_v28  ;;  %v1300_v31 = vpop.f32.mrf.mxu0  ;;  %1937 = vmatmul.mubr.f32.gmra.mxu0 %v3137_v8  ;;  %v2277_v8 = vld [vmem:[#allocation2 + $0x6c0] sm:$0xff] }
 0x1bf   : > { %2945 = vst [vmem:[%s4086_s27 + $0x128] sm:$0xff] %v1521_v52  ;;  %v1301_v34 = vadd.f32 %v4365_v48, %v1300_v31  ;;  %2161 = vmatprep.mubr.f32.mxu1 %v3781_v6  ;;  %2361 = vmatprep.subr.mxu0 %v3260_v0 }
 0x1c0   : > { %v1525_v47 = vpop.f32.mrf.mxu1  ;;  %2162 = vmatmul.mubr.f32.gmra.mxu1 %v3139_v41  ;;  %2362 = vmatpush2.msra.mxu0 %v2278_v62  ;;  %v1302_v24 = vpop.f32.mrf.mxu0  ;;  %v2309_v62 = vld [vmem:[#allocation2 + $0x7c0] sm:$0xff] }
 0x1c1   : > { %v1526_v49 = vadd.f32 %v1525_v47, %v1301_v34  ;;  %2586 = vmatprep.subr.mxu1 %v3260_v0  ;;  %1941 = vmatprep.mubr.f32.mxu0 %v3768_v42  ;;  %v3140_v34 = vld [vmem:[%s3415_s18 + $0x140] sm:$0xff] }
 0x1c2   : > { %v1527_v28 = vpop.f32.mrf.mxu1  ;;  %2587 = vmatpush2.msra.mxu1 %v2310_v54  ;;  %v1305_v52 = vpop.f32.mrf.mxu0  ;;  %1942 = vmatmul.mubr.f32.gmra.mxu0 %v3138_v53  ;;  %v2276_v53 = vld [vmem:[#allocation2 + $0x6b8] sm:$0xff] }
 0x1c3   : > { %2946 = vst [vmem:[%s4086_s27 + $0x130] sm:$0xff] %v1526_v49  ;;  %v1306_v25 = vadd.f32 %v4365_v48, %v1305_v52  ;;  %2166 = vmatprep.mubr.f32.mxu1 %v3795_v23  ;;  %2363 = vmatprep.subr.mxu0 %v3260_v0 }
 0x1c4   : > { %v1530_v31 = vpop.f32.mrf.mxu1  ;;  %2167 = vmatmul.mubr.f32.gmra.mxu1 %v3140_v34  ;;  %2364 = vmatpush2.msra.mxu0 %v2277_v8  ;;  %v1307_v47 = vpop.f32.mrf.mxu0  ;;  %v2308_v8 = vld [vmem:[#allocation2 + $0x7b8] sm:$0xff] }
 0x1c5   : > { %v1531_v24 = vadd.f32 %v1530_v31, %v1306_v25  ;;  %2588 = vmatprep.subr.mxu1 %v3260_v0  ;;  %1946 = vmatprep.mubr.f32.mxu0 %v3781_v6  ;;  %v3141_v25 = vld [vmem:[%s3415_s18 + $0x150] sm:$0xff] }
 0x1c6   : > { %v1532_v54 = vpop.f32.mrf.mxu1  ;;  %2589 = vmatpush2.msra.mxu1 %v2309_v62  ;;  %v1310_v49 = vpop.f32.mrf.mxu0  ;;  %1947 = vmatmul.mubr.f32.gmra.mxu0 %v3139_v41  ;;  %v2275_v41 = vld [vmem:[#allocation2 + $0x6b0] sm:$0xff] }
 0x1c7   : > { %2947 = vst [vmem:[%s4086_s27 + $0x138] sm:$0xff] %v1531_v24  ;;  %v1311_v28 = vadd.f32 %v4365_v48, %v1310_v49  ;;  %2171 = vmatprep.mubr.f32.mxu1 %v3808_v32  ;;  %2365 = vmatprep.subr.mxu0 %v3260_v0 }
 0x1c8   : > { %v1535_v52 = vpop.f32.mrf.mxu1  ;;  %2172 = vmatmul.mubr.f32.gmra.mxu1 %v3141_v25  ;;  %2366 = vmatpush2.msra.mxu0 %v2276_v53  ;;  %v1312_v31 = vpop.f32.mrf.mxu0  ;;  %v2307_v53 = vld [vmem:[#allocation2 + $0x7b0] sm:$0xff] }
 0x1c9   : > { %v1536_v47 = vadd.f32 %v1535_v52, %v1311_v28  ;;  %2590 = vmatprep.subr.mxu1 %v3260_v0  ;;  %1951 = vmatprep.mubr.f32.mxu0 %v3795_v23  ;;  %v3142_v28 = vld [vmem:[%s3415_s18 + $0x158] sm:$0xff] }
 0x1ca   : > { %v1537_v62 = vpop.f32.mrf.mxu1  ;;  %2591 = vmatpush2.msra.mxu1 %v2308_v8  ;;  %v1315_v24 = vpop.f32.mrf.mxu0  ;;  %1952 = vmatmul.mubr.f32.gmra.mxu0 %v3140_v34  ;;  %v2274_v34 = vld [vmem:[#allocation2 + $0x6a8] sm:$0xff] }
 0x1cb   : > { %2948 = vst [vmem:[%s4086_s27 + $0x140] sm:$0xff] %v1536_v47  ;;  %v1316_v54 = vadd.f32 %v4365_v48, %v1315_v24  ;;  %2176 = vmatprep.mubr.f32.mxu1 %v3822_v17  ;;  %2367 = vmatprep.subr.mxu0 %v3260_v0 }
 0x1cc   : > { %v1540_v49 = vpop.f32.mrf.mxu1  ;;  %2177 = vmatmul.mubr.f32.gmra.mxu1 %v3142_v28  ;;  %2368 = vmatpush2.msra.mxu0 %v2275_v41  ;;  %v1317_v52 = vpop.f32.mrf.mxu0  ;;  %v2306_v41 = vld [vmem:[#allocation2 + $0x7a8] sm:$0xff] }
 0x1cd   : > { %v1541_v31 = vadd.f32 %v1540_v49, %v1316_v54  ;;  %2592 = vmatprep.subr.mxu1 %v3260_v0  ;;  %1956 = vmatprep.mubr.f32.mxu0 %v3808_v32  ;;  %v3143_v54 = vld [vmem:[%s3415_s18 + $0x168] sm:$0xff] }
 0x1ce   : > { %v1542_v8 = vpop.f32.mrf.mxu1  ;;  %2593 = vmatpush2.msra.mxu1 %v2307_v53  ;;  %v1320_v47 = vpop.f32.mrf.mxu0  ;;  %1957 = vmatmul.mubr.f32.gmra.mxu0 %v3141_v25  ;;  %v2273_v25 = vld [vmem:[#allocation2 + $0x6a0] sm:$0xff] }
 0x1cf   : > { %2949 = vst [vmem:[%s4086_s27 + $0x148] sm:$0xff] %v1541_v31  ;;  %v1321_v62 = vadd.f32 %v4365_v48, %v1320_v47  ;;  %2181 = vmatprep.mubr.f32.mxu1 %v3835_v43  ;;  %2369 = vmatprep.subr.mxu0 %v3260_v0 }
 0x1d0   : > { %v1545_v24 = vpop.f32.mrf.mxu1  ;;  %2182 = vmatmul.mubr.f32.gmra.mxu1 %v3143_v54  ;;  %2370 = vmatpush2.msra.mxu0 %v2274_v34  ;;  %v1322_v49 = vpop.f32.mrf.mxu0  ;;  %v2305_v34 = vld [vmem:[#allocation2 + $0x7a0] sm:$0xff] }
 0x1d1   : > { %v1546_v52 = vadd.f32 %v1545_v24, %v1321_v62  ;;  %2594 = vmatprep.subr.mxu1 %v3260_v0  ;;  %1961 = vmatprep.mubr.f32.mxu0 %v3822_v17  ;;  %v3144_v62 = vld [vmem:[%s3415_s18 + $0x170] sm:$0xff] }
 0x1d2   : > { %v1547_v53 = vpop.f32.mrf.mxu1  ;;  %2595 = vmatpush2.msra.mxu1 %v2306_v41  ;;  %v1325_v31 = vpop.f32.mrf.mxu0  ;;  %1962 = vmatmul.mubr.f32.gmra.mxu0 %v3142_v28  ;;  %v2272_v28 = vld [vmem:[#allocation2 + $0x698] sm:$0xff] }
 0x1d3   : > { %2950 = vst [vmem:[%s4086_s27 + $0x150] sm:$0xff] %v1546_v52  ;;  %v1326_v8 = vadd.f32 %v4365_v48, %v1325_v31  ;;  %2186 = vmatprep.mubr.f32.mxu1 %v3847_v20  ;;  %2371 = vmatprep.subr.mxu0 %v3260_v0  ;;  %v293_v41 = vld [vmem:[%s3415_s18 + $0x198] sm:$0xff]  ;;  %v4480_v52 = vld [vmem:[%s3415_s18 + $0x1a0] sm:$0xff] }
 0x1d4   : > { %v1550_v47 = vpop.f32.mrf.mxu1  ;;  %2187 = vmatmul.mubr.f32.gmra.mxu1 %v3144_v62  ;;  %2372 = vmatpush2.msra.mxu0 %v2273_v25  ;;  %v1327_v24 = vpop.f32.mrf.mxu0  ;;  %v2304_v25 = vld [vmem:[#allocation2 + $0x798] sm:$0xff]  ;;  %v1690_v5 = vrot.slane %v293_v41, 1 }
 0x1d5   : > { %v1551_v49 = vadd.f32 %v1550_v47, %v1326_v8  ;;  %2596 = vmatprep.subr.mxu1 %v3260_v0  ;;  %1966 = vmatprep.mubr.f32.mxu0 %v3835_v43  ;;  %v3145_v47 = vld [vmem:[%s3415_s18 + $0x180] sm:$0xff] }
 0x1d6   : > { %v1552_v53 = vpop.f32.mrf.mxu1  ;;  %2597 = vmatpush2.msra.mxu1 %v2305_v34  ;;  %v1330_v31 = vpop.f32.mrf.mxu0  ;;  %1967 = vmatmul.mubr.f32.gmra.mxu0 %v3143_v54  ;;  %v1691_v34 = vrot.slane %v4480_v52, 1 }
 0x1d7   : > { %2951 = vst [vmem:[%s4086_s27 + $0x158] sm:$0xff] %v1551_v49  ;;  %v1331_v15 = vadd.f32 %v4365_v48, %v1330_v31  ;;  %2191 = vmatprep.mubr.f32.mxu1 %v3859_v1  ;;  %2373 = vmatprep.subr.mxu0 %v3260_v0  ;;  %v2271_v49 = vld [vmem:[#allocation2 + $0x690] sm:$0xff]  ;;  %v4491_v53 = vld [vmem:[%s3415_s18 + $0x1a8] sm:$0x3] }
 0x1d8   : > { %v1555_v8 = vpop.f32.mrf.mxu1  ;;  %2192 = vmatmul.mubr.f32.gmra.mxu1 %v3145_v47  ;;  %2374 = vmatpush2.msra.mxu0 %v2272_v28  ;;  %v1332_v24 = vpop.f32.mrf.mxu0  ;;  %v4499_v43 = vsel %vm345_vm0, %v1690_v5, %v1691_v34 }
 0x1d9   : > { %v1556_v54 = vadd.f32 %v1555_v8, %v1331_v15  ;;  %2598 = vmatprep.subr.mxu1 %v3260_v0  ;;  %1971 = vmatprep.mubr.f32.mxu0 %v3847_v20  ;;  %v2303_v24 = vld [vmem:[#allocation2 + $0x790] sm:$0xff]  ;;  %v3146_v8 = vld [vmem:[%s3415_s18 + $0x188] sm:$0xff]  ;;  %s3175_s18 = scalar_lea.vmem %s4827_s6, 16384 }
 0x1da   : > { %v1557_v31 = vpop.f32.mrf.mxu1  ;;  %2599 = vmatpush2.msra.mxu1 %v2304_v25  ;;  %v1335_v19 = vpop.f32.mrf.mxu0  ;;  %1972 = vmatmul.mubr.f32.gmra.mxu0 %v3144_v62  ;;  %v1693_v25 = vrot.slane %v4491_v53, 1  ;;  %p3176_p11 = scmp.ne.s32.totalorder %s4827_s6, %s3175_s18  ;;  %p3183_p1 = scmp.lt.s32.totalorder %s3181_s26, %s3175_s18 }
 0x1db   : > { %2952 = vst [vmem:[%s4086_s27 + $0x160] sm:$0xff] %v1556_v54  ;;  %v1336_v28 = vadd.f32 %v4365_v48, %v1335_v19  ;;  %2196 = vmatprep.mubr.f32.mxu1 %v3871_v40  ;;  %2375 = vmatprep.subr.mxu0 %v3260_v0  ;;  %v2270_v19 = vld [vmem:[#allocation2 + $0x688] sm:$0xff] }
 0x1dc   : > { %v1560_v15 = vpop.f32.mrf.mxu1  ;;  %2197 = vmatmul.mubr.f32.gmra.mxu1 %v3146_v8  ;;  %2376 = vmatpush2.msra.mxu0 %v2271_v49  ;;  %v1337_v20 = vpop.f32.mrf.mxu0  ;;  %p3177_p12 = pnand %p3176_p11, %p3324_p4  ;;  %p3184_p2 = por %p3183_p1, %p3182_p0 }
 0x1dd   : > { %v1561_v62 = vadd.f32 %v1560_v15, %v1336_v28  ;;  %2600 = vmatprep.subr.mxu1 %v3260_v0  ;;  %1976 = vmatprep.mubr.f32.mxu0 %v3859_v1  ;;  %v2302_v20 = vld [vmem:[#allocation2 + $0x788] sm:$0xff]  ;;  %v4511_v28 = vsel %vm345_vm0, %v1691_v34, %v1693_v25  ;;  %v2301_v34 = vld [vmem:[#allocation2 + $0x780] sm:$0xff] }
 0x1de   : > { %v1562_v54 = vpop.f32.mrf.mxu1  ;;  %2601 = vmatpush2.msra.mxu1 %v2303_v24  ;;  %v1340_v31 = vpop.f32.mrf.mxu0  ;;  %1977 = vmatmul.mubr.f32.gmra.mxu0 %v3145_v47  ;;  %v2269_v47 = vld [vmem:[#allocation2 + $0x680] sm:$0xff]  ;;  %p3178_p13 = pneg %p3177_p12 }
 0x1df   : > { %2953 = vst [vmem:[%s4086_s27 + $0x168] sm:$0xff] %v1561_v62  ;;  %v1341_v16 = vadd.f32 %v4365_v48, %v1340_v31  ;;  %2201 = vmatprep.mubr.f32.mxu1 %v4499_v43  ;;  %2377 = vmatprep.subr.mxu0 %v3260_v0 }
 0x1e0   : > { %v1565_v5 = vpop.f32.mrf.mxu1  ;;  %2202 = vmatmul.mubr.f32.gmra.mxu1 %v293_v41  ;;  %2378 = vmatpush2.msra.mxu0 %v2270_v19  ;;  %v1342_v49 = vpop.f32.mrf.mxu0  ;;  %p3185_p3 = pnand %p3184_p2, %p3178_p13 }
 0x1e1   : > { %v1566_v24 = vadd.f32 %v1565_v5, %v1341_v16  ;;  %2602 = vmatprep.subr.mxu1 %v3260_v0  ;;  %1981 = vmatprep.mubr.f32.mxu0 %v3871_v40 }
 0x1e2   : > { %v1567_v15 = vpop.f32.mrf.mxu1  ;;  %2603 = vmatpush2.msra.mxu1 %v2302_v20  ;;  %v1345_v62 = vpop.f32.mrf.mxu0  ;;  %1982 = vmatmul.mubr.f32.gmra.mxu0 %v3146_v8 }
 0x1e3   : > { %2954 = vst [vmem:[%s4086_s27 + $0x170] sm:$0xff] %v1566_v24  ;;  %v1346_v41 = vadd.f32 %v4365_v48, %v1345_v62  ;;  %2206 = vmatprep.mubr.f32.mxu1 %v4511_v28  ;;  %2379 = vmatprep.subr.mxu0 %v3260_v0 }
 0x1e4   : > { %v1570_v19 = vpop.f32.mrf.mxu1  ;;  %2207 = vmatmul.mubr.f32.gmra.mxu1 %v4480_v52  ;;  %2380 = vmatpush2.msra.mxu0 %v2269_v47  ;;  %v1347_v16 = vpop.f32.mrf.mxu0 }
 0x1e5   : > { %v1571_v54 = vadd.f32 %v1570_v19, %v1346_v41  ;;  %2604 = vmatprep.subr.mxu1 %v3260_v0  ;;  %2381 = vmatprep.mubr.f32.mxu0 %v3884_v59 }
 0x1e6   : > { %v1572_v8 = vpop.f32.mrf.mxu1  ;;  %2605 = vmatpush2.msra.mxu1 %v2301_v34  ;;  %v1350_v31 = vpop.f32.mrf.mxu0  ;;  %2382 = vmatmul.mubr.f32.vlgmr.msra.gmra.mxu0 %v3452_v14 }
 0x1e7   : > { %2955 = vst [vmem:[%s4086_s27 + $0x178] sm:$0xff] %v1571_v54  ;;  %v1351_v20 = vadd.f32 %v4365_v48, %v1350_v31  ;;  %2606 = vmatprep.mubr.f32.mxu1 %v3905_v22  ;;  %2386 = vmatprep.mubr.f32.mxu0 %v3895_v10 }
 0x1e8   : > { %v1575_v52 = vpop.f32.mrf.mxu1  ;;  %2607 = vmatmul.mubr.f32.vlgmr.msra.gmra.mxu1 %v3483_v27  ;;  %v1352_v5 = vpop.f32.mrf.mxu0 }
 0x1e9   : > { %v1576_v0 = vadd.f32 %v1575_v52, %v1351_v20  ;;  %2611 = vmatprep.mubr.f32.mxu1 %v3916_v60 }
 0x1ea   : > { %v1577_v59 = vpop.f32.mrf.mxu1  ;;  %v1355_v49 = vpop.f32.mrf.mxu0  ;;  %2387 = vmatmul.mubr.f32.gmra.mxu0 %v3471_v21 }
 0x1eb   : > { %2956 = vst [vmem:[%s4086_s27 + $0x180] sm:$0xff] %v1576_v0  ;;  %v1356_v14 = vadd.f32 %v4365_v48, %v1355_v49  ;;  %2391 = vmatprep.mubr.f32.mxu0 %v3905_v22 }
 0x1ec   : > { %v1580_v24 = vpop.f32.mrf.mxu1  ;;  %2612 = vmatmul.mubr.f32.gmra.mxu1 %v3498_v33  ;;  %v1357_v10 = vpop.f32.mrf.mxu0 }
 0x1ed   : > { %v1581_v47 = vadd.f32 %v1580_v24, %v1356_v14  ;;  %2616 = vmatprep.mubr.f32.mxu1 %v3927_v38 }
 0x1ee   : > { %v1582_v15 = vpop.f32.mrf.mxu1  ;;  %v1360_v62 = vpop.f32.mrf.mxu0  ;;  %2392 = vmatmul.mubr.f32.gmra.mxu0 %v3483_v27 }
 0x1ef   : > { %2957 = vst [vmem:[%s4086_s27 + $0x188] sm:$0xff] %v1581_v47  ;;  %v1361_v21 = vadd.f32 %v4365_v48, %v1360_v62  ;;  %2396 = vmatprep.mubr.f32.mxu0 %v3916_v60  ;;  %v4988_v62 = vld [vmem:[#allocation12_spill] sm:$0xff] }
 0x1f0   : > { %v1585_v41 = vpop.f32.mrf.mxu1  ;;  %2617 = vmatmul.mubr.f32.gmra.mxu1 %v3511_v39  ;;  %v1362_v22 = vpop.f32.mrf.mxu0 }
 0x1f1   : > { %v1586_v34 = vadd.f32 %v1585_v41, %v1361_v21  ;;  %2621 = vmatprep.mubr.f32.mxu1 %v3938_v9 }
 0x1f2   : > { %v1587_v19 = vpop.f32.mrf.mxu1  ;;  %v1365_v16 = vpop.f32.mrf.mxu0  ;;  %2397 = vmatmul.mubr.f32.gmra.mxu0 %v3498_v33 }
 0x1f3   : > { %2958 = vst [vmem:[%s4086_s27 + $0x190] sm:$0xff] %v1586_v34  ;;  %v1366_v27 = vadd.f32 %v4365_v48, %v1365_v16  ;;  %2401 = vmatprep.mubr.f32.mxu0 %v3927_v38  ;;  %v4989_v19 = vld [vmem:[#allocation13_spill] sm:$0xff] }
 0x1f4   : > { %v1590_v54 = vpop.f32.mrf.mxu1  ;;  %2622 = vmatmul.mubr.f32.gmra.mxu1 %v3525_v45  ;;  %v1367_v60 = vpop.f32.mrf.mxu0 }
 0x1f5   : > { %v1591_v8 = vadd.f32 %v1590_v54, %v1366_v27  ;;  %2626 = vmatprep.mubr.f32.mxu1 %v3949_v26 }
 0x1f6   : > { %v1592_v31 = vpop.f32.mrf.mxu1  ;;  %v1370_v20 = vpop.f32.mrf.mxu0  ;;  %2402 = vmatmul.mubr.f32.gmra.mxu0 %v3511_v39 }
 0x1f7   : > { %2959 = vst [vmem:[%s4086_s27 + $0x198] sm:$0xff] %v1591_v8  ;;  %v1371_v33 = vadd.f32 %v4365_v48, %v1370_v20  ;;  %2406 = vmatprep.mubr.f32.mxu0 %v3938_v9  ;;  %v4990_v8 = vld [vmem:[#allocation14_spill] sm:$0xff] }
 0x1f8   : > { %v1595_v52 = vpop.f32.mrf.mxu1  ;;  %2627 = vmatmul.mubr.f32.gmra.mxu1 %v3538_v51  ;;  %v1372_v38 = vpop.f32.mrf.mxu0 }
 0x1f9   : > { %v1596_v5 = vadd.f32 %v1595_v52, %v1371_v33  ;;  %2631 = vmatprep.mubr.f32.mxu1 %v3960_v56 }
 0x1fa   : > { %v1597_v0 = vpop.f32.mrf.mxu1  ;;  %v1375_v59 = vpop.f32.mrf.mxu0  ;;  %2407 = vmatmul.mubr.f32.gmra.mxu0 %v3525_v45 }
 0x1fb   : > { %2960 = vst [vmem:[%s4086_s27 + $0x1a0] sm:$0xff] %v1596_v5  ;;  %v1376_v39 = vadd.f32 %v4365_v48, %v1375_v59  ;;  %2411 = vmatprep.mubr.f32.mxu0 %v3949_v26  ;;  %v4991_v5 = vld [vmem:[#allocation15_spill] sm:$0xff] }
 0x1fc   : > { %v1600_v49 = vpop.f32.mrf.mxu1  ;;  %2632 = vmatmul.mubr.f32.gmra.mxu1 %v3552_v57  ;;  %v1377_v9 = vpop.f32.mrf.mxu0 }
 0x1fd   : > { %v1601_v14 = vadd.f32 %v1600_v49, %v1376_v39  ;;  %2636 = vmatprep.mubr.f32.mxu1 %v3971_v50 }
 0x1fe   : > { %v1602_v24 = vpop.f32.mrf.mxu1  ;;  %v1380_v10 = vpop.f32.mrf.mxu0  ;;  %2412 = vmatmul.mubr.f32.gmra.mxu0 %v3538_v51 }
 0x1ff   : > { %2961 = vst [vmem:[%s4086_s27 + $0x1a8] sm:$0xff] %v1601_v14  ;;  %v1381_v45 = vadd.f32 %v4365_v48, %v1380_v10  ;;  %2416 = vmatprep.mubr.f32.mxu0 %v3960_v56  ;;  %v4992_v14 = vld [vmem:[#allocation16_spill] sm:$0xff] }
 0x200   : > { %v1605_v47 = vpop.f32.mrf.mxu1  ;;  %2637 = vmatmul.mubr.f32.gmra.mxu1 %v3565_v63  ;;  %v1382_v26 = vpop.f32.mrf.mxu0 }
 0x201   : > { %v1606_v15 = vadd.f32 %v1605_v47, %v1381_v45  ;;  %2641 = vmatprep.mubr.f32.mxu1 %v4988_v62 }
 0x202   : > { %v1607_v21 = vpop.f32.mrf.mxu1  ;;  %v1385_v41 = vpop.f32.mrf.mxu0  ;;  %2417 = vmatmul.mubr.f32.gmra.mxu0 %v3552_v57 }
 0x203   : > { %2962 = vst [vmem:[%s4086_s27 + $0x1b0] sm:$0xff] %v1606_v15  ;;  %v1386_v51 = vadd.f32 %v4365_v48, %v1385_v41  ;;  %2421 = vmatprep.mubr.f32.mxu0 %v3971_v50  ;;  %v4993_v15 = vld [vmem:[#allocation17_spill] sm:$0xff] }
 0x204   : > { %v1610_v22 = vpop.f32.mrf.mxu1  ;;  %2642 = vmatmul.mubr.f32.gmra.mxu1 %v3579_v7  ;;  %v1387_v56 = vpop.f32.mrf.mxu0 }
 0x205   : > { %v1611_v34 = vadd.f32 %v1610_v22, %v1386_v51  ;;  %2646 = vmatprep.mubr.f32.mxu1 %v4989_v19  ;;  %v4994_v56 = vld [vmem:[#allocation18_spill] sm:$0xff] }
 0x206   : > { %v1612_v16 = vpop.f32.mrf.mxu1  ;;  %v1390_v27 = vpop.f32.mrf.mxu0  ;;  %2422 = vmatmul.mubr.f32.gmra.mxu0 %v3565_v63 }
 0x207   : > { %2963 = vst [vmem:[%s4086_s27 + $0x1b8] sm:$0xff] %v1611_v34  ;;  %v1391_v57 = vadd.f32 %v4365_v48, %v1390_v27  ;;  %2426 = vmatprep.mubr.f32.mxu0 %v4988_v62 }
 0x208   : > { %v1615_v54 = vpop.f32.mrf.mxu1  ;;  %2647 = vmatmul.mubr.f32.gmra.mxu1 %v3592_v18  ;;  %v1392_v50 = vpop.f32.mrf.mxu0 }
 0x209   : > { %v1616_v60 = vadd.f32 %v1615_v54, %v1391_v57  ;;  %2651 = vmatprep.mubr.f32.mxu1 %v4990_v8 }
 0x20a   : > { %v1617_v31 = vpop.f32.mrf.mxu1  ;;  %v1395_v20 = vpop.f32.mrf.mxu0  ;;  %2427 = vmatmul.mubr.f32.gmra.mxu0 %v3579_v7 }
 0x20b   : > { %2964 = vst [vmem:[%s4086_s27 + $0x1c0] sm:$0xff] %v1616_v60  ;;  %v1396_v63 = vadd.f32 %v4365_v48, %v1395_v20  ;;  %2431 = vmatprep.mubr.f32.mxu0 %v4989_v19  ;;  %v4995_v20 = vld [vmem:[#allocation19_spill] sm:$0xff] }
 0x20c   : > { %v1620_v33 = vpop.f32.mrf.mxu1  ;;  %2652 = vmatmul.mubr.f32.gmra.mxu1 %v3606_v29  ;;  %v1397_v52 = vpop.f32.mrf.mxu0 }
 0x20d   : > { %v1621_v38 = vadd.f32 %v1620_v33, %v1396_v63  ;;  %2656 = vmatprep.mubr.f32.mxu1 %v4991_v5 }
 0x20e   : > { %v1622_v0 = vpop.f32.mrf.mxu1  ;;  %v1400_v59 = vpop.f32.mrf.mxu0  ;;  %2432 = vmatmul.mubr.f32.gmra.mxu0 %v3592_v18 }
 0x20f   : > { %2965 = vst [vmem:[%s4086_s27 + $0x1c8] sm:$0xff] %v1621_v38  ;;  %v1401_v7 = vadd.f32 %v4365_v48, %v1400_v59  ;;  %2436 = vmatprep.mubr.f32.mxu0 %v4990_v8 }
 0x210   : > { %v1625_v39 = vpop.f32.mrf.mxu1  ;;  %2657 = vmatmul.mubr.f32.gmra.mxu1 %v3619_v36  ;;  %v1402_v49 = vpop.f32.mrf.mxu0 }
 0x211   : > { %v1626_v9 = vadd.f32 %v1625_v39, %v1401_v7  ;;  %2661 = vmatprep.mubr.f32.mxu1 %v4992_v14  ;;  %v4996_v49 = vld [vmem:[#allocation20_spill] sm:$0xff] }
 0x212   : > { %v1627_v24 = vpop.f32.mrf.mxu1  ;;  %v1405_v10 = vpop.f32.mrf.mxu0  ;;  %2437 = vmatmul.mubr.f32.gmra.mxu0 %v3606_v29 }
 0x213   : > { %2966 = vst [vmem:[%s4086_s27 + $0x1d0] sm:$0xff] %v1626_v9  ;;  %v1406_v18 = vadd.f32 %v4365_v48, %v1405_v10  ;;  %2441 = vmatprep.mubr.f32.mxu0 %v4991_v5 }
 0x214   : > { %v1630_v45 = vpop.f32.mrf.mxu1  ;;  %2662 = vmatmul.mubr.f32.gmra.mxu1 %v3633_v46  ;;  %v1407_v47 = vpop.f32.mrf.mxu0 }
 0x215   : > { %v1631_v26 = vadd.f32 %v1630_v45, %v1406_v18  ;;  %2666 = vmatprep.mubr.f32.mxu1 %v4993_v15 }
 0x216   : > { %v1632_v62 = vpop.f32.mrf.mxu1  ;;  %v1410_v21 = vpop.f32.mrf.mxu0  ;;  %2442 = vmatmul.mubr.f32.gmra.mxu0 %v3619_v36 }
 0x217   : > { %2967 = vst [vmem:[%s4086_s27 + $0x1d8] sm:$0xff] %v1631_v26  ;;  %v1411_v29 = vadd.f32 %v4365_v48, %v1410_v21  ;;  %2446 = vmatprep.mubr.f32.mxu0 %v4992_v14  ;;  %v4997_v62 = vld [vmem:[#allocation21_spill] sm:$0xff] }
 0x218   : > { %v1635_v41 = vpop.f32.mrf.mxu1  ;;  %2667 = vmatmul.mubr.f32.gmra.mxu1 %v3646_v55  ;;  %v1412_v51 = vpop.f32.mrf.mxu0 }
 0x219   : > { %v1636_v22 = vadd.f32 %v1635_v41, %v1411_v29  ;;  %2671 = vmatprep.mubr.f32.mxu1 %v4994_v56 }
 0x21a   : > { %v1637_v34 = vpop.f32.mrf.mxu1  ;;  %v1415_v19 = vpop.f32.mrf.mxu0  ;;  %2447 = vmatmul.mubr.f32.gmra.mxu0 %v3633_v46 }
 0x21b   : > { %2968 = vst [vmem:[%s4086_s27 + $0x1e0] sm:$0xff] %v1636_v22  ;;  %v1416_v36 = vadd.f32 %v4365_v48, %v1415_v19  ;;  %2451 = vmatprep.mubr.f32.mxu0 %v4993_v15 }
 0x21c   : > { %v1640_v16 = vpop.f32.mrf.mxu1  ;;  %2672 = vmatmul.mubr.f32.gmra.mxu1 %v3660_v2  ;;  %v1417_v27 = vpop.f32.mrf.mxu0 }
 0x21d   : > { %v1641_v57 = vadd.f32 %v1640_v16, %v1416_v36  ;;  %2676 = vmatprep.mubr.f32.mxu1 %v4065_v61  ;;  %v4998_v16 = vld [vmem:[#allocation22_spill] sm:$0xff] }
 0x21e   : > { %v1642_v54 = vpop.f32.mrf.mxu1  ;;  %v1420_v50 = vpop.f32.mrf.mxu0  ;;  %2452 = vmatmul.mubr.f32.gmra.mxu0 %v3646_v55  ;;  %v4618_v55 = vld [vmem:[%s4879_s2] ss:$0 sm:$0xff] }
 0x21f   : > { %2969 = vst [vmem:[%s4086_s27 + $0x1e8] sm:$0xff] %v1641_v57  ;;  %v1421_v46 = vadd.f32 %v4365_v48, %v1420_v50  ;;  %2456 = vmatprep.mubr.f32.mxu0 %v4994_v56 }
 0x220   : > { %v1645_v60 = vpop.f32.mrf.mxu1  ;;  %2677 = vmatmul.mubr.f32.gmra.mxu1 %v3673_v13  ;;  %v1422_v8 = vpop.f32.mrf.mxu0 }
 0x221   : > { %v1646_v31 = vadd.f32 %v1645_v60, %v1421_v46  ;;  %2681 = vmatprep.mubr.f32.mxu1 %v4995_v20  ;;  %v4999_v60 = vld [vmem:[#allocation23_spill] sm:$0xff] }
 0x222   : > { %v1647_v63 = vpop.f32.mrf.mxu1  ;;  %v1425_v33 = vpop.f32.mrf.mxu0  ;;  %2457 = vmatmul.mubr.f32.gmra.mxu0 %v3660_v2 }
 0x223   : > { %2970 = vst [vmem:[%s4086_s27 + $0x1f0] sm:$0xff] %v1646_v31  ;;  %v1426_v48 = vadd.f32 %v4618_v55, %v1425_v33  ;;  %2461 = vmatprep.mubr.f32.mxu0 %v4065_v61  ;;  %v5000_v33 = vld [vmem:[#allocation24_spill] sm:$0xff] }
 0x224   : > { %v1650_v52 = vpop.f32.mrf.mxu1  ;;  %2682 = vmatmul.mubr.f32.gmra.mxu1 %v3687_v30  ;;  %v1427_v38 = vpop.f32.mrf.mxu0 }
 0x225   : > { %v1651_v5 = vadd.f32 %v1650_v52, %v1426_v48  ;;  %2686 = vmatprep.mubr.f32.mxu1 %v4094_v4 }
 0x226   : > { %v1652_v0 = vpop.f32.mrf.mxu1  ;;  %v1828_v2 = vpop.f32.mrf.mxu0  ;;  %2462 = vmatmul.mubr.f32.gmra.mxu0 %v3673_v13 }
 0x227   : > { %2971 = vst [vmem:[%s4086_s27 + $0x1f8] sm:$0xff] %v1651_v5  ;;  %v1829_v59 = vadd.f32 %v4618_v55, %v1828_v2  ;;  %2466 = vmatprep.mubr.f32.mxu0 %v4995_v20  ;;  %v5001_v2 = vld [vmem:[#allocation25_spill] sm:$0xff] }
 0x228   : > { %v2053_v7 = vpop.f32.mrf.mxu1  ;;  %2687 = vmatmul.mubr.f32.gmra.mxu1 %v3700_v44  ;;  %v1830_v61 = vpop.f32.mrf.mxu0 }
 0x229   : > { %v2054_v39 = vadd.f32 %v2053_v7, %v1829_v59  ;;  %2691 = vmatprep.mubr.f32.mxu1 %v4996_v49 }
 0x22a   : > { %v2055_v9 = vpop.f32.mrf.mxu1  ;;  %v1833_v14 = vpop.f32.mrf.mxu0  ;;  %2467 = vmatmul.mubr.f32.gmra.mxu0 %v3687_v30 }
 0x22b   : > { %2972 = vst [vmem:[%s4086_s27 + $0x200] sm:$0xff] %v2054_v39  ;;  %v1834_v13 = vadd.f32 %v4618_v55, %v1833_v14  ;;  %2471 = vmatprep.mubr.f32.mxu0 %v4094_v4  ;;  %v5002_v9 = vld [vmem:[#allocation26_spill] sm:$0xff] }
 0x22c   : > { %v2058_v24 = vpop.f32.mrf.mxu1  ;;  %2692 = vmatmul.mubr.f32.gmra.mxu1 %v3714_v58  ;;  %v1835_v10 = vpop.f32.mrf.mxu0 }
 0x22d   : > { %v2059_v18 = vadd.f32 %v2058_v24, %v1834_v13  ;;  %2696 = vmatprep.mubr.f32.mxu1 %v4120_v37 }
 0x22e   : > { %v2060_v45 = vpop.f32.mrf.mxu1  ;;  %v1838_v47 = vpop.f32.mrf.mxu0  ;;  %2472 = vmatmul.mubr.f32.gmra.mxu0 %v3700_v44 }
 0x22f   : > { %2973 = vst [vmem:[%s4086_s27 + $0x208] sm:$0xff] %v2059_v18  ;;  %v1839_v30 = vadd.f32 %v4618_v55, %v1838_v47  ;;  %2476 = vmatprep.mubr.f32.mxu0 %v4996_v49  ;;  %v5003_v45 = vld [vmem:[#allocation27_spill] sm:$0xff] }
 0x230   : > { %v2063_v26 = vpop.f32.mrf.mxu1  ;;  %2697 = vmatmul.mubr.f32.gmra.mxu1 %v3727_v11  ;;  %v1840_v4 = vpop.f32.mrf.mxu0 }
 0x231   : > { %v2064_v15 = vadd.f32 %v2063_v26, %v1839_v30  ;;  %2701 = vmatprep.mubr.f32.mxu1 %v4997_v62  ;;  %v5004_v4 = vld [vmem:[#allocation9_spill] sm:$0xff] }
 0x232   : > { %v2065_v21 = vpop.f32.mrf.mxu1  ;;  %v1843_v29 = vpop.f32.mrf.mxu0  ;;  %2477 = vmatmul.mubr.f32.gmra.mxu0 %v3714_v58 }
 0x233   : > { %2974 = vst [vmem:[%s4086_s27 + $0x210] sm:$0xff] %v2064_v15  ;;  %v1844_v44 = vadd.f32 %v4618_v55, %v1843_v29  ;;  %2481 = vmatprep.mubr.f32.mxu0 %v4120_v37  ;;  %v5005_v21 = vld [vmem:[#allocation8_spill] sm:$0xff] }
 0x234   : > { %v2068_v41 = vpop.f32.mrf.mxu1  ;;  %2702 = vmatmul.mubr.f32.gmra.mxu1 %v3741_v35  ;;  %v1845_v51 = vpop.f32.mrf.mxu0 }
 0x235   : > { %v2069_v22 = vadd.f32 %v2068_v41, %v1844_v44  ;;  %2706 = vmatprep.mubr.f32.mxu1 %v4146_v12  ;;  %v5006_v51 = vld [vmem:[#allocation10_spill] sm:$0xff] }
 0x236   : > { %v2070_v56 = vpop.f32.mrf.mxu1  ;;  %v1848_v34 = vpop.f32.mrf.mxu0  ;;  %2482 = vmatmul.mubr.f32.gmra.mxu0 %v3727_v11 }
 0x237   : > { %2975 = vst [vmem:[%s4086_s27 + $0x218] sm:$0xff] %v2069_v22  ;;  %v1849_v58 = vadd.f32 %v4618_v55, %v1848_v34  ;;  %2486 = vmatprep.mubr.f32.mxu0 %v4997_v62  ;;  %v5007_v34 = vld [vmem:[#allocation28_spill] sm:$0xff] }
 0x238   : > { %v2073_v19 = vpop.f32.mrf.mxu1  ;;  %2707 = vmatmul.mubr.f32.gmra.mxu1 %v3754_v3  ;;  %v1850_v37 = vpop.f32.mrf.mxu0 }
 0x239   : > { %v2074_v36 = vadd.f32 %v2073_v19, %v1849_v58  ;;  %2711 = vmatprep.mubr.f32.mxu1 %v4998_v16  ;;  %v2245_v58 = vrot.slane %v4499_v43, 1  ;;  %v2246_v19 = vrot.slane %v4511_v28, 1 }
 0x23a   : > { %v2075_v27 = vpop.f32.mrf.mxu1  ;;  %v1853_v57 = vpop.f32.mrf.mxu0  ;;  %2487 = vmatmul.mubr.f32.gmra.mxu0 %v3741_v35 }
 0x23b   : > { %2976 = vst [vmem:[%s4086_s27 + $0x220] sm:$0xff] %v2074_v36  ;;  %v1854_v11 = vadd.f32 %v4618_v55, %v1853_v57  ;;  %2491 = vmatprep.mubr.f32.mxu0 %v4146_v12 }
 0x23c   : > { %v2078_v54 = vpop.f32.mrf.mxu1  ;;  %2712 = vmatmul.mubr.f32.gmra.mxu1 %v3768_v42  ;;  %v1855_v50 = vpop.f32.mrf.mxu0 }
 0x23d   : > { %v2079_v46 = vadd.f32 %v2078_v54, %v1854_v11  ;;  %2716 = vmatprep.mubr.f32.mxu1 %v4999_v60  ;;  %v5008_v11 = vld [vmem:[#allocation11_spill] sm:$0xff] }
 0x23e   : > { %v2080_v8 = vpop.f32.mrf.mxu1  ;;  %v1858_v31 = vpop.f32.mrf.mxu0  ;;  %2492 = vmatmul.mubr.f32.gmra.mxu0 %v3754_v3 }
 0x23f   : > { %2977 = vst [vmem:[%s4086_s27 + $0x228] sm:$0xff] %v2079_v46  ;;  %v1859_v35 = vadd.f32 %v4618_v55, %v1858_v31  ;;  %2496 = vmatprep.mubr.f32.mxu0 %v4998_v16  ;;  %v2247_v46 = vsel %vm345_vm0, %v2245_v58, %v2246_v19 }
 0x240   : > { %v2083_v20 = vpop.f32.mrf.mxu1  ;;  %2717 = vmatmul.mubr.f32.gmra.mxu1 %v3781_v6  ;;  %v1860_v12 = vpop.f32.mrf.mxu0 }
 0x241   : > { %v2084_v63 = vadd.f32 %v2083_v20, %v1859_v35  ;;  %2721 = vmatprep.mubr.f32.mxu1 %v5000_v33 }
 0x242   : > { %v2085_v48 = vpop.f32.mrf.mxu1  ;;  %v1863_v52 = vpop.f32.mrf.mxu0  ;;  %2497 = vmatmul.mubr.f32.gmra.mxu0 %v3768_v42 }
 0x243   : > { %2978 = vst [vmem:[%s4086_s27 + $0x230] sm:$0xff] %v2084_v63  ;;  %v1864_v3 = vadd.f32 %v4618_v55, %v1863_v52  ;;  %2501 = vmatprep.mubr.f32.mxu0 %v4999_v60  ;;  %v2248_v60 = vrot.slane %v1693_v25, 1 }
 0x244   : > { %v2088_v38 = vpop.f32.mrf.mxu1  ;;  %2722 = vmatmul.mubr.f32.gmra.mxu1 %v3795_v23  ;;  %v1865_v5 = vpop.f32.mrf.mxu0 }
 0x245   : > { %v2089_v0 = vadd.f32 %v2088_v38, %v1864_v3  ;;  %2726 = vmatprep.mubr.f32.mxu1 %v5001_v2 }
 0x246   : > { %v2090_v59 = vpop.f32.mrf.mxu1  ;;  %v1868_v7 = vpop.f32.mrf.mxu0  ;;  %2502 = vmatmul.mubr.f32.gmra.mxu0 %v3781_v6 }
 0x247   : > { %2979 = vst [vmem:[%s4086_s27 + $0x238] sm:$0xff] %v2089_v0  ;;  %v1869_v42 = vadd.f32 %v4618_v55, %v1868_v7  ;;  %2506 = vmatprep.mubr.f32.mxu0 %v5000_v33  ;;  %v2249_v33 = vsel %vm345_vm0, %v2246_v19, %v2248_v60 }
 0x248   : > { %v2093_v61 = vpop.f32.mrf.mxu1  ;;  %2727 = vmatmul.mubr.f32.gmra.mxu1 %v3808_v32  ;;  %v1870_v39 = vpop.f32.mrf.mxu0 }
 0x249   : > { %v2094_v49 = vadd.f32 %v2093_v61, %v1869_v42  ;;  %2731 = vmatprep.mubr.f32.mxu1 %v5002_v9 }
 0x24a   : > { %v2095_v14 = vpop.f32.mrf.mxu1  ;;  %v1873_v13 = vpop.f32.mrf.mxu0  ;;  %2507 = vmatmul.mubr.f32.gmra.mxu0 %v3795_v23 }
 0x24b   : > { %2980 = vst [vmem:[%s4086_s27 + $0x240] sm:$0xff] %v2094_v49  ;;  %v1874_v6 = vadd.f32 %v4618_v55, %v1873_v13  ;;  %2511 = vmatprep.mubr.f32.mxu0 %v5001_v2 }
 0x24c   : > { %v2098_v24 = vpop.f32.mrf.mxu1  ;;  %2732 = vmatmul.mubr.f32.gmra.mxu1 %v3822_v17  ;;  %v1875_v10 = vpop.f32.mrf.mxu0 }
 0x24d   : > { %v2099_v18 = vadd.f32 %v2098_v24, %v1874_v6  ;;  %2736 = vmatprep.mubr.f32.mxu1 %v5003_v45 }
 0x24e   : > { %v2100_v47 = vpop.f32.mrf.mxu1  ;;  %v1878_v30 = vpop.f32.mrf.mxu0  ;;  %2512 = vmatmul.mubr.f32.gmra.mxu0 %v3808_v32 }
 0x24f   : > { %2981 = vst [vmem:[%s4086_s27 + $0x248] sm:$0xff] %v2099_v18  ;;  %v1879_v23 = vadd.f32 %v4618_v55, %v1878_v30  ;;  %2516 = vmatprep.mubr.f32.mxu0 %v5002_v9 }
 0x250   : > { %v2103_v26 = vpop.f32.mrf.mxu1  ;;  %2737 = vmatmul.mubr.f32.gmra.mxu1 %v5004_v4  ;;  %v1880_v15 = vpop.f32.mrf.mxu0 }
 0x251   : > { %v2104_v62 = vadd.f32 %v2103_v26, %v1879_v23  ;;  %2741 = vmatprep.mubr.f32.mxu1 %v5005_v21 }
 0x252   : > { %v2105_v29 = vpop.f32.mrf.mxu1  ;;  %v1883_v44 = vpop.f32.mrf.mxu0  ;;  %2517 = vmatmul.mubr.f32.gmra.mxu0 %v3822_v17 }
 0x253   : > { %2982 = vst [vmem:[%s4086_s27 + $0x250] sm:$0xff] %v2104_v62  ;;  %v1884_v32 = vadd.f32 %v4618_v55, %v1883_v44  ;;  %2521 = vmatprep.mubr.f32.mxu0 %v5003_v45 }
 0x254   : > { %v2108_v41 = vpop.f32.mrf.mxu1  ;;  %2742 = vmatmul.mubr.f32.gmra.mxu1 %v5006_v51  ;;  %v1885_v22 = vpop.f32.mrf.mxu0 }
 0x255   : > { %v2109_v56 = vadd.f32 %v2108_v41, %v1884_v32  ;;  %2746 = vmatprep.mubr.f32.mxu1 %v5007_v34 }
 0x256   : > { %v2110_v37 = vpop.f32.mrf.mxu1  ;;  %v1888_v36 = vpop.f32.mrf.mxu0  ;;  %2522 = vmatmul.mubr.f32.gmra.mxu0 %v5004_v4 }
 0x257   : > { %2983 = vst [vmem:[%s4086_s27 + $0x258] sm:$0xff] %v2109_v56  ;;  %v1889_v17 = vadd.f32 %v4618_v55, %v1888_v36  ;;  %2526 = vmatprep.mubr.f32.mxu0 %v5005_v21 }
 0x258   : > { %v2113_v16 = vpop.f32.mrf.mxu1  ;;  %2747 = vmatmul.mubr.f32.gmra.mxu1 %v3859_v1  ;;  %v1890_v27 = vpop.f32.mrf.mxu0 }
 0x259   : > { %v2114_v57 = vadd.f32 %v2113_v16, %v1889_v17  ;;  %2751 = vmatprep.mubr.f32.mxu1 %v5008_v11 }
 0x25a   : > { %v2115_v54 = vpop.f32.mrf.mxu1  ;;  %v1893_v50 = vpop.f32.mrf.mxu0  ;;  %2527 = vmatmul.mubr.f32.gmra.mxu0 %v5006_v51 }
 0x25b   : > { %2984 = vst [vmem:[%s4086_s27 + $0x260] sm:$0xff] %v2114_v57  ;;  %v1894_v8 = vadd.f32 %v4618_v55, %v1893_v50  ;;  %2531 = vmatprep.mubr.f32.mxu0 %v5007_v34 }
 0x25c   : > { %v2118_v31 = vpop.f32.mrf.mxu1  ;;  %2752 = vmatmul.mubr.f32.gmra.mxu1 %v3871_v40  ;;  %v1895_v35 = vpop.f32.mrf.mxu0 }
 0x25d   : > { %v2119_v20 = vadd.f32 %v2118_v31, %v1894_v8  ;;  %2756 = vmatprep.mubr.f32.mxu1 %v2247_v46 }
 0x25e   : > { %v2120_v12 = vpop.f32.mrf.mxu1  ;;  %v1898_v63 = vpop.f32.mrf.mxu0  ;;  %2532 = vmatmul.mubr.f32.gmra.mxu0 %v3859_v1 }
 0x25f   : > { %2985 = vst [vmem:[%s4086_s27 + $0x268] sm:$0xff] %v2119_v20  ;;  %v1899_v53 = vadd.f32 %v4618_v55, %v1898_v63  ;;  %2536 = vmatprep.mubr.f32.mxu0 %v5008_v11 }
 0x260   : > { %v2123_v25 = vpop.f32.mrf.mxu1  ;;  %2757 = vmatmul.mubr.f32.gmra.mxu1 %v4499_v43  ;;  %v1900_v48 = vpop.f32.mrf.mxu0 }
 0x261   : > { %v2124_v52 = vadd.f32 %v2123_v25, %v1899_v53  ;;  %2761 = vmatprep.mubr.f32.mxu1 %v2249_v33 }
 0x262   : > { %v2125_v3 = vpop.f32.mrf.mxu1  ;;  %v1903_v38 = vpop.f32.mrf.mxu0  ;;  %2537 = vmatmul.mubr.f32.gmra.mxu0 %v3871_v40 }
 0x263   : > { %2986 = vst [vmem:[%s4086_s27 + $0x270] sm:$0xff] %v2124_v52  ;;  %v1904_v1 = vadd.f32 %v4618_v55, %v1903_v38 }
 0x264   : > { %v2128_v5 = vpop.f32.mrf.mxu1  ;;  %2762 = vmatmul.mubr.f32.gmra.mxu1 %v4511_v28  ;;  %v1905_v0 = vpop.f32.mrf.mxu0 }
 0x265   : > { %v2129_v2 = vadd.f32 %v2128_v5, %v1904_v1 }
 0x266   : > { %v2130_v59 = vpop.f32.mrf.mxu1  ;;  %v1908_v7 = vpop.f32.mrf.mxu0 }
 0x267   : > { %2987 = vst [vmem:[%s4086_s27 + $0x278] sm:$0xff] %v2129_v2  ;;  %v1909_v43 = vadd.f32 %v4618_v55, %v1908_v7 }
 0x268   : > { %v2133_v42 = vpop.f32.mrf.mxu1  ;;  %v1910_v61 = vpop.f32.mrf.mxu0 }
 0x269   : > { %v2134_v39 = vadd.f32 %v2133_v42, %v1909_v43 }
 0x26a   : > { %v2135_v49 = vpop.f32.mrf.mxu1  ;;  %v1913_v40 = vpop.f32.mrf.mxu0 }
 0x26b   : > { %2988 = vst [vmem:[%s4086_s27 + $0x280] sm:$0xff] %v2134_v39  ;;  %v1914_v9 = vadd.f32 %v4618_v55, %v1913_v40 }
 0x26c   : > { %v2138_v14 = vpop.f32.mrf.mxu1  ;;  %v1915_v13 = vpop.f32.mrf.mxu0 }
 0x26d   : > { %v2139_v28 = vadd.f32 %v2138_v14, %v1914_v9 }
 0x26e   : > { %v2140_v6 = vpop.f32.mrf.mxu1  ;;  %v1918_v24 = vpop.f32.mrf.mxu0 }
 0x26f   : > { %2989 = vst [vmem:[%s4086_s27 + $0x288] sm:$0xff] %v2139_v28  ;;  %v1919_v10 = vadd.f32 %v4618_v55, %v1918_v24 }
 0x270   : > { %v2143_v18 = vpop.f32.mrf.mxu1  ;;  %v1920_v45 = vpop.f32.mrf.mxu0 }
 0x271   : > { %v2144_v47 = vadd.f32 %v2143_v18, %v1919_v10 }
 0x272   : > { %v2145_v30 = vpop.f32.mrf.mxu1  ;;  %v1923_v23 = vpop.f32.mrf.mxu0 }
 0x273   : > { %2990 = vst [vmem:[%s4086_s27 + $0x290] sm:$0xff] %v2144_v47  ;;  %v1924_v26 = vadd.f32 %v4618_v55, %v1923_v23 }
 0x274   : > { %v2148_v4 = vpop.f32.mrf.mxu1  ;;  %v1925_v15 = vpop.f32.mrf.mxu0 }
 0x275   : > { %v2149_v62 = vadd.f32 %v2148_v4, %v1924_v26 }
 0x276   : > { %v2150_v21 = vpop.f32.mrf.mxu1  ;;  %v1928_v29 = vpop.f32.mrf.mxu0 }
 0x277   : > { %2991 = vst [vmem:[%s4086_s27 + $0x298] sm:$0xff] %v2149_v62  ;;  %v1929_v44 = vadd.f32 %v4618_v55, %v1928_v29 }
 0x278   : > { %v2153_v32 = vpop.f32.mrf.mxu1  ;;  %v1930_v41 = vpop.f32.mrf.mxu0 }
 0x279   : > { %v2154_v51 = vadd.f32 %v2153_v32, %v1929_v44 }
 0x27a   : > { %v2155_v22 = vpop.f32.mrf.mxu1  ;;  %v1933_v56 = vpop.f32.mrf.mxu0 }
 0x27b   : > { %2992 = vst [vmem:[%s4086_s27 + $0x2a0] sm:$0xff] %v2154_v51  ;;  %v1934_v34 = vadd.f32 %v4618_v55, %v1933_v56 }
 0x27c   : > { %v2158_v58 = vpop.f32.mrf.mxu1  ;;  %v1935_v19 = vpop.f32.mrf.mxu0 }
 0x27d   : > { %v2159_v37 = vadd.f32 %v2158_v58, %v1934_v34 }
 0x27e   : > { %v2160_v36 = vpop.f32.mrf.mxu1  ;;  %v1938_v17 = vpop.f32.mrf.mxu0 }
 0x27f   : > { %2993 = vst [vmem:[%s4086_s27 + $0x2a8] sm:$0xff] %v2159_v37  ;;  %v1939_v16 = vadd.f32 %v4618_v55, %v1938_v17 }
 0x280   : > { %v2163_v27 = vpop.f32.mrf.mxu1  ;;  %v1940_v57 = vpop.f32.mrf.mxu0 }
 0x281   : > { %v2164_v11 = vadd.f32 %v2163_v27, %v1939_v16 }
 0x282   : > { %v2165_v54 = vpop.f32.mrf.mxu1  ;;  %v1943_v50 = vpop.f32.mrf.mxu0 }
 0x283   : > { %2994 = vst [vmem:[%s4086_s27 + $0x2b0] sm:$0xff] %v2164_v11  ;;  %v1944_v46 = vadd.f32 %v4618_v55, %v1943_v50 }
 0x284   : > { %v2168_v60 = vpop.f32.mrf.mxu1  ;;  %v1945_v8 = vpop.f32.mrf.mxu0 }
 0x285   : > { %v2169_v31 = vadd.f32 %v2168_v60, %v1944_v46 }
 0x286   : > { %v2170_v35 = vpop.f32.mrf.mxu1  ;;  %v1948_v20 = vpop.f32.mrf.mxu0 }
 0x287   : > { %2995 = vst [vmem:[%s4086_s27 + $0x2b8] sm:$0xff] %v2169_v31  ;;  %v1949_v12 = vadd.f32 %v4618_v55, %v1948_v20 }
 0x288   : > { %v2173_v63 = vpop.f32.mrf.mxu1  ;;  %v1950_v33 = vpop.f32.mrf.mxu0 }
 0x289   : > { %v2174_v53 = vadd.f32 %v2173_v63, %v1949_v12 }
 0x28a   : > { %v2175_v25 = vpop.f32.mrf.mxu1  ;;  %v1953_v48 = vpop.f32.mrf.mxu0 }
 0x28b   : > { %2996 = vst [vmem:[%s4086_s27 + $0x2c0] sm:$0xff] %v2174_v53  ;;  %v1954_v52 = vadd.f32 %v4618_v55, %v1953_v48 }
 0x28c   : > { %v2178_v3 = vpop.f32.mrf.mxu1  ;;  %v1955_v38 = vpop.f32.mrf.mxu0 }
 0x28d   : > { %v2179_v1 = vadd.f32 %v2178_v3, %v1954_v52 }
 0x28e   : > { %v2180_v5 = vpop.f32.mrf.mxu1  ;;  %v1958_v0 = vpop.f32.mrf.mxu0 }
 0x28f   : > { %2997 = vst [vmem:[%s4086_s27 + $0x2c8] sm:$0xff] %v2179_v1  ;;  %v1959_v2 = vadd.f32 %v4618_v55, %v1958_v0 }
 0x290   : > { %v2183_v59 = vpop.f32.mrf.mxu1  ;;  %v1960_v7 = vpop.f32.mrf.mxu0 }
 0x291   : > { %v2184_v43 = vadd.f32 %v2183_v59, %v1959_v2 }
 0x292   : > { %v2185_v42 = vpop.f32.mrf.mxu1  ;;  %v1963_v61 = vpop.f32.mrf.mxu0 }
 0x293   : > { %2998 = vst [vmem:[%s4086_s27 + $0x2d0] sm:$0xff] %v2184_v43  ;;  %v1964_v39 = vadd.f32 %v4618_v55, %v1963_v61 }
 0x294   : > { %v2188_v49 = vpop.f32.mrf.mxu1  ;;  %v1965_v40 = vpop.f32.mrf.mxu0 }
 0x295   : > { %v2189_v9 = vadd.f32 %v2188_v49, %v1964_v39 }
 0x296   : > { %v2190_v14 = vpop.f32.mrf.mxu1  ;;  %v1968_v13 = vpop.f32.mrf.mxu0 }
 0x297   : > { %2999 = vst [vmem:[%s4086_s27 + $0x2d8] sm:$0xff] %v2189_v9  ;;  %v1969_v28 = vadd.f32 %v4618_v55, %v1968_v13 }
 0x298   : > { %v2193_v6 = vpop.f32.mrf.mxu1  ;;  %v1970_v24 = vpop.f32.mrf.mxu0 }
 0x299   : > { %v2194_v10 = vadd.f32 %v2193_v6, %v1969_v28 }
 0x29a   : > { %v2195_v18 = vpop.f32.mrf.mxu1  ;;  %v1973_v45 = vpop.f32.mrf.mxu0 }
 0x29b   : > { %3000 = vst [vmem:[%s4086_s27 + $0x2e0] sm:$0xff] %v2194_v10  ;;  %v1974_v47 = vadd.f32 %v4618_v55, %v1973_v45 }
 0x29c   : > { %v2198_v30 = vpop.f32.mrf.mxu1  ;;  %v1975_v23 = vpop.f32.mrf.mxu0 }
 0x29d   : > { %v2199_v26 = vadd.f32 %v2198_v30, %v1974_v47 }
 0x29e   : > { %v2200_v4 = vpop.f32.mrf.mxu1  ;;  %v1978_v15 = vpop.f32.mrf.mxu0 }
 0x29f   : > { %3001 = vst [vmem:[%s4086_s27 + $0x2e8] sm:$0xff] %v2199_v26  ;;  %v1979_v62 = vadd.f32 %v4618_v55, %v1978_v15 }
 0x2a0   : > { %v2203_v21 = vpop.f32.mrf.mxu1  ;;  %v1980_v29 = vpop.f32.mrf.mxu0 }
 0x2a1   : > { %v2204_v44 = vadd.f32 %v2203_v21, %v1979_v62 }
 0x2a2   : > { %v2205_v32 = vpop.f32.mrf.mxu1  ;;  %v1983_v41 = vpop.f32.mrf.mxu0 }
 0x2a3   : > { %3002 = vst [vmem:[%s4086_s27 + $0x2f0] sm:$0xff] %v2204_v44  ;;  %v1984_v51 = vadd.f32 %v4618_v55, %v1983_v41 }
 0x2a4   : > { %v2208_v22 = vpop.f32.mrf.mxu1  ;;  %v1985_v56 = vpop.f32.mrf.mxu0 }
 0x2a5   : > { %v2209_v34 = vadd.f32 %v2208_v22, %v1984_v51 }
 0x2a6   : > { %v2210_v58 = vpop.f32.mrf.mxu1  ;;  %v2383_v19 = vpop.f32.mrf.mxu0 }
 0x2a7   : > { %3003 = vst [vmem:[%s4086_s27 + $0x2f8] sm:$0xff] %v2209_v34  ;;  %v2384_v37 = vadd.f32 %v4618_v55, %v2383_v19 }
 0x2a8   : > { %v2608_v36 = vpop.f32.mrf.mxu1  ;;  %v2385_v17 = vpop.f32.mrf.mxu0 }
 0x2a9   : > { %v2609_v16 = vadd.f32 %v2608_v36, %v2384_v37 }
 0x2aa   : > { %v2610_v27 = vpop.f32.mrf.mxu1  ;;  %v2388_v57 = vpop.f32.mrf.mxu0 }
 0x2ab   : > { %3004 = vst [vmem:[%s4086_s27 + $0x300] sm:$0xff] %v2609_v16  ;;  %v2389_v11 = vadd.f32 %v4618_v55, %v2388_v57 }
 0x2ac   : > { %v2613_v54 = vpop.f32.mrf.mxu1  ;;  %v2390_v50 = vpop.f32.mrf.mxu0 }
 0x2ad   : > { %v2614_v46 = vadd.f32 %v2613_v54, %v2389_v11 }
 0x2ae   : > { %v2615_v60 = vpop.f32.mrf.mxu1  ;;  %v2393_v8 = vpop.f32.mrf.mxu0 }
 0x2af   : > { %3005 = vst [vmem:[%s4086_s27 + $0x308] sm:$0xff] %v2614_v46  ;;  %v2394_v31 = vadd.f32 %v4618_v55, %v2393_v8 }
 0x2b0   : > { %v2618_v35 = vpop.f32.mrf.mxu1  ;;  %v2395_v20 = vpop.f32.mrf.mxu0 }
 0x2b1   : > { %v2619_v12 = vadd.f32 %v2618_v35, %v2394_v31 }
 0x2b2   : > { %v2620_v63 = vpop.f32.mrf.mxu1  ;;  %v2398_v33 = vpop.f32.mrf.mxu0 }
 0x2b3   : > { %3006 = vst [vmem:[%s4086_s27 + $0x310] sm:$0xff] %v2619_v12  ;;  %v2399_v53 = vadd.f32 %v4618_v55, %v2398_v33 }
 0x2b4   : > { %v2623_v25 = vpop.f32.mrf.mxu1  ;;  %v2400_v48 = vpop.f32.mrf.mxu0 }
 0x2b5   : > { %v2624_v52 = vadd.f32 %v2623_v25, %v2399_v53 }
 0x2b6   : > { %v2625_v3 = vpop.f32.mrf.mxu1  ;;  %v2403_v38 = vpop.f32.mrf.mxu0 }
 0x2b7   : > { %3007 = vst [vmem:[%s4086_s27 + $0x318] sm:$0xff] %v2624_v52  ;;  %v2404_v1 = vadd.f32 %v4618_v55, %v2403_v38 }
 0x2b8   : > { %v2628_v5 = vpop.f32.mrf.mxu1  ;;  %v2405_v0 = vpop.f32.mrf.mxu0 }
 0x2b9   : > { %v2629_v2 = vadd.f32 %v2628_v5, %v2404_v1 }
 0x2ba   : > { %v2630_v59 = vpop.f32.mrf.mxu1  ;;  %v2408_v7 = vpop.f32.mrf.mxu0 }
 0x2bb   : > { %3008 = vst [vmem:[%s4086_s27 + $0x320] sm:$0xff] %v2629_v2  ;;  %v2409_v43 = vadd.f32 %v4618_v55, %v2408_v7 }
 0x2bc   : > { %v2633_v42 = vpop.f32.mrf.mxu1  ;;  %v2410_v61 = vpop.f32.mrf.mxu0 }
 0x2bd   : > { %v2634_v39 = vadd.f32 %v2633_v42, %v2409_v43 }
 0x2be   : > { %v2635_v49 = vpop.f32.mrf.mxu1  ;;  %v2413_v40 = vpop.f32.mrf.mxu0 }
 0x2bf   : > { %3009 = vst [vmem:[%s4086_s27 + $0x328] sm:$0xff] %v2634_v39  ;;  %v2414_v9 = vadd.f32 %v4618_v55, %v2413_v40 }
 0x2c0   : > { %v2638_v14 = vpop.f32.mrf.mxu1  ;;  %v2415_v13 = vpop.f32.mrf.mxu0 }
 0x2c1   : > { %v2639_v28 = vadd.f32 %v2638_v14, %v2414_v9 }
 0x2c2   : > { %v2640_v6 = vpop.f32.mrf.mxu1  ;;  %v2418_v24 = vpop.f32.mrf.mxu0 }
 0x2c3   : > { %3010 = vst [vmem:[%s4086_s27 + $0x330] sm:$0xff] %v2639_v28  ;;  %v2419_v10 = vadd.f32 %v4618_v55, %v2418_v24 }
 0x2c4   : > { %v2643_v18 = vpop.f32.mrf.mxu1  ;;  %v2420_v45 = vpop.f32.mrf.mxu0 }
 0x2c5   : > { %v2644_v47 = vadd.f32 %v2643_v18, %v2419_v10 }
 0x2c6   : > { %v2645_v30 = vpop.f32.mrf.mxu1  ;;  %v2423_v23 = vpop.f32.mrf.mxu0 }
 0x2c7   : > { %3011 = vst [vmem:[%s4086_s27 + $0x338] sm:$0xff] %v2644_v47  ;;  %v2424_v26 = vadd.f32 %v4618_v55, %v2423_v23 }
 0x2c8   : > { %v2648_v4 = vpop.f32.mrf.mxu1  ;;  %v2425_v15 = vpop.f32.mrf.mxu0 }
 0x2c9   : > { %v2649_v62 = vadd.f32 %v2648_v4, %v2424_v26 }
 0x2ca   : > { %v2650_v21 = vpop.f32.mrf.mxu1  ;;  %v2428_v29 = vpop.f32.mrf.mxu0 }
 0x2cb   : > { %3012 = vst [vmem:[%s4086_s27 + $0x340] sm:$0xff] %v2649_v62  ;;  %v2429_v44 = vadd.f32 %v4618_v55, %v2428_v29 }
 0x2cc   : > { %v2653_v32 = vpop.f32.mrf.mxu1  ;;  %v2430_v41 = vpop.f32.mrf.mxu0 }
 0x2cd   : > { %v2654_v51 = vadd.f32 %v2653_v32, %v2429_v44 }
 0x2ce   : > { %v2655_v22 = vpop.f32.mrf.mxu1  ;;  %v2433_v56 = vpop.f32.mrf.mxu0 }
 0x2cf   : > { %3013 = vst [vmem:[%s4086_s27 + $0x348] sm:$0xff] %v2654_v51  ;;  %v2434_v34 = vadd.f32 %v4618_v55, %v2433_v56 }
 0x2d0   : > { %v2658_v58 = vpop.f32.mrf.mxu1  ;;  %v2435_v19 = vpop.f32.mrf.mxu0 }
 0x2d1   : > { %v2659_v37 = vadd.f32 %v2658_v58, %v2434_v34 }
 0x2d2   : > { %v2660_v36 = vpop.f32.mrf.mxu1  ;;  %v2438_v17 = vpop.f32.mrf.mxu0 }
 0x2d3   : > { %3014 = vst [vmem:[%s4086_s27 + $0x350] sm:$0xff] %v2659_v37  ;;  %v2439_v16 = vadd.f32 %v4618_v55, %v2438_v17 }
 0x2d4   : > { %v2663_v27 = vpop.f32.mrf.mxu1  ;;  %v2440_v57 = vpop.f32.mrf.mxu0 }
 0x2d5   : > { %v2664_v11 = vadd.f32 %v2663_v27, %v2439_v16 }
 0x2d6   : > { %v2665_v54 = vpop.f32.mrf.mxu1  ;;  %v2443_v50 = vpop.f32.mrf.mxu0 }
 0x2d7   : > { %3015 = vst [vmem:[%s4086_s27 + $0x358] sm:$0xff] %v2664_v11  ;;  %v2444_v46 = vadd.f32 %v4618_v55, %v2443_v50 }
 0x2d8   : > { %v2668_v60 = vpop.f32.mrf.mxu1  ;;  %v2445_v8 = vpop.f32.mrf.mxu0 }
 0x2d9   : > { %v2669_v31 = vadd.f32 %v2668_v60, %v2444_v46 }
 0x2da   : > { %v2670_v35 = vpop.f32.mrf.mxu1  ;;  %v2448_v20 = vpop.f32.mrf.mxu0 }
 0x2db   : > { %3016 = vst [vmem:[%s4086_s27 + $0x360] sm:$0xff] %v2669_v31  ;;  %v2449_v12 = vadd.f32 %v4618_v55, %v2448_v20 }
 0x2dc   : > { %v2673_v63 = vpop.f32.mrf.mxu1  ;;  %v2450_v33 = vpop.f32.mrf.mxu0 }
 0x2dd   : > { %v2674_v53 = vadd.f32 %v2673_v63, %v2449_v12 }
 0x2de   : > { %v2675_v25 = vpop.f32.mrf.mxu1  ;;  %v2453_v48 = vpop.f32.mrf.mxu0 }
 0x2df   : > { %3017 = vst [vmem:[%s4086_s27 + $0x368] sm:$0xff] %v2674_v53  ;;  %v2454_v52 = vadd.f32 %v4618_v55, %v2453_v48 }
 0x2e0   : > { %v2678_v3 = vpop.f32.mrf.mxu1  ;;  %v2455_v38 = vpop.f32.mrf.mxu0 }
 0x2e1   : > { %v2679_v1 = vadd.f32 %v2678_v3, %v2454_v52 }
 0x2e2   : > { %v2680_v5 = vpop.f32.mrf.mxu1  ;;  %v2458_v0 = vpop.f32.mrf.mxu0 }
 0x2e3   : > { %3018 = vst [vmem:[%s4086_s27 + $0x370] sm:$0xff] %v2679_v1  ;;  %v2459_v2 = vadd.f32 %v4618_v55, %v2458_v0 }
 0x2e4   : > { %v2683_v59 = vpop.f32.mrf.mxu1  ;;  %v2460_v7 = vpop.f32.mrf.mxu0 }
 0x2e5   : > { %v2684_v43 = vadd.f32 %v2683_v59, %v2459_v2 }
 0x2e6   : > { %v2685_v42 = vpop.f32.mrf.mxu1  ;;  %v2463_v61 = vpop.f32.mrf.mxu0 }
 0x2e7   : > { %3019 = vst [vmem:[%s4086_s27 + $0x378] sm:$0xff] %v2684_v43  ;;  %v2464_v39 = vadd.f32 %v4618_v55, %v2463_v61 }
 0x2e8   : > { %v2688_v49 = vpop.f32.mrf.mxu1  ;;  %v2465_v40 = vpop.f32.mrf.mxu0 }
 0x2e9   : > { %v2689_v9 = vadd.f32 %v2688_v49, %v2464_v39 }
 0x2ea   : > { %v2690_v14 = vpop.f32.mrf.mxu1  ;;  %v2468_v13 = vpop.f32.mrf.mxu0 }
 0x2eb   : > { %3020 = vst [vmem:[%s4086_s27 + $0x380] sm:$0xff] %v2689_v9  ;;  %v2469_v28 = vadd.f32 %v4618_v55, %v2468_v13 }
 0x2ec   : > { %v2693_v6 = vpop.f32.mrf.mxu1  ;;  %v2470_v24 = vpop.f32.mrf.mxu0 }
 0x2ed   : > { %v2694_v10 = vadd.f32 %v2693_v6, %v2469_v28 }
 0x2ee   : > { %v2695_v18 = vpop.f32.mrf.mxu1  ;;  %v2473_v45 = vpop.f32.mrf.mxu0 }
 0x2ef   : > { %3021 = vst [vmem:[%s4086_s27 + $0x388] sm:$0xff] %v2694_v10  ;;  %v2474_v47 = vadd.f32 %v4618_v55, %v2473_v45 }
 0x2f0   : > { %v2698_v30 = vpop.f32.mrf.mxu1  ;;  %v2475_v23 = vpop.f32.mrf.mxu0 }
 0x2f1   : > { %v2699_v26 = vadd.f32 %v2698_v30, %v2474_v47 }
 0x2f2   : > { %v2700_v4 = vpop.f32.mrf.mxu1  ;;  %v2478_v15 = vpop.f32.mrf.mxu0 }
 0x2f3   : > { %3022 = vst [vmem:[%s4086_s27 + $0x390] sm:$0xff] %v2699_v26  ;;  %v2479_v62 = vadd.f32 %v4618_v55, %v2478_v15 }
 0x2f4   : > { %v2703_v21 = vpop.f32.mrf.mxu1  ;;  %v2480_v29 = vpop.f32.mrf.mxu0 }
 0x2f5   : > { %v2704_v44 = vadd.f32 %v2703_v21, %v2479_v62 }
 0x2f6   : > { %v2705_v32 = vpop.f32.mrf.mxu1  ;;  %v2483_v41 = vpop.f32.mrf.mxu0 }
 0x2f7   : > { %3023 = vst [vmem:[%s4086_s27 + $0x398] sm:$0xff] %v2704_v44  ;;  %v2484_v51 = vadd.f32 %v4618_v55, %v2483_v41 }
 0x2f8   : > { %v2708_v22 = vpop.f32.mrf.mxu1  ;;  %v2485_v56 = vpop.f32.mrf.mxu0 }
 0x2f9   : > { %v2709_v34 = vadd.f32 %v2708_v22, %v2484_v51 }
 0x2fa   : > { %v2710_v58 = vpop.f32.mrf.mxu1  ;;  %v2488_v19 = vpop.f32.mrf.mxu0 }
 0x2fb   : > { %3024 = vst [vmem:[%s4086_s27 + $0x3a0] sm:$0xff] %v2709_v34  ;;  %v2489_v37 = vadd.f32 %v4618_v55, %v2488_v19  ;;  %v3148_v34 = vld [vmem:[%s4879_s2] ss:$0 sm:$0xff] }
 0x2fc   : > { %v2713_v36 = vpop.f32.mrf.mxu1  ;;  %v2490_v17 = vpop.f32.mrf.mxu0 }
 0x2fd   : > { %v2714_v16 = vadd.f32 %v2713_v36, %v2489_v37 }
 0x2fe   : > { %v2715_v27 = vpop.f32.mrf.mxu1  ;;  %v2493_v57 = vpop.f32.mrf.mxu0 }
 0x2ff   : > { %3025 = vst [vmem:[%s4086_s27 + $0x3a8] sm:$0xff] %v2714_v16  ;;  %v2494_v11 = vadd.f32 %v4618_v55, %v2493_v57 }
 0x300   : > { %v2718_v54 = vpop.f32.mrf.mxu1  ;;  %v2495_v50 = vpop.f32.mrf.mxu0 }
 0x301   : > { %v2719_v46 = vadd.f32 %v2718_v54, %v2494_v11 }
 0x302   : > { %v2720_v60 = vpop.f32.mrf.mxu1  ;;  %v2498_v8 = vpop.f32.mrf.mxu0 }
 0x303   : > { %3026 = vst [vmem:[%s4086_s27 + $0x3b0] sm:$0xff] %v2719_v46  ;;  %v2499_v31 = vadd.f32 %v4618_v55, %v2498_v8 }
 0x304   : > { %v2723_v35 = vpop.f32.mrf.mxu1  ;;  %v2500_v20 = vpop.f32.mrf.mxu0 }
 0x305   : > { %v2724_v12 = vadd.f32 %v2723_v35, %v2499_v31 }
 0x306   : > { %v2725_v63 = vpop.f32.mrf.mxu1  ;;  %v2503_v33 = vpop.f32.mrf.mxu0 }
 0x307   : > { %3027 = vst [vmem:[%s4086_s27 + $0x3b8] sm:$0xff] %v2724_v12  ;;  %v2504_v53 = vadd.f32 %v4618_v55, %v2503_v33 }
 0x308   : > { %v2728_v25 = vpop.f32.mrf.mxu1  ;;  %v2505_v48 = vpop.f32.mrf.mxu0 }
 0x309   : > { %v2729_v52 = vadd.f32 %v2728_v25, %v2504_v53 }
 0x30a   : > { %v2730_v3 = vpop.f32.mrf.mxu1  ;;  %v2508_v38 = vpop.f32.mrf.mxu0 }
 0x30b   : > { %3028 = vst [vmem:[%s4086_s27 + $0x3c0] sm:$0xff] %v2729_v52  ;;  %v2509_v1 = vadd.f32 %v4618_v55, %v2508_v38 }
 0x30c   : > { %v2733_v5 = vpop.f32.mrf.mxu1  ;;  %v2510_v0 = vpop.f32.mrf.mxu0 }
 0x30d   : > { %v2734_v2 = vadd.f32 %v2733_v5, %v2509_v1 }
 0x30e   : > { %v2735_v59 = vpop.f32.mrf.mxu1  ;;  %v2513_v7 = vpop.f32.mrf.mxu0 }
 0x30f   : > { %3029 = vst [vmem:[%s4086_s27 + $0x3c8] sm:$0xff] %v2734_v2  ;;  %v2514_v43 = vadd.f32 %v4618_v55, %v2513_v7 }
 0x310   : > { %v2738_v42 = vpop.f32.mrf.mxu1  ;;  %v2515_v61 = vpop.f32.mrf.mxu0 }
 0x311   : > { %v2739_v39 = vadd.f32 %v2738_v42, %v2514_v43 }
 0x312   : > { %v2740_v49 = vpop.f32.mrf.mxu1  ;;  %v2518_v40 = vpop.f32.mrf.mxu0 }
 0x313   : > { %3030 = vst [vmem:[%s4086_s27 + $0x3d0] sm:$0xff] %v2739_v39  ;;  %v2519_v9 = vadd.f32 %v4618_v55, %v2518_v40 }
 0x314   : > { %v2743_v14 = vpop.f32.mrf.mxu1  ;;  %v2520_v13 = vpop.f32.mrf.mxu0 }
 0x315   : > { %v2744_v28 = vadd.f32 %v2743_v14, %v2519_v9 }
 0x316   : > { %v2745_v6 = vpop.f32.mrf.mxu1  ;;  %v2523_v24 = vpop.f32.mrf.mxu0 }
 0x317   : > { %3031 = vst [vmem:[%s4086_s27 + $0x3d8] sm:$0xff] %v2744_v28  ;;  %v2524_v10 = vadd.f32 %v4618_v55, %v2523_v24 }
 0x318   : > { %v2748_v18 = vpop.f32.mrf.mxu1  ;;  %v2525_v45 = vpop.f32.mrf.mxu0 }
 0x319   : > { %v2749_v47 = vadd.f32 %v2748_v18, %v2524_v10 }
 0x31a   : > { %v2750_v30 = vpop.f32.mrf.mxu1  ;;  %v2528_v23 = vpop.f32.mrf.mxu0 }
 0x31b   : > { %3032 = vst [vmem:[%s4086_s27 + $0x3e0] sm:$0xff] %v2749_v47  ;;  %v2529_v26 = vadd.f32 %v4618_v55, %v2528_v23 }
 0x31c   : > { %v2753_v4 = vpop.f32.mrf.mxu1  ;;  %v2530_v15 = vpop.f32.mrf.mxu0 }
 0x31d   : > { %v2754_v62 = vadd.f32 %v2753_v4, %v2529_v26 }
 0x31e   : > { %v2755_v21 = vpop.f32.mrf.mxu1  ;;  %v2533_v29 = vpop.f32.mrf.mxu0 }
 0x31f   : > { %3033 = vst [vmem:[%s4086_s27 + $0x3e8] sm:$0xff] %v2754_v62  ;;  %v2534_v44 = vadd.f32 %v4618_v55, %v2533_v29 }
 0x320   : > { %v2758_v32 = vpop.f32.mrf.mxu1  ;;  %v2535_v41 = vpop.f32.mrf.mxu0 }
 0x321   : > { %v2759_v51 = vadd.f32 %v2758_v32, %v2534_v44 }
 0x322   : > { %v2760_v22 = vpop.f32.mrf.mxu1  ;;  %v2538_v56 = vpop.f32.mrf.mxu0 }
 0x323   : > { %3034 = vst [vmem:[%s4086_s27 + $0x3f0] sm:$0xff] %v2759_v51  ;;  %v2539_v58 = vadd.f32 %v3148_v34, %v2538_v56 }
 0x324   : > { %v2763_v19 = vpop.f32.mrf.mxu1  ;;  %v2540_v37 = vpop.f32.mrf.mxu0 }
 0x325   : > { %v2764_v55 = vadd.f32 %v2763_v19, %v2539_v58 }
 0x326   : > { %v2765_v36 = vpop.f32.mrf.mxu1 }
 0x327   : > { %3035 = vst [vmem:[%s4086_s27 + $0x3f8] sm:$0xff] %v2764_v55 }
 0x328   : > { %3188 = shalt.err (!%p3185_p3)
}
 0x329   : > { %s3189_s19 = scalar_lea.hbm %s4825_s11, 16384  ;;  %s3193_s29 = scalar_lea.hbm %s4880_s3, 32768 }
 0x32a   : > { %p3190_p5 = scmp.ne.s32.totalorder %s4825_s11, %s3189_s19  ;;  %p3194_p9 = scmp.lt.s32.totalorder %s4825_s11, %s4880_s3 }
 0x32b   : > { %p3195_p10 = scmp.lt.s32.totalorder %s3193_s29, %s3189_s19 }
 0x32c   : > { %p3191_p6 = pnand %p3190_p5, %p3324_p4 }
 0x32d   : > { %p3196_p11 = por %p3195_p10, %p3194_p9 }
 0x32e   : > { %p3192_p7 = pneg %p3191_p6 }
 0x330   : > { %p3197_p12 = pnand %p3196_p11, %p3192_p7 }
 0x332   : > { %3200 = shalt.err (!%p3197_p12)
}
 0x333   : > { %s3262_s5 = smov 128   ;;  %s3263_s7 = smov 8  }
 0x334   : > { %3047 = dma.vmem_to_hbm [thread:$0]  (%p3324_p4), %s4827_s6, 16384, %s4825_s11, %s4832_s15, %s3262_s5, %s3262_s5, %s3263_s7  }
 0x335 PF: > { %p3059_p13 = scmp.ge.s32.totalorder %s3255_s17, 2  ;;  %s2832_s8 = sand.u32 1, %s3235_s12  }
 0x336   : > { %s2833_s9 = scalar_lea.sflag [#allocation4], %s2832_s8 }
 0x337   : > { %p3054_p0 = pnand %p3059_p13, %p3331_p8 }
 0x339   : > { %p3055_p1 = pneg %p3054_p0 }
 0x33b   : > { %3230 = dma.done.wait (%p3055_p1), %s2833_s9, 16384  }
 0x33c   : > { %3232 = vsyncadd (%p3055_p1), %s2833_s9, 4294950912  ;;  %s17_s17 = sadd.s32 1, %s3255_s17   ;;  %s5009_s12 = smov %s3239_s13 }
 0x33d   : > { %p14_p2 = scmp.ge.s32.totalorder %s17_s17, 4   ;;  %s5010_s13 = smov %s3243_s14 }
 0x33e   : > { %s5011_s14 = smov %s3337_s25  ;;  %s5012_s15 = smov %s3251_s16 }
 0x33f   : > { %s5013_s16 = smov %s5015_s20  ;;  %16 = sbr.rel (!%p14_p2) target bundleno = 5 (0x5), region = 82 }
 0x344   :  { %2838 = vsyncpa [#allocation3], 1 }
 0x345   :  { %2840 = vsyncpa [#allocation3 + $0x1], 1 }
 0x346   :  { %2841 = vsyncpa [#allocation4], 1 }
 0x347   :  { %2843 = vsyncpa [#allocation4 + $0x1], 1 }

</bundles_post_ra>
